<compile_context>
chip_gen: v7x
topology: tpu7x:2x2x1
jax: 0.10.0
libtpu: 0.0.40
codegen_flags: <defaults>
</compile_context>

<pallas_src>
import functools

import numpy as np

import jax
import jax.numpy as jnp
from jax.experimental import pallas as pl
from jax.experimental.pallas import tpu as pltpu


_SCALES = (1, 2, 3, 6)                     # AdaptiveAvgPool2d output sizes
_VMEM_LIMIT = 32 * 1024 * 1024             # <= half of v7x's 64 MiB physical VMEM


# -----------------------------------------------------------------------------
# Kernels
# -----------------------------------------------------------------------------
def _conv3x3_kernel(xp_ref, w_ref, shift_ref, alpha_ref, o_ref, *, hband):
    """3x3 conv (pad=1) + folded BN + PReLU for one image / one Cout tile.

    xp_ref : (H+2, W+2, Cin) zero-padded input
    w_ref  : (3, 3, Cin, Cout_tile) BN-folded weight
    o_ref  : (H*W, Cout_tile) spatially-flattened output
    """
    Hp, Wp, Cin = xp_ref.shape
    H, W = Hp - 2, Wp - 2
    Cout = o_ref.shape[-1]
    rows = hband * W
    nbands = H // hband

    shift = shift_ref[...]            # (1, Cout_tile)
    alpha = alpha_ref[0]              # PReLU slope (scalar, SMEM)

    def band(i, carry):
        h0 = i * hband
        acc = jnp.zeros((rows, Cout), jnp.float32)
        for kh in range(3):           # 9 taps: statically unrolled
            for kw in range(3):
                xs = xp_ref[pl.ds(h0 + kh, hband), pl.ds(kw, W), :]   # (hband, W, Cin)
                acc = acc + jnp.dot(xs.reshape(rows, Cin), w_ref[kh, kw],
                                    preferred_element_type=jnp.float32)
        y = acc + shift
        y = jnp.where(y >= 0.0, y, alpha * y)
        r0 = pl.multiple_of(i * rows, rows)
        o_ref[pl.ds(r0, rows), :] = y.astype(o_ref.dtype)             # slab store
        return carry

    jax.lax.fori_loop(0, nbands, band, 0)


def _pool_kernel(pool_ref, x_ref, o_ref):
    """All four adaptive average pools as one matmul: (50, H*W) @ (H*W, C)."""
    o_ref[...] = jnp.dot(pool_ref[...], x_ref[...],
                         preferred_element_type=jnp.float32).astype(o_ref.dtype)


def _branch_kernel(p_ref, w1_ref, wf_ref, s1_ref, a1_ref, o_ref):
    """Per-scale 1x1 conv + folded BN + PReLU, then projection through the
    matching row block of the fuse weight:  z = PReLU(p @ W1 + s1) @ Wf_k."""
    y = jnp.dot(p_ref[...], w1_ref[...], preferred_element_type=jnp.float32)
    y = y + s1_ref[...]
    a = a1_ref[0]
    y = jnp.where(y >= 0.0, y, a * y)
    o_ref[...] = jnp.dot(y, wf_ref[...],
                         preferred_element_type=jnp.float32).astype(o_ref.dtype)


def _fuse_kernel(up_ref, z_ref, sf_ref, af_ref, o_ref):
    """Bilinear upsample of all branches + fuse 1x1 conv + BN + PReLU:
    out = PReLU(UP_tile @ Z_b + shift_f)."""
    y = jnp.dot(up_ref[...], z_ref[...], preferred_element_type=jnp.float32)
    y = y + sf_ref[...]
    a = af_ref[0]
    o_ref[...] = jnp.where(y >= 0.0, y, a * y).astype(o_ref.dtype)


# -----------------------------------------------------------------------------
# pallas_call wrappers
# -----------------------------------------------------------------------------
def _cout_tile(c):
    return 128 if (c > 128 and c % 128 == 0) else c


def _pick_hband(h, w):
    """Largest divisor of h with hband*w <= 1024 rows (bounded VMEM accumulator,
    but still >=128 MXU rows whenever possible)."""
    best = 1
    for d in range(1, h + 1):
        if h % d == 0 and d * w <= 1024:
            best = d
    return best


def conv3x3_bn_prelu(x_nhwc, w, shift, alpha):
    B, H, W, Cin = x_nhwc.shape
    Cout = w.shape[-1]
    tc = _cout_tile(Cout)
    hband = _pick_hband(H, W)
    xp = jnp.pad(x_nhwc, ((0, 0), (1, 1), (1, 1), (0, 0)))    # zero "same" padding

    kernel = functools.partial(_conv3x3_kernel, hband=hband)
    out = pl.pallas_call(
        kernel,
        out_shape=jax.ShapeDtypeStruct((B, H * W, Cout), jnp.float32),
        grid_spec=pltpu.PrefetchScalarGridSpec(
            num_scalar_prefetch=0,
            grid=(B, Cout // tc),
            in_specs=[
                pl.BlockSpec((pl.Squeezed(), H + 2, W + 2, Cin),
                             lambda b, co: (b, 0, 0, 0)),
                pl.BlockSpec((3, 3, Cin, tc), lambda b, co: (0, 0, 0, co)),
                pl.BlockSpec((1, tc), lambda b, co: (0, co)),
                pl.BlockSpec(memory_space=pltpu.MemorySpace.SMEM),
            ],
            out_specs=pl.BlockSpec((pl.Squeezed(), H * W, tc),
                                   lambda b, co: (b, 0, co)),
        ),
        compiler_params=pltpu.CompilerParams(
            dimension_semantics=("parallel", "parallel"),
            vmem_limit_bytes=_VMEM_LIMIT),
    )(xp, w, shift, alpha)
    return out                                                 # (B, H*W, Cout)


def adaptive_pool_all(x_flat, pool_mat):
    B, HW, C = x_flat.shape
    R = pool_mat.shape[0]
    tc = _cout_tile(C)
    return pl.pallas_call(
        _pool_kernel,
        out_shape=jax.ShapeDtypeStruct((B, R, C), jnp.float32),
        grid_spec=pltpu.PrefetchScalarGridSpec(
            num_scalar_prefetch=0,
            grid=(B, C // tc),
            in_specs=[
                pl.BlockSpec((R, HW), lambda b, c: (0, 0)),
                pl.BlockSpec((pl.Squeezed(), HW, tc), lambda b, c: (b, 0, c)),
            ],
            out_specs=pl.BlockSpec((pl.Squeezed(), R, tc), lambda b, c: (b, 0, c)),
        ),
        compiler_params=pltpu.CompilerParams(
            dimension_semantics=("parallel", "parallel"),
            vmem_limit_bytes=_VMEM_LIMIT),
    )(pool_mat, x_flat)                                        # (B, 50, C)


def branch_1x1_fused(pooled_flat, w1, wf_chunk, shift1, alpha1):
    M, D = pooled_flat.shape
    return pl.pallas_call(
        _branch_kernel,
        out_shape=jax.ShapeDtypeStruct((M, D), jnp.float32),
        grid_spec=pltpu.PrefetchScalarGridSpec(
            num_scalar_prefetch=0,
            grid=(1,),
            in_specs=[
                pl.BlockSpec((M, D), lambda i: (0, 0)),
                pl.BlockSpec((D, D), lambda i: (0, 0)),
                pl.BlockSpec((D, D), lambda i: (0, 0)),
                pl.BlockSpec((1, D), lambda i: (0, 0)),
                pl.BlockSpec(memory_space=pltpu.MemorySpace.SMEM),
            ],
            out_specs=pl.BlockSpec((M, D), lambda i: (0, 0)),
        ),
        compiler_params=pltpu.CompilerParams(
            dimension_semantics=("arbitrary",),
            vmem_limit_bytes=_VMEM_LIMIT),
    )(pooled_flat, w1, wf_chunk, shift1, alpha1)


def fuse_upsample_conv(up_mat, z, shift_f, alpha_f):
    B, KK, D = z.shape
    M = up_mat.shape[0]
    tm = M if M <= 1024 else 1024
    mpad = ((M + tm - 1) // tm) * tm
    if mpad != M:                       # only the small constant matrix is padded
        up_mat = jnp.pad(up_mat, ((0, mpad - M), (0, 0)))

    out = pl.pallas_call(
        _fuse_kernel,
        out_shape=jax.ShapeDtypeStruct((B, mpad, D), jnp.float32),
        grid_spec=pltpu.PrefetchScalarGridSpec(
            num_scalar_prefetch=0,
            grid=(B, mpad // tm),
            in_specs=[
                pl.BlockSpec((tm, KK), lambda b, t: (t, 0)),
                pl.BlockSpec((pl.Squeezed(), KK, D), lambda b, t: (b, 0, 0)),
                pl.BlockSpec((1, D), lambda b, t: (0, 0)),
                pl.BlockSpec(memory_space=pltpu.MemorySpace.SMEM),
            ],
            out_specs=pl.BlockSpec((pl.Squeezed(), tm, D), lambda b, t: (b, t, 0)),
        ),
        compiler_params=pltpu.CompilerParams(
            dimension_semantics=("parallel", "parallel"),
            vmem_limit_bytes=_VMEM_LIMIT),
    )(up_mat, z, shift_f, alpha_f)
    return out[:, :M, :]                                       # (B, H*W, D)


# -----------------------------------------------------------------------------
# Host-side constant matrices (adaptive pooling / bilinear upsampling)
# -----------------------------------------------------------------------------
def _adaptive_pool_matrix(out_size, in_size):
    """Row i averages input rows [floor(i*in/out), ceil((i+1)*in/out))."""
    m = np.zeros((out_size, in_size), np.float32)
    for i in range(out_size):
        s = (i * in_size) // out_size
        e = -((-(i + 1) * in_size) // out_size)
        m[i, s:e] = 1.0 / float(e - s)
    return m


def _bilinear_matrix(out_size, in_size):
    """Bilinear interpolation weights, align_corners=False (F.upsample default)."""
    m = np.zeros((out_size, in_size), np.float32)
    if in_size == 1:
        m[:, 0] = 1.0
        return m
    scale = in_size / out_size
    for i in range(out_size):
        src = max((i + 0.5) * scale - 0.5, 0.0)
        p0 = min(int(np.floor(src)), in_size - 1)
        p1 = min(p0 + 1, in_size - 1)
        lam = src - p0
        m[i, p0] += 1.0 - lam
        m[i, p1] += lam
    return m


def build_consts(H, W):
    pool_rows, up_cols, offsets = [], [], []
    off = 0
    for k in _SCALES:
        ph = _adaptive_pool_matrix(k, H)            # (k, H)
        pw = _adaptive_pool_matrix(k, W)            # (k, W)
        pool_rows.append(np.einsum("ph,qw->pqhw", ph, pw).reshape(k * k, H * W))
        wh = _bilinear_matrix(H, k)                 # (H, k)
        ww = _bilinear_matrix(W, k)                 # (W, k)
        up_cols.append(np.einsum("ip,jq->ijpq", wh, ww).reshape(H * W, k * k))
        offsets.append((off, k * k))
        off += k * k
    return {
        "pool": jnp.asarray(np.concatenate(pool_rows, axis=0), jnp.float32),  # (50, H*W)
        "up": jnp.asarray(np.concatenate(up_cols, axis=1), jnp.float32),      # (H*W, 50)
        "offsets": tuple(offsets),
    }


# -----------------------------------------------------------------------------
# PPM forward
# -----------------------------------------------------------------------------
def ppm_forward(x_nchw, params, consts):
    B, _, H, W = x_nchw.shape
    D = params["down"][0].shape[-1]
    x = jnp.transpose(x_nchw, (0, 2, 3, 1)).astype(jnp.float32)     # NCHW -> NHWC

    # down_conv: 3x3 conv + BN + PReLU -> spatially flattened (B, H*W, D)
    xf = conv3x3_bn_prelu(x, *params["down"])

    # all four adaptive average pools in a single pass over xf -> (B, 50, D)
    pooled = adaptive_pool_all(xf, consts["pool"])

    # per-scale 1x1 conv + BN + PReLU, pre-projected through the matching row
    # block of the (BN-folded) fuse weight, so the upsampled branches and their
    # channel concat never have to be materialised.
    zs = []
    for bi, (off, cnt) in enumerate(consts["offsets"]):
        pk = pooled[:, off:off + cnt, :].reshape(B * cnt, D)
        w1, s1, a1 = params["branch"][bi]
        zk = branch_1x1_fused(pk, w1, params["fuse_w_chunks"][bi], s1, a1)
        zs.append(zk.reshape(B, cnt, D))
    z = jnp.concatenate(zs, axis=1)                                 # (B, 50, D) tiny

    # bilinear upsample + concat + fuse 1x1 conv + BN + PReLU in one kernel
    out = fuse_upsample_conv(consts["up"], z, params["fuse_shift"], params["fuse_alpha"])
    out = out.reshape(B, H, W, D)
    return jnp.transpose(out, (0, 3, 1, 2))                         # NHWC -> NCHW


# -----------------------------------------------------------------------------
# Deterministic synthetic parameters (mirrors the __init__ shapes, BN folded)
# -----------------------------------------------------------------------------
def init_params(key, in_dim, down_dim):
    D = down_dim
    eps = 1e-5

    def bn_fold(k, c):
        k1, k2, k3, k4 = jax.random.split(k, 4)
        gamma = 1.0 + 0.1 * jax.random.normal(k1, (c,))
        beta = 0.1 * jax.random.normal(k2, (c,))
        mean = 0.1 * jax.random.normal(k3, (c,))
        var = jnp.abs(1.0 + 0.1 * jax.random.normal(k4, (c,)))
        scale = gamma / jnp.sqrt(var + eps)
        shift = beta - mean * scale
        return scale, shift

    def conv_bn_prelu(k, cin, cout, ksize):
        k1, k2, k3 = jax.random.split(k, 3)
        fan_in = cin * ksize * ksize
        if ksize == 1:
            w = jax.random.normal(k1, (cin, cout)) / jnp.sqrt(fan_in)
        else:
            w = jax.random.normal(k1, (ksize, ksize, cin, cout)) / jnp.sqrt(fan_in)
        b = 0.1 * jax.random.normal(k2, (cout,))
        scale, shift = bn_fold(k3, cout)
        w_fold = (w * scale).astype(jnp.float32)                     # BN scale into weight
        shift_fold = (b * scale + shift).reshape(1, cout).astype(jnp.float32)
        alpha = jnp.array([0.25], jnp.float32)                       # PReLU default
        return w_fold, shift_fold, alpha

    keys = jax.random.split(key, 6)
    down = conv_bn_prelu(keys[0], in_dim, D, 3)
    branches = tuple(conv_bn_prelu(keys[i + 1], D, D, 1) for i in range(4))
    fw, fshift, falpha = conv_bn_prelu(keys[5], 4 * D, D, 1)
    fuse_chunks = tuple(fw[i * D:(i + 1) * D, :] for i in range(4))
    return {
        "down": down,
        "branch": branches,
        "fuse_w_chunks": fuse_chunks,
        "fuse_shift": fshift,
        "fuse_alpha": falpha,
    }


if __name__ == "__main__":
    key = jax.random.PRNGKey(0)
    kx, kp = jax.random.split(key)

    # Small synthetic stand-in (the real module uses in_dim=2048, down_dim=512).
    B, in_dim, H, W = 2, 128, 16, 16
    down_dim = 128

    x = jax.random.normal(kx, (B, in_dim, H, W), jnp.float32)
    params = init_params(kp, in_dim, down_dim)
    consts = build_consts(H, W)

    fwd = jax.jit(functools.partial(ppm_forward, params=params, consts=consts))
    out = jax.block_until_ready(fwd(x))

    assert out.shape == (B, down_dim, H, W), out.shape
    assert bool(jnp.isfinite(out).all())
    print("KERNEL_OK")
</pallas_src>

<mosaic_0001>
module attributes {stable_mosaic.version = 11 : i64} {
  func.func @_conv3x3_kernel(%arg0: i32, %arg1: i32, %arg2: memref<1x18x18x128xf32, #tpu.memory_space<vmem>>, %arg3: memref<3x3x128x128xf32, #tpu.memory_space<vmem>>, %arg4: memref<1x128xf32, #tpu.memory_space<vmem>>, %arg5: memref<1xf32, #tpu.memory_space<smem>>, %arg6: memref<1x256x128xf32, #tpu.memory_space<vmem>>) attributes {dimension_semantics = [#tpu.dimension_semantics<parallel>, #tpu.dimension_semantics<parallel>], iteration_bounds = array<i64: 2, 1>, scalar_prefetch = 0 : i64, scratch_operands = 0 : i64, tpu.core_type = #tpu.core_type<tc>, window_params = [{transform_indices = @transform_0, window_bounds = array<i64: 1, 18, 18, 128>}, {transform_indices = @transform_1, window_bounds = array<i64: 3, 3, 128, 128>}, {transform_indices = @transform_2, window_bounds = array<i64: 1, 128>}, {transform_indices = @transform_3, window_bounds = array<i64: 1>}, {transform_indices = @transform_4, window_bounds = array<i64: 1, 256, 128>}]} {
    %c0 = arith.constant 0 : index
    %c0_0 = arith.constant 0 : index
    %0 = vector.load %arg4[%c0, %c0_0] : memref<1x128xf32, #tpu.memory_space<vmem>>, vector<1x128xf32>
    %c0_1 = arith.constant 0 : index
    %1 = memref.load %arg5[%c0_1] : memref<1xf32, #tpu.memory_space<smem>>
    %c0_i32 = arith.constant 0 : i32
    %c16_i32 = arith.constant 16 : i32
    %2 = arith.muli %c0_i32, %c16_i32 : i32
    %cst = arith.constant 0.000000e+00 : f32
    %3 = vector.broadcast %cst : f32 to vector<256x128xf32>
    %c0_i32_2 = arith.constant 0 : i32
    %4 = arith.addi %2, %c0_i32_2 : i32
    %c0_3 = arith.constant 0 : index
    %5 = arith.index_cast %4 : i32 to index
    %c0_4 = arith.constant 0 : index
    %c0_5 = arith.constant 0 : index
    %6 = vector.load %arg2[%c0_3, %5, %c0_4, %c0_5] : memref<1x18x18x128xf32, #tpu.memory_space<vmem>>, vector<1x16x16x128xf32>
    %7 = vector.shape_cast %6 : vector<1x16x16x128xf32> to vector<16x16x128xf32>
    %8 = vector.shape_cast %7 : vector<16x16x128xf32> to vector<256x128xf32>
    %c0_6 = arith.constant 0 : index
    %c0_7 = arith.constant 0 : index
    %c0_8 = arith.constant 0 : index
    %c0_9 = arith.constant 0 : index
    %9 = vector.load %arg3[%c0_6, %c0_7, %c0_8, %c0_9] : memref<3x3x128x128xf32, #tpu.memory_space<vmem>>, vector<1x1x128x128xf32>
    %10 = vector.shape_cast %9 : vector<1x1x128x128xf32> to vector<128x128xf32>
    %cst_10 = arith.constant dense<0.000000e+00> : vector<256x128xf32>
    %11 = tpu.matmul %8, %10, %cst_10 {dimension_numbers = #tpu.dot_dimension_numbers<[1], [0], [0], [1], [0, 0, 1, 1], [], []>} : vector<256x128xf32>, vector<128x128xf32>, vector<256x128xf32> -> vector<256x128xf32>
    %12 = arith.addf %3, %11 : vector<256x128xf32>
    %c0_i32_11 = arith.constant 0 : i32
    %13 = arith.addi %2, %c0_i32_11 : i32
    %c0_12 = arith.constant 0 : index
    %14 = arith.index_cast %13 : i32 to index
    %c1 = arith.constant 1 : index
    %c0_13 = arith.constant 0 : index
    %15 = vector.load %arg2[%c0_12, %14, %c1, %c0_13] : memref<1x18x18x128xf32, #tpu.memory_space<vmem>>, vector<1x16x16x128xf32>
    %16 = vector.shape_cast %15 : vector<1x16x16x128xf32> to vector<16x16x128xf32>
    %17 = vector.shape_cast %16 : vector<16x16x128xf32> to vector<256x128xf32>
    %c0_14 = arith.constant 0 : index
    %c1_15 = arith.constant 1 : index
    %c0_16 = arith.constant 0 : index
    %c0_17 = arith.constant 0 : index
    %18 = vector.load %arg3[%c0_14, %c1_15, %c0_16, %c0_17] : memref<3x3x128x128xf32, #tpu.memory_space<vmem>>, vector<1x1x128x128xf32>
    %19 = vector.shape_cast %18 : vector<1x1x128x128xf32> to vector<128x128xf32>
    %cst_18 = arith.constant dense<0.000000e+00> : vector<256x128xf32>
    %20 = tpu.matmul %17, %19, %cst_18 {dimension_numbers = #tpu.dot_dimension_numbers<[1], [0], [0], [1], [0, 0, 1, 1], [], []>} : vector<256x128xf32>, vector<128x128xf32>, vector<256x128xf32> -> vector<256x128xf32>
    %21 = arith.addf %12, %20 : vector<256x128xf32>
    %c0_i32_19 = arith.constant 0 : i32
    %22 = arith.addi %2, %c0_i32_19 : i32
    %c0_20 = arith.constant 0 : index
    %23 = arith.index_cast %22 : i32 to index
    %c2 = arith.constant 2 : index
    %c0_21 = arith.constant 0 : index
    %24 = vector.load %arg2[%c0_20, %23, %c2, %c0_21] : memref<1x18x18x128xf32, #tpu.memory_space<vmem>>, vector<1x16x16x128xf32>
    %25 = vector.shape_cast %24 : vector<1x16x16x128xf32> to vector<16x16x128xf32>
    %26 = vector.shape_cast %25 : vector<16x16x128xf32> to vector<256x128xf32>
    %c0_22 = arith.constant 0 : index
    %c2_23 = arith.constant 2 : index
    %c0_24 = arith.constant 0 : index
    %c0_25 = arith.constant 0 : index
    %27 = vector.load %arg3[%c0_22, %c2_23, %c0_24, %c0_25] : memref<3x3x128x128xf32, #tpu.memory_space<vmem>>, vector<1x1x128x128xf32>
    %28 = vector.shape_cast %27 : vector<1x1x128x128xf32> to vector<128x128xf32>
    %cst_26 = arith.constant dense<0.000000e+00> : vector<256x128xf32>
    %29 = tpu.matmul %26, %28, %cst_26 {dimension_numbers = #tpu.dot_dimension_numbers<[1], [0], [0], [1], [0, 0, 1, 1], [], []>} : vector<256x128xf32>, vector<128x128xf32>, vector<256x128xf32> -> vector<256x128xf32>
    %30 = arith.addf %21, %29 : vector<256x128xf32>
    %c1_i32 = arith.constant 1 : i32
    %31 = arith.addi %2, %c1_i32 : i32
    %c0_27 = arith.constant 0 : index
    %32 = arith.index_cast %31 : i32 to index
    %c0_28 = arith.constant 0 : index
    %c0_29 = arith.constant 0 : index
    %33 = vector.load %arg2[%c0_27, %32, %c0_28, %c0_29] : memref<1x18x18x128xf32, #tpu.memory_space<vmem>>, vector<1x16x16x128xf32>
    %34 = vector.shape_cast %33 : vector<1x16x16x128xf32> to vector<16x16x128xf32>
    %35 = vector.shape_cast %34 : vector<16x16x128xf32> to vector<256x128xf32>
    %c1_30 = arith.constant 1 : index
    %c0_31 = arith.constant 0 : index
    %c0_32 = arith.constant 0 : index
    %c0_33 = arith.constant 0 : index
    %36 = vector.load %arg3[%c1_30, %c0_31, %c0_32, %c0_33] : memref<3x3x128x128xf32, #tpu.memory_space<vmem>>, vector<1x1x128x128xf32>
    %37 = vector.shape_cast %36 : vector<1x1x128x128xf32> to vector<128x128xf32>
    %cst_34 = arith.constant dense<0.000000e+00> : vector<256x128xf32>
    %38 = tpu.matmul %35, %37, %cst_34 {dimension_numbers = #tpu.dot_dimension_numbers<[1], [0], [0], [1], [0, 0, 1, 1], [], []>} : vector<256x128xf32>, vector<128x128xf32>, vector<256x128xf32> -> vector<256x128xf32>
    %39 = arith.addf %30, %38 : vector<256x128xf32>
    %c1_i32_35 = arith.constant 1 : i32
    %40 = arith.addi %2, %c1_i32_35 : i32
    %c0_36 = arith.constant 0 : index
    %41 = arith.index_cast %40 : i32 to index
    %c1_37 = arith.constant 1 : index
    %c0_38 = arith.constant 0 : index
    %42 = vector.load %arg2[%c0_36, %41, %c1_37, %c0_38] : memref<1x18x18x128xf32, #tpu.memory_space<vmem>>, vector<1x16x16x128xf32>
    %43 = vector.shape_cast %42 : vector<1x16x16x128xf32> to vector<16x16x128xf32>
    %44 = vector.shape_cast %43 : vector<16x16x128xf32> to vector<256x128xf32>
    %c1_39 = arith.constant 1 : index
    %c1_40 = arith.constant 1 : index
    %c0_41 = arith.constant 0 : index
    %c0_42 = arith.constant 0 : index
    %45 = vector.load %arg3[%c1_39, %c1_40, %c0_41, %c0_42] : memref<3x3x128x128xf32, #tpu.memory_space<vmem>>, vector<1x1x128x128xf32>
    %46 = vector.shape_cast %45 : vector<1x1x128x128xf32> to vector<128x128xf32>
    %cst_43 = arith.constant dense<0.000000e+00> : vector<256x128xf32>
    %47 = tpu.matmul %44, %46, %cst_43 {dimension_numbers = #tpu.dot_dimension_numbers<[1], [0], [0], [1], [0, 0, 1, 1], [], []>} : vector<256x128xf32>, vector<128x128xf32>, vector<256x128xf32> -> vector<256x128xf32>
    %48 = arith.addf %39, %47 : vector<256x128xf32>
    %c1_i32_44 = arith.constant 1 : i32
    %49 = arith.addi %2, %c1_i32_44 : i32
    %c0_45 = arith.constant 0 : index
    %50 = arith.index_cast %49 : i32 to index
    %c2_46 = arith.constant 2 : index
    %c0_47 = arith.constant 0 : index
    %51 = vector.load %arg2[%c0_45, %50, %c2_46, %c0_47] : memref<1x18x18x128xf32, #tpu.memory_space<vmem>>, vector<1x16x16x128xf32>
    %52 = vector.shape_cast %51 : vector<1x16x16x128xf32> to vector<16x16x128xf32>
    %53 = vector.shape_cast %52 : vector<16x16x128xf32> to vector<256x128xf32>
    %c1_48 = arith.constant 1 : index
    %c2_49 = arith.constant 2 : index
    %c0_50 = arith.constant 0 : index
    %c0_51 = arith.constant 0 : index
    %54 = vector.load %arg3[%c1_48, %c2_49, %c0_50, %c0_51] : memref<3x3x128x128xf32, #tpu.memory_space<vmem>>, vector<1x1x128x128xf32>
    %55 = vector.shape_cast %54 : vector<1x1x128x128xf32> to vector<128x128xf32>
    %cst_52 = arith.constant dense<0.000000e+00> : vector<256x128xf32>
    %56 = tpu.matmul %53, %55, %cst_52 {dimension_numbers = #tpu.dot_dimension_numbers<[1], [0], [0], [1], [0, 0, 1, 1], [], []>} : vector<256x128xf32>, vector<128x128xf32>, vector<256x128xf32> -> vector<256x128xf32>
    %57 = arith.addf %48, %56 : vector<256x128xf32>
    %c2_i32 = arith.constant 2 : i32
    %58 = arith.addi %2, %c2_i32 : i32
    %c0_53 = arith.constant 0 : index
    %59 = arith.index_cast %58 : i32 to index
    %c0_54 = arith.constant 0 : index
    %c0_55 = arith.constant 0 : index
    %60 = vector.load %arg2[%c0_53, %59, %c0_54, %c0_55] : memref<1x18x18x128xf32, #tpu.memory_space<vmem>>, vector<1x16x16x128xf32>
    %61 = vector.shape_cast %60 : vector<1x16x16x128xf32> to vector<16x16x128xf32>
    %62 = vector.shape_cast %61 : vector<16x16x128xf32> to vector<256x128xf32>
    %c2_56 = arith.constant 2 : index
    %c0_57 = arith.constant 0 : index
    %c0_58 = arith.constant 0 : index
    %c0_59 = arith.constant 0 : index
    %63 = vector.load %arg3[%c2_56, %c0_57, %c0_58, %c0_59] : memref<3x3x128x128xf32, #tpu.memory_space<vmem>>, vector<1x1x128x128xf32>
    %64 = vector.shape_cast %63 : vector<1x1x128x128xf32> to vector<128x128xf32>
    %cst_60 = arith.constant dense<0.000000e+00> : vector<256x128xf32>
    %65 = tpu.matmul %62, %64, %cst_60 {dimension_numbers = #tpu.dot_dimension_numbers<[1], [0], [0], [1], [0, 0, 1, 1], [], []>} : vector<256x128xf32>, vector<128x128xf32>, vector<256x128xf32> -> vector<256x128xf32>
    %66 = arith.addf %57, %65 : vector<256x128xf32>
    %c2_i32_61 = arith.constant 2 : i32
    %67 = arith.addi %2, %c2_i32_61 : i32
    %c0_62 = arith.constant 0 : index
    %68 = arith.index_cast %67 : i32 to index
    %c1_63 = arith.constant 1 : index
    %c0_64 = arith.constant 0 : index
    %69 = vector.load %arg2[%c0_62, %68, %c1_63, %c0_64] : memref<1x18x18x128xf32, #tpu.memory_space<vmem>>, vector<1x16x16x128xf32>
    %70 = vector.shape_cast %69 : vector<1x16x16x128xf32> to vector<16x16x128xf32>
    %71 = vector.shape_cast %70 : vector<16x16x128xf32> to vector<256x128xf32>
    %c2_65 = arith.constant 2 : index
    %c1_66 = arith.constant 1 : index
    %c0_67 = arith.constant 0 : index
    %c0_68 = arith.constant 0 : index
    %72 = vector.load %arg3[%c2_65, %c1_66, %c0_67, %c0_68] : memref<3x3x128x128xf32, #tpu.memory_space<vmem>>, vector<1x1x128x128xf32>
    %73 = vector.shape_cast %72 : vector<1x1x128x128xf32> to vector<128x128xf32>
    %cst_69 = arith.constant dense<0.000000e+00> : vector<256x128xf32>
    %74 = tpu.matmul %71, %73, %cst_69 {dimension_numbers = #tpu.dot_dimension_numbers<[1], [0], [0], [1], [0, 0, 1, 1], [], []>} : vector<256x128xf32>, vector<128x128xf32>, vector<256x128xf32> -> vector<256x128xf32>
    %75 = arith.addf %66, %74 : vector<256x128xf32>
    %c2_i32_70 = arith.constant 2 : i32
    %76 = arith.addi %2, %c2_i32_70 : i32
    %c0_71 = arith.constant 0 : index
    %77 = arith.index_cast %76 : i32 to index
    %c2_72 = arith.constant 2 : index
    %c0_73 = arith.constant 0 : index
    %78 = vector.load %arg2[%c0_71, %77, %c2_72, %c0_73] : memref<1x18x18x128xf32, #tpu.memory_space<vmem>>, vector<1x16x16x128xf32>
    %79 = vector.shape_cast %78 : vector<1x16x16x128xf32> to vector<16x16x128xf32>
    %80 = vector.shape_cast %79 : vector<16x16x128xf32> to vector<256x128xf32>
    %c2_74 = arith.constant 2 : index
    %c2_75 = arith.constant 2 : index
    %c0_76 = arith.constant 0 : index
    %c0_77 = arith.constant 0 : index
    %81 = vector.load %arg3[%c2_74, %c2_75, %c0_76, %c0_77] : memref<3x3x128x128xf32, #tpu.memory_space<vmem>>, vector<1x1x128x128xf32>
    %82 = vector.shape_cast %81 : vector<1x1x128x128xf32> to vector<128x128xf32>
    %cst_78 = arith.constant dense<0.000000e+00> : vector<256x128xf32>
    %83 = tpu.matmul %80, %82, %cst_78 {dimension_numbers = #tpu.dot_dimension_numbers<[1], [0], [0], [1], [0, 0, 1, 1], [], []>} : vector<256x128xf32>, vector<128x128xf32>, vector<256x128xf32> -> vector<256x128xf32>
    %84 = arith.addf %75, %83 : vector<256x128xf32>
    %85 = vector.broadcast %0 : vector<1x128xf32> to vector<256x128xf32>
    %86 = arith.addf %84, %85 : vector<256x128xf32>
    %cst_79 = arith.constant 0.000000e+00 : f32
    %87 = vector.broadcast %cst_79 : f32 to vector<256x128xf32>
    %88 = arith.cmpf oge, %86, %87 : vector<256x128xf32>
    %89 = vector.broadcast %1 : f32 to vector<256x128xf32>
    %90 = arith.mulf %89, %86 : vector<256x128xf32>
    %91 = arith.select %88, %86, %90 : vector<256x128xi1>, vector<256x128xf32>
    %c256_i32 = arith.constant 256 : i32
    %92 = arith.muli %c0_i32, %c256_i32 : i32
    %93 = tpu.assume_multiple %92, 256 : i32
    %c0_80 = arith.constant 0 : index
    %94 = arith.index_cast %93 : i32 to index
    %c0_81 = arith.constant 0 : index
    %95 = vector.load %arg6[%c0_80, %94, %c0_81] : memref<1x256x128xf32, #tpu.memory_space<vmem>>, vector<1x256x128xf32>
    %96 = vector.shape_cast %95 : vector<1x256x128xf32> to vector<256x128xf32>
    %97 = vector.shape_cast %91 : vector<256x128xf32> to vector<1x256x128xf32>
    tpu.vector_store %arg6[%c0_80, %94, %c0_81], %97 {strides = array<i32>} : memref<1x256x128xf32, #tpu.memory_space<vmem>>, vector<1x256x128xf32>,
    %c1_i32_82 = arith.constant 1 : i32
    return
  }
  func.func @transform_0(%arg0: i32, %arg1: i32) -> (i32, i32, i32, i32) {
    %c0_i32 = arith.constant 0 : i32
    %c0_i32_0 = arith.constant 0 : i32
    %c0_i32_1 = arith.constant 0 : i32
    %c0_i32_2 = arith.constant 0 : i32
    return %arg0, %c0_i32, %c0_i32_0, %c0_i32_1 : i32, i32, i32, i32
  }
  func.func @transform_1(%arg0: i32, %arg1: i32) -> (i32, i32, i32, i32) {
    %c0_i32 = arith.constant 0 : i32
    %c0_i32_0 = arith.constant 0 : i32
    %c0_i32_1 = arith.constant 0 : i32
    %c0_i32_2 = arith.constant 0 : i32
    return %c0_i32, %c0_i32_0, %c0_i32_1, %arg1 : i32, i32, i32, i32
  }
  func.func @transform_2(%arg0: i32, %arg1: i32) -> (i32, i32) {
    %c0_i32 = arith.constant 0 : i32
    %c0_i32_0 = arith.constant 0 : i32
    return %c0_i32, %arg1 : i32, i32
  }
  func.func @transform_3(%arg0: i32, %arg1: i32) -> i32 {
    %c0_i32 = arith.constant 0 : i32
    %c0_i32_0 = arith.constant 0 : i32
    return %c0_i32 : i32
  }
  func.func @transform_4(%arg0: i32, %arg1: i32) -> (i32, i32, i32) {
    %c0_i32 = arith.constant 0 : i32
    %c0_i32_0 = arith.constant 0 : i32
    return %arg0, %c0_i32, %arg1 : i32, i32, i32
  }
}

module attributes {stable_mosaic.version = 11 : i64} {
  func.func @_pool_kernel(%arg0: i32, %arg1: i32, %arg2: memref<50x256xf32, #tpu.memory_space<vmem>>, %arg3: memref<1x256x128xf32, #tpu.memory_space<vmem>>, %arg4: memref<1x50x128xf32, #tpu.memory_space<vmem>>) attributes {dimension_semantics = [#tpu.dimension_semantics<parallel>, #tpu.dimension_semantics<parallel>], iteration_bounds = array<i64: 2, 1>, scalar_prefetch = 0 : i64, scratch_operands = 0 : i64, tpu.core_type = #tpu.core_type<tc>, window_params = [{pipeline_mode = #tpu.pipeline_mode<synchronous>, transform_indices = @transform_0, window_bounds = array<i64: 50, 256>}, {transform_indices = @transform_1, window_bounds = array<i64: 1, 256, 128>}, {transform_indices = @transform_2, window_bounds = array<i64: 1, 50, 128>}]} {
    %c0 = arith.constant 0 : index
    %c0_0 = arith.constant 0 : index
    %0 = vector.load %arg2[%c0, %c0_0] : memref<50x256xf32, #tpu.memory_space<vmem>>, vector<50x256xf32>
    %c0_1 = arith.constant 0 : index
    %c0_2 = arith.constant 0 : index
    %c0_3 = arith.constant 0 : index
    %1 = vector.load %arg3[%c0_1, %c0_2, %c0_3] : memref<1x256x128xf32, #tpu.memory_space<vmem>>, vector<1x256x128xf32>
    %2 = vector.shape_cast %1 : vector<1x256x128xf32> to vector<256x128xf32>
    %cst = arith.constant dense<0.000000e+00> : vector<50x128xf32>
    %3 = tpu.matmul %0, %2, %cst {dimension_numbers = #tpu.dot_dimension_numbers<[1], [0], [0], [1], [0, 0, 1, 1], [], []>} : vector<50x256xf32>, vector<256x128xf32>, vector<50x128xf32> -> vector<50x128xf32>
    %c0_4 = arith.constant 0 : index
    %c0_5 = arith.constant 0 : index
    %c0_6 = arith.constant 0 : index
    %4 = vector.load %arg4[%c0_4, %c0_5, %c0_6] : memref<1x50x128xf32, #tpu.memory_space<vmem>>, vector<1x50x128xf32>
    %5 = vector.shape_cast %4 : vector<1x50x128xf32> to vector<50x128xf32>
    %6 = vector.shape_cast %3 : vector<50x128xf32> to vector<1x50x128xf32>
    tpu.vector_store %arg4[%c0_4, %c0_5, %c0_6], %6 {strides = array<i32>} : memref<1x50x128xf32, #tpu.memory_space<vmem>>, vector<1x50x128xf32>,
    return
  }
  func.func @transform_0(%arg0: i32, %arg1: i32) -> (i32, i32) {
    %c0_i32 = arith.constant 0 : i32
    %c0_i32_0 = arith.constant 0 : i32
    %c0_i32_1 = arith.constant 0 : i32
    return %c0_i32, %c0_i32_0 : i32, i32
  }
  func.func @transform_1(%arg0: i32, %arg1: i32) -> (i32, i32, i32) {
    %c0_i32 = arith.constant 0 : i32
    %c0_i32_0 = arith.constant 0 : i32
    return %arg0, %c0_i32, %arg1 : i32, i32, i32
  }
  func.func @transform_2(%arg0: i32, %arg1: i32) -> (i32, i32, i32) {
    %c0_i32 = arith.constant 0 : i32
    %c0_i32_0 = arith.constant 0 : i32
    return %arg0, %c0_i32, %arg1 : i32, i32, i32
  }
}

module attributes {stable_mosaic.version = 11 : i64} {
  func.func @_branch_kernel(%arg0: i32, %arg1: memref<2x128xf32, #tpu.memory_space<vmem>>, %arg2: memref<128x128xf32, #tpu.memory_space<vmem>>, %arg3: memref<128x128xf32, #tpu.memory_space<vmem>>, %arg4: memref<1x128xf32, #tpu.memory_space<vmem>>, %arg5: memref<1xf32, #tpu.memory_space<smem>>, %arg6: memref<2x128xf32, #tpu.memory_space<vmem>>) attributes {dimension_semantics = [#tpu.dimension_semantics<arbitrary>], iteration_bounds = array<i64: 1>, scalar_prefetch = 0 : i64, scratch_operands = 0 : i64, tpu.core_type = #tpu.core_type<tc>, window_params = [{pipeline_mode = #tpu.pipeline_mode<synchronous>, transform_indices = @transform_0, window_bounds = array<i64: 2, 128>}, {pipeline_mode = #tpu.pipeline_mode<synchronous>, transform_indices = @transform_1, window_bounds = array<i64: 128, 128>}, {pipeline_mode = #tpu.pipeline_mode<synchronous>, transform_indices = @transform_2, window_bounds = array<i64: 128, 128>}, {pipeline_mode = #tpu.pipeline_mode<synchronous>, transform_indices = @transform_3, window_bounds = array<i64: 1, 128>}, {transform_indices = @transform_4, window_bounds = array<i64: 1>}, {pipeline_mode = #tpu.pipeline_mode<synchronous>, transform_indices = @transform_5, window_bounds = array<i64: 2, 128>}]} {
    %c0 = arith.constant 0 : index
    %c0_0 = arith.constant 0 : index
    %0 = vector.load %arg1[%c0, %c0_0] : memref<2x128xf32, #tpu.memory_space<vmem>>, vector<2x128xf32>
    %c0_1 = arith.constant 0 : index
    %c0_2 = arith.constant 0 : index
    %1 = vector.load %arg2[%c0_1, %c0_2] : memref<128x128xf32, #tpu.memory_space<vmem>>, vector<128x128xf32>
    %cst = arith.constant dense<0.000000e+00> : vector<2x128xf32>
    %2 = tpu.matmul %0, %1, %cst {dimension_numbers = #tpu.dot_dimension_numbers<[1], [0], [0], [1], [0, 0, 1, 1], [], []>} : vector<2x128xf32>, vector<128x128xf32>, vector<2x128xf32> -> vector<2x128xf32>
    %c0_3 = arith.constant 0 : index
    %c0_4 = arith.constant 0 : index
    %3 = vector.load %arg4[%c0_3, %c0_4] : memref<1x128xf32, #tpu.memory_space<vmem>>, vector<1x128xf32>
    %4 = vector.broadcast %3 : vector<1x128xf32> to vector<2x128xf32>
    %5 = arith.addf %2, %4 : vector<2x128xf32>
    %c0_5 = arith.constant 0 : index
    %6 = memref.load %arg5[%c0_5] : memref<1xf32, #tpu.memory_space<smem>>
    %cst_6 = arith.constant 0.000000e+00 : f32
    %7 = vector.broadcast %cst_6 : f32 to vector<2x128xf32>
    %8 = arith.cmpf oge, %5, %7 : vector<2x128xf32>
    %9 = vector.broadcast %6 : f32 to vector<2x128xf32>
    %10 = arith.mulf %9, %5 : vector<2x128xf32>
    %11 = arith.select %8, %5, %10 : vector<2x128xi1>, vector<2x128xf32>
    %c0_7 = arith.constant 0 : index
    %c0_8 = arith.constant 0 : index
    %12 = vector.load %arg3[%c0_7, %c0_8] : memref<128x128xf32, #tpu.memory_space<vmem>>, vector<128x128xf32>
    %cst_9 = arith.constant dense<0.000000e+00> : vector<2x128xf32>
    %13 = tpu.matmul %11, %12, %cst_9 {dimension_numbers = #tpu.dot_dimension_numbers<[1], [0], [0], [1], [0, 0, 1, 1], [], []>} : vector<2x128xf32>, vector<128x128xf32>, vector<2x128xf32> -> vector<2x128xf32>
    %c0_10 = arith.constant 0 : index
    %c0_11 = arith.constant 0 : index
    %14 = vector.load %arg6[%c0_10, %c0_11] : memref<2x128xf32, #tpu.memory_space<vmem>>, vector<2x128xf32>
    tpu.vector_store %arg6[%c0_10, %c0_11], %13 {strides = array<i32>} : memref<2x128xf32, #tpu.memory_space<vmem>>, vector<2x128xf32>,
    return
  }
  func.func @transform_0(%arg0: i32) -> (i32, i32) {
    %c0_i32 = arith.constant 0 : i32
    %c0_i32_0 = arith.constant 0 : i32
    %c0_i32_1 = arith.constant 0 : i32
    return %c0_i32, %c0_i32_0 : i32, i32
  }
  func.func @transform_1(%arg0: i32) -> (i32, i32) {
    %c0_i32 = arith.constant 0 : i32
    %c0_i32_0 = arith.constant 0 : i32
    %c0_i32_1 = arith.constant 0 : i32
    return %c0_i32, %c0_i32_0 : i32, i32
  }
  func.func @transform_2(%arg0: i32) -> (i32, i32) {
    %c0_i32 = arith.constant 0 : i32
    %c0_i32_0 = arith.constant 0 : i32
    %c0_i32_1 = arith.constant 0 : i32
    return %c0_i32, %c0_i32_0 : i32, i32
  }
  func.func @transform_3(%arg0: i32) -> (i32, i32) {
    %c0_i32 = arith.constant 0 : i32
    %c0_i32_0 = arith.constant 0 : i32
    %c0_i32_1 = arith.constant 0 : i32
    return %c0_i32, %c0_i32_0 : i32, i32
  }
  func.func @transform_4(%arg0: i32) -> i32 {
    %c0_i32 = arith.constant 0 : i32
    %c0_i32_0 = arith.constant 0 : i32
    return %c0_i32 : i32
  }
  func.func @transform_5(%arg0: i32) -> (i32, i32) {
    %c0_i32 = arith.constant 0 : i32
    %c0_i32_0 = arith.constant 0 : i32
    %c0_i32_1 = arith.constant 0 : i32
    return %c0_i32, %c0_i32_0 : i32, i32
  }
}

module attributes {stable_mosaic.version = 11 : i64} {
  func.func @_branch_kernel(%arg0: i32, %arg1: memref<8x128xf32, #tpu.memory_space<vmem>>, %arg2: memref<128x128xf32, #tpu.memory_space<vmem>>, %arg3: memref<128x128xf32, #tpu.memory_space<vmem>>, %arg4: memref<1x128xf32, #tpu.memory_space<vmem>>, %arg5: memref<1xf32, #tpu.memory_space<smem>>, %arg6: memref<8x128xf32, #tpu.memory_space<vmem>>) attributes {dimension_semantics = [#tpu.dimension_semantics<arbitrary>], iteration_bounds = array<i64: 1>, scalar_prefetch = 0 : i64, scratch_operands = 0 : i64, tpu.core_type = #tpu.core_type<tc>, window_params = [{pipeline_mode = #tpu.pipeline_mode<synchronous>, transform_indices = @transform_0, window_bounds = array<i64: 8, 128>}, {pipeline_mode = #tpu.pipeline_mode<synchronous>, transform_indices = @transform_1, window_bounds = array<i64: 128, 128>}, {pipeline_mode = #tpu.pipeline_mode<synchronous>, transform_indices = @transform_2, window_bounds = array<i64: 128, 128>}, {pipeline_mode = #tpu.pipeline_mode<synchronous>, transform_indices = @transform_3, window_bounds = array<i64: 1, 128>}, {transform_indices = @transform_4, window_bounds = array<i64: 1>}, {pipeline_mode = #tpu.pipeline_mode<synchronous>, transform_indices = @transform_5, window_bounds = array<i64: 8, 128>}]} {
    %c0 = arith.constant 0 : index
    %c0_0 = arith.constant 0 : index
    %0 = vector.load %arg1[%c0, %c0_0] : memref<8x128xf32, #tpu.memory_space<vmem>>, vector<8x128xf32>
    %c0_1 = arith.constant 0 : index
    %c0_2 = arith.constant 0 : index
    %1 = vector.load %arg2[%c0_1, %c0_2] : memref<128x128xf32, #tpu.memory_space<vmem>>, vector<128x128xf32>
    %cst = arith.constant dense<0.000000e+00> : vector<8x128xf32>
    %2 = tpu.matmul %0, %1, %cst {dimension_numbers = #tpu.dot_dimension_numbers<[1], [0], [0], [1], [0, 0, 1, 1], [], []>} : vector<8x128xf32>, vector<128x128xf32>, vector<8x128xf32> -> vector<8x128xf32>
    %c0_3 = arith.constant 0 : index
    %c0_4 = arith.constant 0 : index
    %3 = vector.load %arg4[%c0_3, %c0_4] : memref<1x128xf32, #tpu.memory_space<vmem>>, vector<1x128xf32>
    %4 = vector.broadcast %3 : vector<1x128xf32> to vector<8x128xf32>
    %5 = arith.addf %2, %4 : vector<8x128xf32>
    %c0_5 = arith.constant 0 : index
    %6 = memref.load %arg5[%c0_5] : memref<1xf32, #tpu.memory_space<smem>>
    %cst_6 = arith.constant 0.000000e+00 : f32
    %7 = vector.broadcast %cst_6 : f32 to vector<8x128xf32>
    %8 = arith.cmpf oge, %5, %7 : vector<8x128xf32>
    %9 = vector.broadcast %6 : f32 to vector<8x128xf32>
    %10 = arith.mulf %9, %5 : vector<8x128xf32>
    %11 = arith.select %8, %5, %10 : vector<8x128xi1>, vector<8x128xf32>
    %c0_7 = arith.constant 0 : index
    %c0_8 = arith.constant 0 : index
    %12 = vector.load %arg3[%c0_7, %c0_8] : memref<128x128xf32, #tpu.memory_space<vmem>>, vector<128x128xf32>
    %cst_9 = arith.constant dense<0.000000e+00> : vector<8x128xf32>
    %13 = tpu.matmul %11, %12, %cst_9 {dimension_numbers = #tpu.dot_dimension_numbers<[1], [0], [0], [1], [0, 0, 1, 1], [], []>} : vector<8x128xf32>, vector<128x128xf32>, vector<8x128xf32> -> vector<8x128xf32>
    %c0_10 = arith.constant 0 : index
    %c0_11 = arith.constant 0 : index
    %14 = vector.load %arg6[%c0_10, %c0_11] : memref<8x128xf32, #tpu.memory_space<vmem>>, vector<8x128xf32>
    tpu.vector_store %arg6[%c0_10, %c0_11], %13 {strides = array<i32>} : memref<8x128xf32, #tpu.memory_space<vmem>>, vector<8x128xf32>,
    return
  }
  func.func @transform_0(%arg0: i32) -> (i32, i32) {
    %c0_i32 = arith.constant 0 : i32
    %c0_i32_0 = arith.constant 0 : i32
    %c0_i32_1 = arith.constant 0 : i32
    return %c0_i32, %c0_i32_0 : i32, i32
  }
  func.func @transform_1(%arg0: i32) -> (i32, i32) {
    %c0_i32 = arith.constant 0 : i32
    %c0_i32_0 = arith.constant 0 : i32
    %c0_i32_1 = arith.constant 0 : i32
    return %c0_i32, %c0_i32_0 : i32, i32
  }
  func.func @transform_2(%arg0: i32) -> (i32, i32) {
    %c0_i32 = arith.constant 0 : i32
    %c0_i32_0 = arith.constant 0 : i32
    %c0_i32_1 = arith.constant 0 : i32
    return %c0_i32, %c0_i32_0 : i32, i32
  }
  func.func @transform_3(%arg0: i32) -> (i32, i32) {
    %c0_i32 = arith.constant 0 : i32
    %c0_i32_0 = arith.constant 0 : i32
    %c0_i32_1 = arith.constant 0 : i32
    return %c0_i32, %c0_i32_0 : i32, i32
  }
  func.func @transform_4(%arg0: i32) -> i32 {
    %c0_i32 = arith.constant 0 : i32
    %c0_i32_0 = arith.constant 0 : i32
    return %c0_i32 : i32
  }
  func.func @transform_5(%arg0: i32) -> (i32, i32) {
    %c0_i32 = arith.constant 0 : i32
    %c0_i32_0 = arith.constant 0 : i32
    %c0_i32_1 = arith.constant 0 : i32
    return %c0_i32, %c0_i32_0 : i32, i32
  }
}

module attributes {stable_mosaic.version = 11 : i64} {
  func.func @_branch_kernel(%arg0: i32, %arg1: memref<18x128xf32, #tpu.memory_space<vmem>>, %arg2: memref<128x128xf32, #tpu.memory_space<vmem>>, %arg3: memref<128x128xf32, #tpu.memory_space<vmem>>, %arg4: memref<1x128xf32, #tpu.memory_space<vmem>>, %arg5: memref<1xf32, #tpu.memory_space<smem>>, %arg6: memref<18x128xf32, #tpu.memory_space<vmem>>) attributes {dimension_semantics = [#tpu.dimension_semantics<arbitrary>], iteration_bounds = array<i64: 1>, scalar_prefetch = 0 : i64, scratch_operands = 0 : i64, tpu.core_type = #tpu.core_type<tc>, window_params = [{pipeline_mode = #tpu.pipeline_mode<synchronous>, transform_indices = @transform_0, window_bounds = array<i64: 18, 128>}, {pipeline_mode = #tpu.pipeline_mode<synchronous>, transform_indices = @transform_1, window_bounds = array<i64: 128, 128>}, {pipeline_mode = #tpu.pipeline_mode<synchronous>, transform_indices = @transform_2, window_bounds = array<i64: 128, 128>}, {pipeline_mode = #tpu.pipeline_mode<synchronous>, transform_indices = @transform_3, window_bounds = array<i64: 1, 128>}, {transform_indices = @transform_4, window_bounds = array<i64: 1>}, {pipeline_mode = #tpu.pipeline_mode<synchronous>, transform_indices = @transform_5, window_bounds = array<i64: 18, 128>}]} {
    %c0 = arith.constant 0 : index
    %c0_0 = arith.constant 0 : index
    %0 = vector.load %arg1[%c0, %c0_0] : memref<18x128xf32, #tpu.memory_space<vmem>>, vector<18x128xf32>
    %c0_1 = arith.constant 0 : index
    %c0_2 = arith.constant 0 : index
    %1 = vector.load %arg2[%c0_1, %c0_2] : memref<128x128xf32, #tpu.memory_space<vmem>>, vector<128x128xf32>
    %cst = arith.constant dense<0.000000e+00> : vector<18x128xf32>
    %2 = tpu.matmul %0, %1, %cst {dimension_numbers = #tpu.dot_dimension_numbers<[1], [0], [0], [1], [0, 0, 1, 1], [], []>} : vector<18x128xf32>, vector<128x128xf32>, vector<18x128xf32> -> vector<18x128xf32>
    %c0_3 = arith.constant 0 : index
    %c0_4 = arith.constant 0 : index
    %3 = vector.load %arg4[%c0_3, %c0_4] : memref<1x128xf32, #tpu.memory_space<vmem>>, vector<1x128xf32>
    %4 = vector.broadcast %3 : vector<1x128xf32> to vector<18x128xf32>
    %5 = arith.addf %2, %4 : vector<18x128xf32>
    %c0_5 = arith.constant 0 : index
    %6 = memref.load %arg5[%c0_5] : memref<1xf32, #tpu.memory_space<smem>>
    %cst_6 = arith.constant 0.000000e+00 : f32
    %7 = vector.broadcast %cst_6 : f32 to vector<18x128xf32>
    %8 = arith.cmpf oge, %5, %7 : vector<18x128xf32>
    %9 = vector.broadcast %6 : f32 to vector<18x128xf32>
    %10 = arith.mulf %9, %5 : vector<18x128xf32>
    %11 = arith.select %8, %5, %10 : vector<18x128xi1>, vector<18x128xf32>
    %c0_7 = arith.constant 0 : index
    %c0_8 = arith.constant 0 : index
    %12 = vector.load %arg3[%c0_7, %c0_8] : memref<128x128xf32, #tpu.memory_space<vmem>>, vector<128x128xf32>
    %cst_9 = arith.constant dense<0.000000e+00> : vector<18x128xf32>
    %13 = tpu.matmul %11, %12, %cst_9 {dimension_numbers = #tpu.dot_dimension_numbers<[1], [0], [0], [1], [0, 0, 1, 1], [], []>} : vector<18x128xf32>, vector<128x128xf32>, vector<18x128xf32> -> vector<18x128xf32>
    %c0_10 = arith.constant 0 : index
    %c0_11 = arith.constant 0 : index
    %14 = vector.load %arg6[%c0_10, %c0_11] : memref<18x128xf32, #tpu.memory_space<vmem>>, vector<18x128xf32>
    tpu.vector_store %arg6[%c0_10, %c0_11], %13 {strides = array<i32>} : memref<18x128xf32, #tpu.memory_space<vmem>>, vector<18x128xf32>,
    return
  }
  func.func @transform_0(%arg0: i32) -> (i32, i32) {
    %c0_i32 = arith.constant 0 : i32
    %c0_i32_0 = arith.constant 0 : i32
    %c0_i32_1 = arith.constant 0 : i32
    return %c0_i32, %c0_i32_0 : i32, i32
  }
  func.func @transform_1(%arg0: i32) -> (i32, i32) {
    %c0_i32 = arith.constant 0 : i32
    %c0_i32_0 = arith.constant 0 : i32
    %c0_i32_1 = arith.constant 0 : i32
    return %c0_i32, %c0_i32_0 : i32, i32
  }
  func.func @transform_2(%arg0: i32) -> (i32, i32) {
    %c0_i32 = arith.constant 0 : i32
    %c0_i32_0 = arith.constant 0 : i32
    %c0_i32_1 = arith.constant 0 : i32
    return %c0_i32, %c0_i32_0 : i32, i32
  }
  func.func @transform_3(%arg0: i32) -> (i32, i32) {
    %c0_i32 = arith.constant 0 : i32
    %c0_i32_0 = arith.constant 0 : i32
    %c0_i32_1 = arith.constant 0 : i32
    return %c0_i32, %c0_i32_0 : i32, i32
  }
  func.func @transform_4(%arg0: i32) -> i32 {
    %c0_i32 = arith.constant 0 : i32
    %c0_i32_0 = arith.constant 0 : i32
    return %c0_i32 : i32
  }
  func.func @transform_5(%arg0: i32) -> (i32, i32) {
    %c0_i32 = arith.constant 0 : i32
    %c0_i32_0 = arith.constant 0 : i32
    %c0_i32_1 = arith.constant 0 : i32
    return %c0_i32, %c0_i32_0 : i32, i32
  }
}

module attributes {stable_mosaic.version = 11 : i64} {
  func.func @_branch_kernel(%arg0: i32, %arg1: memref<72x128xf32, #tpu.memory_space<vmem>>, %arg2: memref<128x128xf32, #tpu.memory_space<vmem>>, %arg3: memref<128x128xf32, #tpu.memory_space<vmem>>, %arg4: memref<1x128xf32, #tpu.memory_space<vmem>>, %arg5: memref<1xf32, #tpu.memory_space<smem>>, %arg6: memref<72x128xf32, #tpu.memory_space<vmem>>) attributes {dimension_semantics = [#tpu.dimension_semantics<arbitrary>], iteration_bounds = array<i64: 1>, scalar_prefetch = 0 : i64, scratch_operands = 0 : i64, tpu.core_type = #tpu.core_type<tc>, window_params = [{pipeline_mode = #tpu.pipeline_mode<synchronous>, transform_indices = @transform_0, window_bounds = array<i64: 72, 128>}, {pipeline_mode = #tpu.pipeline_mode<synchronous>, transform_indices = @transform_1, window_bounds = array<i64: 128, 128>}, {pipeline_mode = #tpu.pipeline_mode<synchronous>, transform_indices = @transform_2, window_bounds = array<i64: 128, 128>}, {pipeline_mode = #tpu.pipeline_mode<synchronous>, transform_indices = @transform_3, window_bounds = array<i64: 1, 128>}, {transform_indices = @transform_4, window_bounds = array<i64: 1>}, {pipeline_mode = #tpu.pipeline_mode<synchronous>, transform_indices = @transform_5, window_bounds = array<i64: 72, 128>}]} {
    %c0 = arith.constant 0 : index
    %c0_0 = arith.constant 0 : index
    %0 = vector.load %arg1[%c0, %c0_0] : memref<72x128xf32, #tpu.memory_space<vmem>>, vector<72x128xf32>
    %c0_1 = arith.constant 0 : index
    %c0_2 = arith.constant 0 : index
    %1 = vector.load %arg2[%c0_1, %c0_2] : memref<128x128xf32, #tpu.memory_space<vmem>>, vector<128x128xf32>
    %cst = arith.constant dense<0.000000e+00> : vector<72x128xf32>
    %2 = tpu.matmul %0, %1, %cst {dimension_numbers = #tpu.dot_dimension_numbers<[1], [0], [0], [1], [0, 0, 1, 1], [], []>} : vector<72x128xf32>, vector<128x128xf32>, vector<72x128xf32> -> vector<72x128xf32>
    %c0_3 = arith.constant 0 : index
    %c0_4 = arith.constant 0 : index
    %3 = vector.load %arg4[%c0_3, %c0_4] : memref<1x128xf32, #tpu.memory_space<vmem>>, vector<1x128xf32>
    %4 = vector.broadcast %3 : vector<1x128xf32> to vector<72x128xf32>
    %5 = arith.addf %2, %4 : vector<72x128xf32>
    %c0_5 = arith.constant 0 : index
    %6 = memref.load %arg5[%c0_5] : memref<1xf32, #tpu.memory_space<smem>>
    %cst_6 = arith.constant 0.000000e+00 : f32
    %7 = vector.broadcast %cst_6 : f32 to vector<72x128xf32>
    %8 = arith.cmpf oge, %5, %7 : vector<72x128xf32>
    %9 = vector.broadcast %6 : f32 to vector<72x128xf32>
    %10 = arith.mulf %9, %5 : vector<72x128xf32>
    %11 = arith.select %8, %5, %10 : vector<72x128xi1>, vector<72x128xf32>
    %c0_7 = arith.constant 0 : index
    %c0_8 = arith.constant 0 : index
    %12 = vector.load %arg3[%c0_7, %c0_8] : memref<128x128xf32, #tpu.memory_space<vmem>>, vector<128x128xf32>
    %cst_9 = arith.constant dense<0.000000e+00> : vector<72x128xf32>
    %13 = tpu.matmul %11, %12, %cst_9 {dimension_numbers = #tpu.dot_dimension_numbers<[1], [0], [0], [1], [0, 0, 1, 1], [], []>} : vector<72x128xf32>, vector<128x128xf32>, vector<72x128xf32> -> vector<72x128xf32>
    %c0_10 = arith.constant 0 : index
    %c0_11 = arith.constant 0 : index
    %14 = vector.load %arg6[%c0_10, %c0_11] : memref<72x128xf32, #tpu.memory_space<vmem>>, vector<72x128xf32>
    tpu.vector_store %arg6[%c0_10, %c0_11], %13 {strides = array<i32>} : memref<72x128xf32, #tpu.memory_space<vmem>>, vector<72x128xf32>,
    return
  }
  func.func @transform_0(%arg0: i32) -> (i32, i32) {
    %c0_i32 = arith.constant 0 : i32
    %c0_i32_0 = arith.constant 0 : i32
    %c0_i32_1 = arith.constant 0 : i32
    return %c0_i32, %c0_i32_0 : i32, i32
  }
  func.func @transform_1(%arg0: i32) -> (i32, i32) {
    %c0_i32 = arith.constant 0 : i32
    %c0_i32_0 = arith.constant 0 : i32
    %c0_i32_1 = arith.constant 0 : i32
    return %c0_i32, %c0_i32_0 : i32, i32
  }
  func.func @transform_2(%arg0: i32) -> (i32, i32) {
    %c0_i32 = arith.constant 0 : i32
    %c0_i32_0 = arith.constant 0 : i32
    %c0_i32_1 = arith.constant 0 : i32
    return %c0_i32, %c0_i32_0 : i32, i32
  }
  func.func @transform_3(%arg0: i32) -> (i32, i32) {
    %c0_i32 = arith.constant 0 : i32
    %c0_i32_0 = arith.constant 0 : i32
    %c0_i32_1 = arith.constant 0 : i32
    return %c0_i32, %c0_i32_0 : i32, i32
  }
  func.func @transform_4(%arg0: i32) -> i32 {
    %c0_i32 = arith.constant 0 : i32
    %c0_i32_0 = arith.constant 0 : i32
    return %c0_i32 : i32
  }
  func.func @transform_5(%arg0: i32) -> (i32, i32) {
    %c0_i32 = arith.constant 0 : i32
    %c0_i32_0 = arith.constant 0 : i32
    %c0_i32_1 = arith.constant 0 : i32
    return %c0_i32, %c0_i32_0 : i32, i32
  }
}

module attributes {stable_mosaic.version = 11 : i64} {
  func.func @_fuse_kernel(%arg0: i32, %arg1: i32, %arg2: memref<256x50xf32, #tpu.memory_space<vmem>>, %arg3: memref<1x50x128xf32, #tpu.memory_space<vmem>>, %arg4: memref<1x128xf32, #tpu.memory_space<vmem>>, %arg5: memref<1xf32, #tpu.memory_space<smem>>, %arg6: memref<1x256x128xf32, #tpu.memory_space<vmem>>) attributes {dimension_semantics = [#tpu.dimension_semantics<parallel>, #tpu.dimension_semantics<parallel>], iteration_bounds = array<i64: 2, 1>, scalar_prefetch = 0 : i64, scratch_operands = 0 : i64, tpu.core_type = #tpu.core_type<tc>, window_params = [{transform_indices = @transform_0, window_bounds = array<i64: 256, 50>}, {transform_indices = @transform_1, window_bounds = array<i64: 1, 50, 128>}, {pipeline_mode = #tpu.pipeline_mode<synchronous>, transform_indices = @transform_2, window_bounds = array<i64: 1, 128>}, {transform_indices = @transform_3, window_bounds = array<i64: 1>}, {transform_indices = @transform_4, window_bounds = array<i64: 1, 256, 128>}]} {
    %c0 = arith.constant 0 : index
    %c0_0 = arith.constant 0 : index
    %0 = vector.load %arg2[%c0, %c0_0] : memref<256x50xf32, #tpu.memory_space<vmem>>, vector<256x50xf32>
    %c0_1 = arith.constant 0 : index
    %c0_2 = arith.constant 0 : index
    %c0_3 = arith.constant 0 : index
    %1 = vector.load %arg3[%c0_1, %c0_2, %c0_3] : memref<1x50x128xf32, #tpu.memory_space<vmem>>, vector<1x50x128xf32>
    %2 = vector.shape_cast %1 : vector<1x50x128xf32> to vector<50x128xf32>
    %cst = arith.constant dense<0.000000e+00> : vector<256x128xf32>
    %3 = tpu.matmul %0, %2, %cst {dimension_numbers = #tpu.dot_dimension_numbers<[1], [0], [0], [1], [0, 0, 1, 1], [], []>} : vector<256x50xf32>, vector<50x128xf32>, vector<256x128xf32> -> vector<256x128xf32>
    %c0_4 = arith.constant 0 : index
    %c0_5 = arith.constant 0 : index
    %4 = vector.load %arg4[%c0_4, %c0_5] : memref<1x128xf32, #tpu.memory_space<vmem>>, vector<1x128xf32>
    %5 = vector.broadcast %4 : vector<1x128xf32> to vector<256x128xf32>
    %6 = arith.addf %3, %5 : vector<256x128xf32>
    %c0_6 = arith.constant 0 : index
    %7 = memref.load %arg5[%c0_6] : memref<1xf32, #tpu.memory_space<smem>>
    %cst_7 = arith.constant 0.000000e+00 : f32
    %8 = vector.broadcast %cst_7 : f32 to vector<256x128xf32>
    %9 = arith.cmpf oge, %6, %8 : vector<256x128xf32>
    %10 = vector.broadcast %7 : f32 to vector<256x128xf32>
    %11 = arith.mulf %10, %6 : vector<256x128xf32>
    %12 = arith.select %9, %6, %11 : vector<256x128xi1>, vector<256x128xf32>
    %c0_8 = arith.constant 0 : index
    %c0_9 = arith.constant 0 : index
    %c0_10 = arith.constant 0 : index
    %13 = vector.load %arg6[%c0_8, %c0_9, %c0_10] : memref<1x256x128xf32, #tpu.memory_space<vmem>>, vector<1x256x128xf32>
    %14 = vector.shape_cast %13 : vector<1x256x128xf32> to vector<256x128xf32>
    %15 = vector.shape_cast %12 : vector<256x128xf32> to vector<1x256x128xf32>
    tpu.vector_store %arg6[%c0_8, %c0_9, %c0_10], %15 {strides = array<i32>} : memref<1x256x128xf32, #tpu.memory_space<vmem>>, vector<1x256x128xf32>,
    return
  }
  func.func @transform_0(%arg0: i32, %arg1: i32) -> (i32, i32) {
    %c0_i32 = arith.constant 0 : i32
    %c0_i32_0 = arith.constant 0 : i32
    return %arg1, %c0_i32 : i32, i32
  }
  func.func @transform_1(%arg0: i32, %arg1: i32) -> (i32, i32, i32) {
    %c0_i32 = arith.constant 0 : i32
    %c0_i32_0 = arith.constant 0 : i32
    %c0_i32_1 = arith.constant 0 : i32
    return %arg0, %c0_i32, %c0_i32_0 : i32, i32, i32
  }
  func.func @transform_2(%arg0: i32, %arg1: i32) -> (i32, i32) {
    %c0_i32 = arith.constant 0 : i32
    %c0_i32_0 = arith.constant 0 : i32
    %c0_i32_1 = arith.constant 0 : i32
    return %c0_i32, %c0_i32_0 : i32, i32
  }
  func.func @transform_3(%arg0: i32, %arg1: i32) -> i32 {
    %c0_i32 = arith.constant 0 : i32
    %c0_i32_0 = arith.constant 0 : i32
    return %c0_i32 : i32
  }
  func.func @transform_4(%arg0: i32, %arg1: i32) -> (i32, i32, i32) {
    %c0_i32 = arith.constant 0 : i32
    %c0_i32_0 = arith.constant 0 : i32
    return %arg0, %arg1, %c0_i32 : i32, i32, i32
  }
}

</mosaic_0001>

<bundles_post_ra>
// kernel: ppm_forward.8
= control target key start
LH: loop header
LB: loop body
LE: loop exit
PB: predicated region body
PF: predicated region fallthrough
CT: control target
= control target key end

     0   :  { %s587_s9 = smov 0   ;;  %s589_s10 = smov 0   ;;  %s700_s0 = inlined_call_operand.vmem [shape: f32[50,256], index: 0, kind: input, shape index: {}]   ;;  %s701_s1 = inlined_call_operand.vmem [shape: f32[2,256,128], index: 1, kind: input, shape index: {}]   ;;  %s702_s2 = inlined_call_operand.vmem [shape: f32[2,50,128], index: 2, kind: output, shape index: {}]  }
   0x1   :  { %s591_s11 = smov 0  }
   0x2 LB: > { %s24_s12 = sadd.s32 1, %s566_s10  ;;  %p415_p0 = scmp.ge.s32.totalorder %s570_s11, 1  ;;  %s570_s11 = sphi %s591_s11, %s12_s11   ;;  %s566_s10 = sphi %s589_s10, %s704_s10   ;;  %s562_s9 = sphi %s587_s9, %s703_s9  }
   0x3   : > { %p26_p1 = scmp.ge.s32.totalorder %s24_s12, 2  ;;  %p131_p2 = scmp.lt.s32.totalorder %s570_s11, 3 }
   0x5   : > { %s706_s12 = smov (%p26_p1, %s24_s12), 0  ;;  %p132_p3 = pnand %p415_p0, %p131_p2 }
   0x6   : > { %p159_p4 = scmp.lt.s32.totalorder (!%p132_p3), %s562_s9, 1  ;;  %v176_v0 = vld [vmem:[%s700_s0 + $0x8] sm:$0xff] (!%p132_p3)  ;;  %v175_v50 = vld [vmem:[%s700_s0] sm:$0xff] (!%p132_p3)  ;;  %v178_v52 = vld [vmem:[%s700_s0 + $0x18] sm:$0xff] (!%p132_p3) }
   0x7   : > { %135 = sbr.rel (%p132_p3) target bundleno = 280 (0x118), region = 28  ;;  %v184_v1 = vld [vmem:[%s700_s0 + $0x48] sm:$0xff] (!%p132_p3)  ;;  %285 = vmatprep.mubr.f32.mxu0 (!%p132_p3), %v176_v0  ;;  %v183_v51 = vld [vmem:[%s700_s0 + $0x40] sm:$0xff] (!%p132_p3)  ;;  %v186_v53 = vld [vmem:[%s700_s0 + $0x58] sm:$0xff] (!%p132_p3) }
   0x8   : > { %305 = vmatprep.mubr.f32.mxu1 (!%p132_p3), %v184_v1  ;;  %v177_v54 = vld [vmem:[%s700_s0 + $0x10] sm:$0xff] (!%p132_p3)  ;;  %v180_v56 = vld [vmem:[%s700_s0 + $0x28] sm:$0xff] (!%p132_p3)  ;;  %v179_v58 = vld [vmem:[%s700_s0 + $0x20] sm:$0xff] (!%p132_p3) }
   0x9   : > { %v185_v55 = vld [vmem:[%s700_s0 + $0x50] sm:$0xff] (!%p132_p3)  ;;  %v188_v57 = vld [vmem:[%s700_s0 + $0x68] sm:$0x3] (!%p132_p3)  ;;  %v187_v59 = vld [vmem:[%s700_s0 + $0x60] sm:$0x3] (!%p132_p3) }
   0xa   : > { %v182_v60 = vld [vmem:[%s700_s0 + $0x38] sm:$0xff] (!%p132_p3)  ;;  %v181_v61 = vld [vmem:[%s700_s0 + $0x30] sm:$0xff] (!%p132_p3) }
   0xe   : > { %s708_s9 = smov (!%p159_p4, %s562_s9), 1 }
   0xf   : > { %s421_s17 = sshll.u32 %s708_s9, 8  ;;  %s523_s21 = smul.u32 56, %s708_s9 }
  0x10   : > { %s617_s20 = scalar_lea.vmem %s701_s1, %s421_s17 }
  0x11   : > { %v205_v2 = vld [vmem:[%s617_s20 + $0x80] sm:$0xff]  ;;  %v206_v3 = vld [vmem:[%s617_s20 + $0x88] sm:$0xff]  ;;  %v207_v7 = vld [vmem:[%s617_s20 + $0x90] sm:$0xff]  ;;  %s174_s24 = scalar_lea.vmem %s702_s2, %s523_s21 }
  0x12   : > { %v189_v4 = vld [vmem:[%s617_s20] sm:$0xff]  ;;  %v475_v5 = vpack.c.bf16 %v206_v3, %v205_v2  ;;  %v190_v6 = vld [vmem:[%s617_s20 + $0x8] sm:$0xff]  ;;  %v208_v8 = vld [vmem:[%s617_s20 + $0x98] sm:$0xff] }
  0x13   : > { %v477_v9 = vpack.c.bf16 %v190_v6, %v189_v4  ;;  %v479_v10 = vpack.c.bf16 %v208_v8, %v207_v7  ;;  %v191_v11 = vld [vmem:[%s617_s20 + $0x10] sm:$0xff]  ;;  %v192_v12 = vld [vmem:[%s617_s20 + $0x18] sm:$0xff]  ;;  %v209_v13 = vld [vmem:[%s617_s20 + $0xa0] sm:$0xff] }
  0x14   : > { %476 = vmatprep.subr.bf16.mxu0 %v475_v5  ;;  %507 = vmatprep.subr.bf16.mxu1 %v475_v5  ;;  %v210_v14 = vld [vmem:[%s617_s20 + $0xa8] sm:$0xff]  ;;  %v481_v15 = vpack.c.bf16 %v192_v12, %v191_v11  ;;  %v193_v17 = vld [vmem:[%s617_s20 + $0x20] sm:$0xff]  ;;  %v211_v19 = vld [vmem:[%s617_s20 + $0xb0] sm:$0xff] }
  0x15   : > { %478 = vmatpush3.bf16.msra.mxu0 %v477_v9  ;;  %515 = vmatpush3.bf16.msra.mxu1 %v477_v9  ;;  %v483_v16 = vpack.c.bf16 %v210_v14, %v209_v13  ;;  %v194_v18 = vld [vmem:[%s617_s20 + $0x28] sm:$0xff]  ;;  %v212_v20 = vld [vmem:[%s617_s20 + $0xb8] sm:$0xff]  ;;  %v195_v23 = vld [vmem:[%s617_s20 + $0x30] sm:$0xff] }
  0x16   : > { %480 = vmatprep.subr.bf16.mxu0 %v479_v10  ;;  %508 = vmatprep.subr.bf16.mxu1 %v479_v10  ;;  %v485_v21 = vpack.c.bf16 %v194_v18, %v193_v17  ;;  %v487_v22 = vpack.c.bf16 %v212_v20, %v211_v19  ;;  %v196_v24 = vld [vmem:[%s617_s20 + $0x38] sm:$0xff]  ;;  %v213_v25 = vld [vmem:[%s617_s20 + $0xc0] sm:$0xff]  ;;  %v214_v26 = vld [vmem:[%s617_s20 + $0xc8] sm:$0xff] }
  0x17   : > { %v489_v27 = vpack.c.bf16 %v196_v24, %v195_v23  ;;  %v491_v28 = vpack.c.bf16 %v214_v26, %v213_v25  ;;  %v197_v29 = vld [vmem:[%s617_s20 + $0x40] sm:$0xff]  ;;  %v198_v30 = vld [vmem:[%s617_s20 + $0x48] sm:$0xff]  ;;  %v215_v31 = vld [vmem:[%s617_s20 + $0xd0] sm:$0xff] }
  0x18   : > { %v216_v32 = vld [vmem:[%s617_s20 + $0xd8] sm:$0xff]  ;;  %v493_v33 = vpack.c.bf16 %v198_v30, %v197_v29  ;;  %v199_v35 = vld [vmem:[%s617_s20 + $0x50] sm:$0xff]  ;;  %v217_v37 = vld [vmem:[%s617_s20 + $0xe0] sm:$0xff] }
  0x19   : > { %482 = vmatpush3.bf16.msra.mxu0 %v481_v15  ;;  %516 = vmatpush3.bf16.msra.mxu1 %v481_v15  ;;  %v495_v34 = vpack.c.bf16 %v216_v32, %v215_v31  ;;  %v200_v36 = vld [vmem:[%s617_s20 + $0x58] sm:$0xff]  ;;  %v218_v38 = vld [vmem:[%s617_s20 + $0xe8] sm:$0xff]  ;;  %v201_v41 = vld [vmem:[%s617_s20 + $0x60] sm:$0xff] }
  0x1a   : > { %484 = vmatprep.subr.bf16.mxu0 %v483_v16  ;;  %509 = vmatprep.subr.bf16.mxu1 %v483_v16  ;;  %v497_v39 = vpack.c.bf16 %v200_v36, %v199_v35  ;;  %v499_v40 = vpack.c.bf16 %v218_v38, %v217_v37  ;;  %v202_v42 = vld [vmem:[%s617_s20 + $0x68] sm:$0xff]  ;;  %v219_v43 = vld [vmem:[%s617_s20 + $0xf0] sm:$0xff]  ;;  %v220_v44 = vld [vmem:[%s617_s20 + $0xf8] sm:$0xff] }
  0x1b   : > { %v501_v45 = vpack.c.bf16 %v202_v42, %v201_v41  ;;  %v503_v46 = vpack.c.bf16 %v220_v44, %v219_v43  ;;  %v203_v47 = vld [vmem:[%s617_s20 + $0x70] sm:$0xff]  ;;  %v204_v48 = vld [vmem:[%s617_s20 + $0x78] sm:$0xff] }
  0x1c   : > { %v505_v49 = vpack.c.bf16 %v204_v48, %v203_v47 }
  0x1d   : > { %486 = vmatpush3.bf16.msra.mxu0 %v485_v21  ;;  %517 = vmatpush3.bf16.msra.mxu1 %v485_v21 }
  0x1e   : > { %488 = vmatprep.subr.bf16.mxu0 %v487_v22  ;;  %510 = vmatprep.subr.bf16.mxu1 %v487_v22 }
  0x21   : > { %490 = vmatpush3.bf16.msra.mxu0 %v489_v27  ;;  %518 = vmatpush3.bf16.msra.mxu1 %v489_v27 }
  0x22   : > { %492 = vmatprep.subr.bf16.mxu0 %v491_v28  ;;  %511 = vmatprep.subr.bf16.mxu1 %v491_v28 }
  0x25   : > { %494 = vmatpush3.bf16.msra.mxu0 %v493_v33  ;;  %519 = vmatpush3.bf16.msra.mxu1 %v493_v33 }
  0x26   : > { %496 = vmatprep.subr.bf16.mxu0 %v495_v34  ;;  %512 = vmatprep.subr.bf16.mxu1 %v495_v34 }
  0x29   : > { %498 = vmatpush3.bf16.msra.mxu0 %v497_v39  ;;  %520 = vmatpush3.bf16.msra.mxu1 %v497_v39 }
  0x2a   : > { %500 = vmatprep.subr.bf16.mxu0 %v499_v40  ;;  %513 = vmatprep.subr.bf16.mxu1 %v499_v40 }
  0x2d   : > { %502 = vmatpush3.bf16.msra.mxu0 %v501_v45  ;;  %521 = vmatpush3.bf16.msra.mxu1 %v501_v45 }
  0x2e   : > { %504 = vmatprep.subr.bf16.mxu0 %v503_v46  ;;  %514 = vmatprep.subr.bf16.mxu1 %v503_v46 }
  0x31   : > { %506 = vmatpush3.bf16.msra.mxu0 %v505_v49  ;;  %522 = vmatpush3.bf16.msra.mxu1 %v505_v49 }
  0x34   : > { %286 = vmatmul.mubr.f32.vlgmr.msra.gmra.mrb[0].mxu0 %v175_v50  ;;  %306 = vmatmul.mubr.f32.vlgmr.msra.gmra.mrb[0].mxu1 %v183_v51 }
  0x35   : > { %290 = vmatprep.mubr.f32.mxu0 %v178_v52  ;;  %310 = vmatprep.mubr.f32.mxu1 %v186_v53 }
  0x38   : > { %291 = vmatmul.mubr.f32.gmra.mrb[2].mxu0 %v177_v54  ;;  %311 = vmatmul.mubr.f32.gmra.mrb[2].mxu1 %v185_v55 }
  0x39   : > { %295 = vmatprep.mubr.f32.mxu0 %v180_v56  ;;  %315 = vmatprep.mubr.f32.mxu1 %v188_v57 }
  0x3c   : > { %296 = vmatmul.mubr.f32.gmra.mrb[4].mxu0 %v179_v58  ;;  %316 = vmatmul.mubr.f32.gmra.mrb[4].mxu1 %v187_v59 }
  0x3d   : > { %300 = vmatprep.mubr.f32.mxu0 %v182_v60 }
  0x40   : > { %301 = vmatmul.mubr.f32.gmra.mrb[6].mxu0 %v181_v61 }
 0x107   : > { %v454_v62 = vpop.f32.mrb[0].mxu0  ;;  %v466_v63 = vpop.f32.mrb[0].mxu1 }
 0x108   : > { %v455_v0 = vpop.f32.mrb[1].mxu0  ;;  %v467_v1 = vpop.f32.mrb[1].mxu1 }
 0x109   : > { %v456_v2 = vadd.f32 %v455_v0, %v454_v62  ;;  %v468_v3 = vadd.f32 %v467_v1, %v466_v63 }
 0x10b   : > { %321 = vst [vmem:[%s174_s24] sm:$0xff] %v456_v2  ;;  %v457_v4 = vpop.f32.mrb[2].mxu0  ;;  %325 = vst [vmem:[%s174_s24 + $0x20] sm:$0xff] %v468_v3  ;;  %v469_v5 = vpop.f32.mrb[2].mxu1 }
 0x10c   : > { %v458_v6 = vpop.f32.mrb[3].mxu0  ;;  %v470_v7 = vpop.f32.mrb[3].mxu1 }
 0x10d   : > { %v459_v8 = vadd.f32 %v458_v6, %v457_v4  ;;  %v471_v9 = vadd.f32 %v470_v7, %v469_v5 }
 0x10f   : > { %322 = vst [vmem:[%s174_s24 + $0x8] sm:$0xff] %v459_v8  ;;  %v460_v10 = vpop.f32.mrb[4].mxu0  ;;  %326 = vst [vmem:[%s174_s24 + $0x28] sm:$0xff] %v471_v9  ;;  %v472_v11 = vpop.f32.mrb[4].mxu1 }
 0x110   : > { %v461_v12 = vpop.f32.mrb[5].mxu0  ;;  %v473_v13 = vpop.f32.mrb[5].mxu1 }
 0x111   : > { %v462_v14 = vadd.f32 %v461_v12, %v460_v10  ;;  %v474_v15 = vadd.f32 %v473_v13, %v472_v11 }
 0x113   : > { %323 = vst [vmem:[%s174_s24 + $0x10] sm:$0xff] %v462_v14  ;;  %v463_v16 = vpop.f32.mrb[6].mxu0  ;;  %327 = vst [vmem:[%s174_s24 + $0x30] sm:$0x3] %v474_v15 }
 0x114   : > { %v464_v17 = vpop.f32.mrb[7].mxu0 }
 0x115   : > { %v465_v18 = vadd.f32 %v464_v17, %v463_v16 }
 0x117   : > { %324 = vst [vmem:[%s174_s24 + $0x18] sm:$0xff] %v465_v18 }
 0x118 PF: > { %s12_s11 = sadd.s32 1, %s570_s11   ;;  %s703_s9 = smov %s566_s10 }
 0x119   : > { %p9_p5 = scmp.ge.s32.totalorder %s12_s11, 4   ;;  %s704_s10 = smov %s706_s12 }
 0x11b   :  { %11 = sbr.rel (!%p9_p5) target bundleno = 2 (0x2), region = 58 }

// kernel: ppm_forward.9
= control target key start
LH: loop header
LB: loop body
LE: loop exit
PB: predicated region body
PF: predicated region fallthrough
CT: control target
= control target key end

     0   :  { %v367_v0 = vmov 0.0|0.0   ;;  %vm368_vm0 = vmmov 0   ;;  %v369_v4 = vmov 0.0   ;;  %s524_s1 = inlined_call_operand.vmem [shape: f32[128,128], index: 1, kind: input, shape index: {}]   ;;  %s525_s2 = inlined_call_operand.vmem [shape: f32[128,128], index: 2, kind: input, shape index: {}]   ;;  %s526_s0 = inlined_call_operand.vmem [shape: f32[2,128], index: 0, kind: input, shape index: {}]   ;;  %s527_s3 = inlined_call_operand.vmem [shape: f32[1,128], index: 3, kind: input, shape index: {}]   ;;  %s528_s4 = inlined_call_operand.<no memory space> [shape: f32[1], index: 4, kind: input, shape index: {}]   ;;  %s529_s5 = inlined_call_operand.vmem [shape: f32[2,128], index: 5, kind: output, shape index: {}]  }
   0x1   :  { %316 = vmatprep.subr.bf16.mxu0 %v367_v0  ;;  %v22_v1 = vld [vmem:[%s524_s1] sm:$0xff]  ;;  %v23_v2 = vld [vmem:[%s524_s1 + $0x8] sm:$0xff]  ;;  %v24_v3 = vld [vmem:[%s524_s1 + $0x10] sm:$0xff]  ;;  %278 = vmatprep.mubr.msk.f32.mxu0 %vm368_vm0, %v369_v4  ;;  %v117_v53 = vstv %s528_s4 }
   0x2   :  { %v317_v5 = vpack.c.bf16 %v23_v2, %v22_v1  ;;  %v25_v6 = vld [vmem:[%s524_s1 + $0x18] sm:$0xff]  ;;  %340 = vmatprep.subr.bf16.mxu1 %v367_v0  ;;  %313 = vmatprep.mubr.msk.f32.mxu1 %vm368_vm0, %v369_v4  ;;  %v26_v8 = vld [vmem:[%s524_s1 + $0x20] sm:$0xff]  ;;  %v27_v9 = vld [vmem:[%s524_s1 + $0x28] sm:$0xff] }
   0x3   :  { %v320_v7 = vpack.c.bf16 %v25_v6, %v24_v3  ;;  %v120_v10 = vld [vmem:[%s525_s2] sm:$0xff]  ;;  %v121_v11 = vld [vmem:[%s525_s2 + $0x8] sm:$0xff]  ;;  %v122_v12 = vld [vmem:[%s525_s2 + $0x10] sm:$0xff]  ;;  %v323_v14 = vpack.c.bf16 %v27_v9, %v26_v8 }
   0x4   :  { %318 = vmatpush3.bf16.msra.mxu0 %v317_v5  ;;  %v123_v13 = vld [vmem:[%s525_s2 + $0x18] sm:$0xff]  ;;  %v341_v15 = vpack.c.bf16 %v121_v11, %v120_v10  ;;  %v28_v16 = vld [vmem:[%s524_s1 + $0x30] sm:$0xff]  ;;  %v124_v19 = vld [vmem:[%s525_s2 + $0x20] sm:$0xff] }
   0x5   :  { %319 = vmatprep.subr.bf16.mxu0 %v367_v0  ;;  %v29_v17 = vld [vmem:[%s524_s1 + $0x38] sm:$0xff]  ;;  %v344_v18 = vpack.c.bf16 %v123_v13, %v122_v12  ;;  %v125_v20 = vld [vmem:[%s525_s2 + $0x28] sm:$0xff]  ;;  %v30_v22 = vld [vmem:[%s524_s1 + $0x40] sm:$0xff] }
   0x6   :  { %342 = vmatpush3.bf16.msra.mxu1 %v341_v15  ;;  %v326_v21 = vpack.c.bf16 %v29_v17, %v28_v16  ;;  %v31_v23 = vld [vmem:[%s524_s1 + $0x48] sm:$0xff]  ;;  %v347_v24 = vpack.c.bf16 %v125_v20, %v124_v19  ;;  %v126_v25 = vld [vmem:[%s525_s2 + $0x30] sm:$0xff]  ;;  %v127_v26 = vld [vmem:[%s525_s2 + $0x38] sm:$0xff] }
   0x7   :  { %343 = vmatprep.subr.bf16.mxu1 %v367_v0  ;;  %v329_v27 = vpack.c.bf16 %v31_v23, %v30_v22  ;;  %v32_v28 = vld [vmem:[%s524_s1 + $0x50] sm:$0xff]  ;;  %v33_v29 = vld [vmem:[%s524_s1 + $0x58] sm:$0xff]  ;;  %v350_v30 = vpack.c.bf16 %v127_v26, %v126_v25  ;;  %v128_v31 = vld [vmem:[%s525_s2 + $0x40] sm:$0xff] }
   0x8   :  { %321 = vmatpush3.bf16.msra.mxu0 %v320_v7  ;;  %v129_v32 = vld [vmem:[%s525_s2 + $0x48] sm:$0xff]  ;;  %v332_v33 = vpack.c.bf16 %v33_v29, %v32_v28  ;;  %v34_v34 = vld [vmem:[%s524_s1 + $0x60] sm:$0xff]  ;;  %v130_v37 = vld [vmem:[%s525_s2 + $0x50] sm:$0xff] }
   0x9   :  { %322 = vmatprep.subr.bf16.mxu0 %v367_v0  ;;  %v35_v35 = vld [vmem:[%s524_s1 + $0x68] sm:$0xff]  ;;  %v353_v36 = vpack.c.bf16 %v129_v32, %v128_v31  ;;  %v131_v38 = vld [vmem:[%s525_s2 + $0x58] sm:$0xff]  ;;  %v36_v40 = vld [vmem:[%s524_s1 + $0x70] sm:$0xff] }
   0xa   :  { %345 = vmatpush3.bf16.msra.mxu1 %v344_v18  ;;  %v335_v39 = vpack.c.bf16 %v35_v35, %v34_v34  ;;  %v37_v41 = vld [vmem:[%s524_s1 + $0x78] sm:$0xff]  ;;  %v356_v42 = vpack.c.bf16 %v131_v38, %v130_v37  ;;  %v132_v43 = vld [vmem:[%s525_s2 + $0x60] sm:$0xff]  ;;  %v133_v44 = vld [vmem:[%s525_s2 + $0x68] sm:$0xff] }
   0xb   :  { %346 = vmatprep.subr.bf16.mxu1 %v367_v0  ;;  %v338_v45 = vpack.c.bf16 %v37_v41, %v36_v40  ;;  %v359_v46 = vpack.c.bf16 %v133_v44, %v132_v43  ;;  %v21_v47 = vld [vmem:[%s526_s0] sm:$0x3]  ;;  %v134_v48 = vld [vmem:[%s525_s2 + $0x70] sm:$0xff]  ;;  %v135_v49 = vld [vmem:[%s525_s2 + $0x78] sm:$0xff] }
   0xc   :  { %324 = vmatpush3.bf16.msra.mxu0 %v323_v14  ;;  %v362_v50 = vpack.c.bf16 %v135_v49, %v134_v48  ;;  %v211_v51 = vld [vmem:[%s527_s3] ss:$0 sm:$0xff] }
   0xd   :  { %325 = vmatprep.subr.bf16.mxu0 %v367_v0 }
   0xe   :  { %348 = vmatpush3.bf16.msra.mxu1 %v347_v24 }
   0xf   :  { %349 = vmatprep.subr.bf16.mxu1 %v367_v0 }
  0x10   :  { %327 = vmatpush3.bf16.msra.mxu0 %v326_v21 }
  0x11   :  { %328 = vmatprep.subr.bf16.mxu0 %v367_v0 }
  0x12   :  { %351 = vmatpush3.bf16.msra.mxu1 %v350_v30 }
  0x13   :  { %352 = vmatprep.subr.bf16.mxu1 %v367_v0 }
  0x14   :  { %330 = vmatpush3.bf16.msra.mxu0 %v329_v27 }
  0x15   :  { %331 = vmatprep.subr.bf16.mxu0 %v367_v0 }
  0x16   :  { %354 = vmatpush3.bf16.msra.mxu1 %v353_v36 }
  0x17   :  { %355 = vmatprep.subr.bf16.mxu1 %v367_v0 }
  0x18   :  { %333 = vmatpush3.bf16.msra.mxu0 %v332_v33 }
  0x19   :  { %334 = vmatprep.subr.bf16.mxu0 %v367_v0 }
  0x1a   :  { %357 = vmatpush3.bf16.msra.mxu1 %v356_v42 }
  0x1b   :  { %358 = vmatprep.subr.bf16.mxu1 %v367_v0 }
  0x1c   :  { %336 = vmatpush3.bf16.msra.mxu0 %v335_v39 }
  0x1d   :  { %337 = vmatprep.subr.bf16.mxu0 %v367_v0 }
  0x1e   :  { %360 = vmatpush3.bf16.msra.mxu1 %v359_v46 }
  0x1f   :  { %361 = vmatprep.subr.bf16.mxu1 %v367_v0 }
  0x20   :  { %339 = vmatpush3.bf16.msra.mxu0 %v338_v45 }
  0x22   :  { %363 = vmatpush3.bf16.msra.mxu1 %v362_v50 }
  0x23   :  { %279 = vmatmul.mubr.f32.vlgmr.msra.gmra.mrb[0].mxu0 %v21_v47 }
  0xf6   :  { %v111_v52 = vpop.f32.mrb[0].mxu0 }
  0xf7   :  { %v112_v54 = vadd.f32 %v211_v51, %v111_v52  ;;  %v280_v55 = vpop.f32.mrb[1].mxu0 }
  0xf9   :  { %v118_v56 = vmul.f32 %v117_v53, %v112_v54  ;;  %vm116_vm1 = vcmp.ge.f32.partialorder %v112_v54, 0.0 }
  0xfb   :  { %v119_v57 = vsel %vm116_vm1, %v112_v54, %v118_v56 }
  0xfc   :  { %314 = vmatmul.mubr.f32.vlgmr.msra.gmra.mrb[0].mxu1 %v119_v57 }
 0x1cf   :  { %v202_v58 = vpop.f32.mrb[0].mxu1 }
 0x1d0   :  { %206 = vst [vmem:[%s529_s5] sm:$0x3] %v202_v58  ;;  %v315_v59 = vpop.f32.mrb[1].mxu1 }

// kernel: ppm_forward.10
= control target key start
LH: loop header
LB: loop body
LE: loop exit
PB: predicated region body
PF: predicated region fallthrough
CT: control target
= control target key end

     0   :  { %v367_v0 = vmov 0.0|0.0   ;;  %vm368_vm0 = vmmov 0   ;;  %v369_v4 = vmov 0.0   ;;  %s524_s1 = inlined_call_operand.vmem [shape: f32[128,128], index: 1, kind: input, shape index: {}]   ;;  %s525_s2 = inlined_call_operand.vmem [shape: f32[128,128], index: 2, kind: input, shape index: {}]   ;;  %s526_s0 = inlined_call_operand.vmem [shape: f32[8,128], index: 0, kind: input, shape index: {}]   ;;  %s527_s3 = inlined_call_operand.vmem [shape: f32[1,128], index: 3, kind: input, shape index: {}]   ;;  %s528_s4 = inlined_call_operand.<no memory space> [shape: f32[1], index: 4, kind: input, shape index: {}]   ;;  %s529_s5 = inlined_call_operand.vmem [shape: f32[8,128], index: 5, kind: output, shape index: {}]  }
   0x1   :  { %316 = vmatprep.subr.bf16.mxu0 %v367_v0  ;;  %v22_v1 = vld [vmem:[%s524_s1] sm:$0xff]  ;;  %v23_v2 = vld [vmem:[%s524_s1 + $0x8] sm:$0xff]  ;;  %v24_v3 = vld [vmem:[%s524_s1 + $0x10] sm:$0xff]  ;;  %278 = vmatprep.mubr.msk.f32.mxu0 %vm368_vm0, %v369_v4  ;;  %v117_v53 = vstv %s528_s4 }
   0x2   :  { %v317_v5 = vpack.c.bf16 %v23_v2, %v22_v1  ;;  %v25_v6 = vld [vmem:[%s524_s1 + $0x18] sm:$0xff]  ;;  %340 = vmatprep.subr.bf16.mxu1 %v367_v0  ;;  %313 = vmatprep.mubr.msk.f32.mxu1 %vm368_vm0, %v369_v4  ;;  %v26_v8 = vld [vmem:[%s524_s1 + $0x20] sm:$0xff]  ;;  %v27_v9 = vld [vmem:[%s524_s1 + $0x28] sm:$0xff] }
   0x3   :  { %v320_v7 = vpack.c.bf16 %v25_v6, %v24_v3  ;;  %v120_v10 = vld [vmem:[%s525_s2] sm:$0xff]  ;;  %v121_v11 = vld [vmem:[%s525_s2 + $0x8] sm:$0xff]  ;;  %v122_v12 = vld [vmem:[%s525_s2 + $0x10] sm:$0xff]  ;;  %v323_v14 = vpack.c.bf16 %v27_v9, %v26_v8 }
   0x4   :  { %318 = vmatpush3.bf16.msra.mxu0 %v317_v5  ;;  %v123_v13 = vld [vmem:[%s525_s2 + $0x18] sm:$0xff]  ;;  %v341_v15 = vpack.c.bf16 %v121_v11, %v120_v10  ;;  %v28_v16 = vld [vmem:[%s524_s1 + $0x30] sm:$0xff]  ;;  %v124_v19 = vld [vmem:[%s525_s2 + $0x20] sm:$0xff] }
   0x5   :  { %319 = vmatprep.subr.bf16.mxu0 %v367_v0  ;;  %v29_v17 = vld [vmem:[%s524_s1 + $0x38] sm:$0xff]  ;;  %v344_v18 = vpack.c.bf16 %v123_v13, %v122_v12  ;;  %v125_v20 = vld [vmem:[%s525_s2 + $0x28] sm:$0xff]  ;;  %v30_v22 = vld [vmem:[%s524_s1 + $0x40] sm:$0xff] }
   0x6   :  { %342 = vmatpush3.bf16.msra.mxu1 %v341_v15  ;;  %v326_v21 = vpack.c.bf16 %v29_v17, %v28_v16  ;;  %v31_v23 = vld [vmem:[%s524_s1 + $0x48] sm:$0xff]  ;;  %v347_v24 = vpack.c.bf16 %v125_v20, %v124_v19  ;;  %v126_v25 = vld [vmem:[%s525_s2 + $0x30] sm:$0xff]  ;;  %v127_v26 = vld [vmem:[%s525_s2 + $0x38] sm:$0xff] }
   0x7   :  { %343 = vmatprep.subr.bf16.mxu1 %v367_v0  ;;  %v329_v27 = vpack.c.bf16 %v31_v23, %v30_v22  ;;  %v32_v28 = vld [vmem:[%s524_s1 + $0x50] sm:$0xff]  ;;  %v33_v29 = vld [vmem:[%s524_s1 + $0x58] sm:$0xff]  ;;  %v350_v30 = vpack.c.bf16 %v127_v26, %v126_v25  ;;  %v128_v31 = vld [vmem:[%s525_s2 + $0x40] sm:$0xff] }
   0x8   :  { %321 = vmatpush3.bf16.msra.mxu0 %v320_v7  ;;  %v129_v32 = vld [vmem:[%s525_s2 + $0x48] sm:$0xff]  ;;  %v332_v33 = vpack.c.bf16 %v33_v29, %v32_v28  ;;  %v34_v34 = vld [vmem:[%s524_s1 + $0x60] sm:$0xff]  ;;  %v130_v37 = vld [vmem:[%s525_s2 + $0x50] sm:$0xff] }
   0x9   :  { %322 = vmatprep.subr.bf16.mxu0 %v367_v0  ;;  %v35_v35 = vld [vmem:[%s524_s1 + $0x68] sm:$0xff]  ;;  %v353_v36 = vpack.c.bf16 %v129_v32, %v128_v31  ;;  %v131_v38 = vld [vmem:[%s525_s2 + $0x58] sm:$0xff]  ;;  %v36_v40 = vld [vmem:[%s524_s1 + $0x70] sm:$0xff] }
   0xa   :  { %345 = vmatpush3.bf16.msra.mxu1 %v344_v18  ;;  %v335_v39 = vpack.c.bf16 %v35_v35, %v34_v34  ;;  %v37_v41 = vld [vmem:[%s524_s1 + $0x78] sm:$0xff]  ;;  %v356_v42 = vpack.c.bf16 %v131_v38, %v130_v37  ;;  %v132_v43 = vld [vmem:[%s525_s2 + $0x60] sm:$0xff]  ;;  %v133_v44 = vld [vmem:[%s525_s2 + $0x68] sm:$0xff] }
   0xb   :  { %346 = vmatprep.subr.bf16.mxu1 %v367_v0  ;;  %v338_v45 = vpack.c.bf16 %v37_v41, %v36_v40  ;;  %v359_v46 = vpack.c.bf16 %v133_v44, %v132_v43  ;;  %v21_v47 = vld [vmem:[%s526_s0] sm:$0xff]  ;;  %v134_v48 = vld [vmem:[%s525_s2 + $0x70] sm:$0xff]  ;;  %v135_v49 = vld [vmem:[%s525_s2 + $0x78] sm:$0xff] }
   0xc   :  { %324 = vmatpush3.bf16.msra.mxu0 %v323_v14  ;;  %v362_v50 = vpack.c.bf16 %v135_v49, %v134_v48  ;;  %v211_v51 = vld [vmem:[%s527_s3] ss:$0 sm:$0xff] }
   0xd   :  { %325 = vmatprep.subr.bf16.mxu0 %v367_v0 }
   0xe   :  { %348 = vmatpush3.bf16.msra.mxu1 %v347_v24 }
   0xf   :  { %349 = vmatprep.subr.bf16.mxu1 %v367_v0 }
  0x10   :  { %327 = vmatpush3.bf16.msra.mxu0 %v326_v21 }
  0x11   :  { %328 = vmatprep.subr.bf16.mxu0 %v367_v0 }
  0x12   :  { %351 = vmatpush3.bf16.msra.mxu1 %v350_v30 }
  0x13   :  { %352 = vmatprep.subr.bf16.mxu1 %v367_v0 }
  0x14   :  { %330 = vmatpush3.bf16.msra.mxu0 %v329_v27 }
  0x15   :  { %331 = vmatprep.subr.bf16.mxu0 %v367_v0 }
  0x16   :  { %354 = vmatpush3.bf16.msra.mxu1 %v353_v36 }
  0x17   :  { %355 = vmatprep.subr.bf16.mxu1 %v367_v0 }
  0x18   :  { %333 = vmatpush3.bf16.msra.mxu0 %v332_v33 }
  0x19   :  { %334 = vmatprep.subr.bf16.mxu0 %v367_v0 }
  0x1a   :  { %357 = vmatpush3.bf16.msra.mxu1 %v356_v42 }
  0x1b   :  { %358 = vmatprep.subr.bf16.mxu1 %v367_v0 }
  0x1c   :  { %336 = vmatpush3.bf16.msra.mxu0 %v335_v39 }
  0x1d   :  { %337 = vmatprep.subr.bf16.mxu0 %v367_v0 }
  0x1e   :  { %360 = vmatpush3.bf16.msra.mxu1 %v359_v46 }
  0x1f   :  { %361 = vmatprep.subr.bf16.mxu1 %v367_v0 }
  0x20   :  { %339 = vmatpush3.bf16.msra.mxu0 %v338_v45 }
  0x22   :  { %363 = vmatpush3.bf16.msra.mxu1 %v362_v50 }
  0x23   :  { %279 = vmatmul.mubr.f32.vlgmr.msra.gmra.mrb[0].mxu0 %v21_v47 }
  0xf6   :  { %v111_v52 = vpop.f32.mrb[0].mxu0 }
  0xf7   :  { %v112_v54 = vadd.f32 %v211_v51, %v111_v52  ;;  %v280_v55 = vpop.f32.mrb[1].mxu0 }
  0xf9   :  { %v118_v56 = vmul.f32 %v117_v53, %v112_v54  ;;  %vm116_vm1 = vcmp.ge.f32.partialorder %v112_v54, 0.0 }
  0xfb   :  { %v119_v57 = vsel %vm116_vm1, %v112_v54, %v118_v56 }
  0xfc   :  { %314 = vmatmul.mubr.f32.vlgmr.msra.gmra.mrb[0].mxu1 %v119_v57 }
 0x1cf   :  { %v202_v58 = vpop.f32.mrb[0].mxu1 }
 0x1d0   :  { %206 = vst [vmem:[%s529_s5] sm:$0xff] %v202_v58  ;;  %v315_v59 = vpop.f32.mrb[1].mxu1 }

// kernel: ppm_forward.11
= control target key start
LH: loop header
LB: loop body
LE: loop exit
PB: predicated region body
PF: predicated region fallthrough
CT: control target
= control target key end

     0   :  { %v413_v0 = vmov 0.0|0.0   ;;  %vm414_vm0 = vmmov 0   ;;  %v415_v4 = vmov 0.0   ;;  %s594_s1 = inlined_call_operand.vmem [shape: f32[128,128], index: 1, kind: input, shape index: {}]   ;;  %s595_s2 = inlined_call_operand.vmem [shape: f32[128,128], index: 2, kind: input, shape index: {}]   ;;  %s596_s0 = inlined_call_operand.vmem [shape: f32[18,128], index: 0, kind: input, shape index: {}]   ;;  %s597_s3 = inlined_call_operand.vmem [shape: f32[1,128], index: 3, kind: input, shape index: {}]   ;;  %s598_s4 = inlined_call_operand.<no memory space> [shape: f32[1], index: 4, kind: input, shape index: {}]   ;;  %s599_s5 = inlined_call_operand.vmem [shape: f32[18,128], index: 5, kind: output, shape index: {}]  }
   0x1   :  { %362 = vmatprep.subr.bf16.mxu0 %v413_v0  ;;  %v24_v1 = vld [vmem:[%s594_s1] sm:$0xff]  ;;  %v25_v2 = vld [vmem:[%s594_s1 + $0x8] sm:$0xff]  ;;  %v26_v3 = vld [vmem:[%s594_s1 + $0x10] sm:$0xff]  ;;  %312 = vmatprep.mubr.msk.f32.mxu0 %vm414_vm0, %v415_v4  ;;  %v131_v55 = vstv %s598_s4 }
   0x2   :  { %v363_v5 = vpack.c.bf16 %v25_v2, %v24_v1  ;;  %v27_v6 = vld [vmem:[%s594_s1 + $0x18] sm:$0xff]  ;;  %386 = vmatprep.subr.bf16.mxu1 %v413_v0  ;;  %353 = vmatprep.mubr.msk.f32.mxu1 %vm414_vm0, %v415_v4  ;;  %v28_v8 = vld [vmem:[%s594_s1 + $0x20] sm:$0xff]  ;;  %v29_v9 = vld [vmem:[%s594_s1 + $0x28] sm:$0xff] }
   0x3   :  { %v366_v7 = vpack.c.bf16 %v27_v6, %v26_v3  ;;  %v138_v10 = vld [vmem:[%s595_s2] sm:$0xff]  ;;  %v139_v11 = vld [vmem:[%s595_s2 + $0x8] sm:$0xff]  ;;  %v369_v12 = vpack.c.bf16 %v29_v9, %v28_v8  ;;  %v140_v14 = vld [vmem:[%s595_s2 + $0x10] sm:$0xff] }
   0x4   :  { %364 = vmatpush3.bf16.msra.mxu0 %v363_v5  ;;  %v387_v13 = vpack.c.bf16 %v139_v11, %v138_v10  ;;  %v141_v15 = vld [vmem:[%s595_s2 + $0x18] sm:$0xff]  ;;  %v30_v16 = vld [vmem:[%s594_s1 + $0x30] sm:$0xff]  ;;  %v142_v19 = vld [vmem:[%s595_s2 + $0x20] sm:$0xff] }
   0x5   :  { %365 = vmatprep.subr.bf16.mxu0 %v413_v0  ;;  %v31_v17 = vld [vmem:[%s594_s1 + $0x38] sm:$0xff]  ;;  %v390_v18 = vpack.c.bf16 %v141_v15, %v140_v14  ;;  %v143_v20 = vld [vmem:[%s595_s2 + $0x28] sm:$0xff]  ;;  %v32_v22 = vld [vmem:[%s594_s1 + $0x40] sm:$0xff] }
   0x6   :  { %388 = vmatpush3.bf16.msra.mxu1 %v387_v13  ;;  %v372_v21 = vpack.c.bf16 %v31_v17, %v30_v16  ;;  %v33_v23 = vld [vmem:[%s594_s1 + $0x48] sm:$0xff]  ;;  %v393_v24 = vpack.c.bf16 %v143_v20, %v142_v19  ;;  %v144_v25 = vld [vmem:[%s595_s2 + $0x30] sm:$0xff]  ;;  %v145_v26 = vld [vmem:[%s595_s2 + $0x38] sm:$0xff] }
   0x7   :  { %389 = vmatprep.subr.bf16.mxu1 %v413_v0  ;;  %v375_v27 = vpack.c.bf16 %v33_v23, %v32_v22  ;;  %v34_v28 = vld [vmem:[%s594_s1 + $0x50] sm:$0xff]  ;;  %v35_v29 = vld [vmem:[%s594_s1 + $0x58] sm:$0xff]  ;;  %v396_v30 = vpack.c.bf16 %v145_v26, %v144_v25  ;;  %v146_v31 = vld [vmem:[%s595_s2 + $0x40] sm:$0xff] }
   0x8   :  { %367 = vmatpush3.bf16.msra.mxu0 %v366_v7  ;;  %v147_v32 = vld [vmem:[%s595_s2 + $0x48] sm:$0xff]  ;;  %v378_v33 = vpack.c.bf16 %v35_v29, %v34_v28  ;;  %v36_v34 = vld [vmem:[%s594_s1 + $0x60] sm:$0xff]  ;;  %v148_v37 = vld [vmem:[%s595_s2 + $0x50] sm:$0xff] }
   0x9   :  { %368 = vmatprep.subr.bf16.mxu0 %v413_v0  ;;  %v37_v35 = vld [vmem:[%s594_s1 + $0x68] sm:$0xff]  ;;  %v399_v36 = vpack.c.bf16 %v147_v32, %v146_v31  ;;  %v149_v38 = vld [vmem:[%s595_s2 + $0x58] sm:$0xff]  ;;  %v38_v40 = vld [vmem:[%s594_s1 + $0x70] sm:$0xff] }
   0xa   :  { %391 = vmatpush3.bf16.msra.mxu1 %v390_v18  ;;  %v381_v39 = vpack.c.bf16 %v37_v35, %v36_v34  ;;  %v39_v41 = vld [vmem:[%s594_s1 + $0x78] sm:$0xff]  ;;  %v402_v42 = vpack.c.bf16 %v149_v38, %v148_v37  ;;  %v150_v43 = vld [vmem:[%s595_s2 + $0x60] sm:$0xff]  ;;  %v151_v44 = vld [vmem:[%s595_s2 + $0x68] sm:$0xff] }
   0xb   :  { %392 = vmatprep.subr.bf16.mxu1 %v413_v0  ;;  %v384_v45 = vpack.c.bf16 %v39_v41, %v38_v40  ;;  %v405_v46 = vpack.c.bf16 %v151_v44, %v150_v43  ;;  %v21_v47 = vld [vmem:[%s596_s0] sm:$0xff]  ;;  %v22_v48 = vld [vmem:[%s596_s0 + $0x8] sm:$0xff]  ;;  %v23_v49 = vld [vmem:[%s596_s0 + $0x10] sm:$0x3] }
   0xc   :  { %370 = vmatpush3.bf16.msra.mxu0 %v369_v12  ;;  %v152_v50 = vld [vmem:[%s595_s2 + $0x70] sm:$0xff]  ;;  %v153_v51 = vld [vmem:[%s595_s2 + $0x78] sm:$0xff]  ;;  %v241_v53 = vld [vmem:[%s597_s3] ss:$0 sm:$0xff] }
   0xd   :  { %371 = vmatprep.subr.bf16.mxu0 %v413_v0  ;;  %v408_v52 = vpack.c.bf16 %v153_v51, %v152_v50 }
   0xe   :  { %394 = vmatpush3.bf16.msra.mxu1 %v393_v24 }
   0xf   :  { %395 = vmatprep.subr.bf16.mxu1 %v413_v0 }
  0x10   :  { %373 = vmatpush3.bf16.msra.mxu0 %v372_v21 }
  0x11   :  { %374 = vmatprep.subr.bf16.mxu0 %v413_v0 }
  0x12   :  { %397 = vmatpush3.bf16.msra.mxu1 %v396_v30 }
  0x13   :  { %398 = vmatprep.subr.bf16.mxu1 %v413_v0 }
  0x14   :  { %376 = vmatpush3.bf16.msra.mxu0 %v375_v27 }
  0x15   :  { %377 = vmatprep.subr.bf16.mxu0 %v413_v0 }
  0x16   :  { %400 = vmatpush3.bf16.msra.mxu1 %v399_v36 }
  0x17   :  { %401 = vmatprep.subr.bf16.mxu1 %v413_v0 }
  0x18   :  { %379 = vmatpush3.bf16.msra.mxu0 %v378_v33 }
  0x19   :  { %380 = vmatprep.subr.bf16.mxu0 %v413_v0 }
  0x1a   :  { %403 = vmatpush3.bf16.msra.mxu1 %v402_v42 }
  0x1b   :  { %404 = vmatprep.subr.bf16.mxu1 %v413_v0 }
  0x1c   :  { %382 = vmatpush3.bf16.msra.mxu0 %v381_v39 }
  0x1d   :  { %383 = vmatprep.subr.bf16.mxu0 %v413_v0 }
  0x1e   :  { %406 = vmatpush3.bf16.msra.mxu1 %v405_v46 }
  0x1f   :  { %407 = vmatprep.subr.bf16.mxu1 %v413_v0 }
  0x20   :  { %385 = vmatpush3.bf16.msra.mxu0 %v384_v45 }
  0x22   :  { %409 = vmatpush3.bf16.msra.mxu1 %v408_v52 }
  0x23   :  { %313 = vmatmul.mubr.f32.vlgmr.msra.gmra.mrb[0].mxu0 %v21_v47 }
  0x24   :  { %315 = vmatprep.mubr.msk.f32.mxu0 %vm414_vm0, %v415_v4 }
  0x27   :  { %316 = vmatmul.mubr.f32.gmra.mrb[2].mxu0 %v22_v48 }
  0x28   :  { %318 = vmatprep.mubr.msk.f32.mxu0 %vm414_vm0, %v415_v4 }
  0x2b   :  { %319 = vmatmul.mubr.f32.gmra.mrb[4].mxu0 %v23_v49 }
  0xf6   :  { %v113_v54 = vpop.f32.mrb[0].mxu0 }
  0xf7   :  { %v114_v56 = vadd.f32 %v241_v53, %v113_v54  ;;  %v314_v57 = vpop.f32.mrb[1].mxu0 }
  0xf9   :  { %v132_v58 = vmul.f32 %v131_v55, %v114_v56  ;;  %vm128_vm1 = vcmp.ge.f32.partialorder %v114_v56, 0.0 }
  0xfa   :  { %v118_v59 = vpop.f32.mrb[2].mxu0 }
  0xfb   :  { %v119_v60 = vadd.f32 %v241_v53, %v118_v59  ;;  %v317_v61 = vpop.f32.mrb[3].mxu0  ;;  %v135_v62 = vsel %vm128_vm1, %v114_v56, %v132_v58 }
  0xfc   :  { %354 = vmatmul.mubr.f32.vlgmr.msra.gmra.mrb[0].mxu1 %v135_v62 }
  0xfd   :  { %v133_v63 = vmul.f32 %v131_v55, %v119_v60  ;;  %356 = vmatprep.mubr.msk.f32.mxu1 %vm414_vm0, %v415_v4  ;;  %vm129_vm2 = vcmp.ge.f32.partialorder %v119_v60, 0.0 }
  0xfe   :  { %v123_v0 = vpop.f32.mrb[4].mxu0 }
  0xff   :  { %v124_v1 = vadd.f32 %v241_v53, %v123_v0  ;;  %v320_v2 = vpop.f32.mrb[5].mxu0  ;;  %v136_v3 = vsel %vm129_vm2, %v119_v60, %v133_v63 }
 0x100   :  { %357 = vmatmul.mubr.f32.gmra.mrb[2].mxu1 %v136_v3 }
 0x101   :  { %v134_v5 = vmul.f32 %v131_v55, %v124_v1  ;;  %359 = vmatprep.mubr.msk.f32.mxu1 %vm414_vm0, %v415_v4  ;;  %vm130_vm3 = vcmp.ge.f32.partialorder %v124_v1, 0.0 }
 0x103   :  { %v137_v6 = vsel %vm130_vm3, %v124_v1, %v134_v5 }
 0x104   :  { %360 = vmatmul.mubr.f32.gmra.mrb[4].mxu1 %v137_v6 }
 0x1cf   :  { %v220_v7 = vpop.f32.mrb[0].mxu1 }
 0x1d0   :  { %234 = vst [vmem:[%s599_s5] sm:$0xff] %v220_v7  ;;  %v355_v8 = vpop.f32.mrb[1].mxu1 }
 0x1d3   :  { %v225_v9 = vpop.f32.mrb[2].mxu1 }
 0x1d4   :  { %235 = vst [vmem:[%s599_s5 + $0x8] sm:$0xff] %v225_v9  ;;  %v358_v10 = vpop.f32.mrb[3].mxu1 }
 0x1d7   :  { %v230_v11 = vpop.f32.mrb[4].mxu1 }
 0x1d8   :  { %236 = vst [vmem:[%s599_s5 + $0x10] sm:$0x3] %v230_v11  ;;  %v361_v4 = vpop.f32.mrb[5].mxu1 }

// kernel: ppm_forward.7
= control target key start
LH: loop header
LB: loop body
LE: loop exit
PB: predicated region body
PF: predicated region fallthrough
CT: control target
= control target key end

     0   :  { %s5338_s17 = smov 0   ;;  %s5340_s18 = smov 0   ;;  %s6524_s0 = inlined_call_operand.vmem [shape: f32[2,18,18,128], index: 0, kind: input, shape index: {}]   ;;  %s6525_s1 = inlined_call_operand.vmem [shape: f32[3,3,128,128], index: 1, kind: input, shape index: {}]   ;;  %s6526_s2 = inlined_call_operand.vmem [shape: f32[1,128], index: 2, kind: input, shape index: {}]   ;;  %s6527_s3 = inlined_call_operand.<no memory space> [shape: f32[1], index: 3, kind: input, shape index: {}]   ;;  %s6528_s4 = inlined_call_operand.vmem [shape: f32[2,256,128], index: 4, kind: output, shape index: {}]  }
   0x1   :  { %9 = sst [smem:[#allocation2]] %s6527_s3  ;;  %s5342_s19 = smov 0  }
   0x2 LB: > { %s27_s3 = sadd.s32 1, %s5304_s18  ;;  %p3221_p0 = scmp.ge.s32.totalorder %s5308_s19, 1  ;;  %s5308_s19 = sphi %s5342_s19, %s15_s19   ;;  %s5304_s18 = sphi %s5340_s18, %s6630_s18   ;;  %s5300_s17 = sphi %s5338_s17, %s6629_s17  }
   0x3   : > { %p29_p1 = scmp.ge.s32.totalorder %s27_s3, 2  ;;  %p194_p2 = scmp.lt.s32.totalorder %s5308_s19, 3 }
   0x5   : > { %s6632_s3 = smov (%p29_p1, %s27_s3), 0  ;;  %p195_p3 = pnand %p3221_p0, %p194_p2 }
   0x7   : > { %198 = sbr.rel (%p195_p3) target bundleno = 555 (0x22b), region = 36 }
   0xe   : > { %v3225_v0 = vld [vmem:[%s6525_s1 + $0x80] sm:$0xff]  ;;  %v3226_v1 = vld [vmem:[%s6525_s1 + $0x88] sm:$0xff]  ;;  %p230_p4 = scmp.lt.s32.totalorder %s5300_s17, 1  ;;  %v3227_v5 = vld [vmem:[%s6525_s1 + $0x90] sm:$0xff] }
   0xf   : > { %v3337_v2 = vld [vmem:[%s6525_s1 + $0x200] sm:$0xff]  ;;  %v4701_v3 = vpack.c.bf16 %v3226_v1, %v3225_v0  ;;  %v3338_v4 = vld [vmem:[%s6525_s1 + $0x208] sm:$0xff]  ;;  %v3228_v6 = vld [vmem:[%s6525_s1 + $0x98] sm:$0xff] }
  0x10   : > { %v5374_v7 = vpack.c.bf16 %v3338_v4, %v3337_v2  ;;  %v4705_v8 = vpack.c.bf16 %v3228_v6, %v3227_v5  ;;  %v3339_v9 = vld [vmem:[%s6525_s1 + $0x210] sm:$0xff]  ;;  %v3340_v10 = vld [vmem:[%s6525_s1 + $0x218] sm:$0xff]  ;;  %v3229_v11 = vld [vmem:[%s6525_s1 + $0xa0] sm:$0xff]  ;;  %s6634_s17 = smov (!%p230_p4, %s5300_s17), 1 }
  0x11   : > { %4702 = vmatprep.subr.bf16.mxu1 %v4701_v3  ;;  %v5387_v12 = vpack.c.bf16 %v3340_v10, %v3339_v9  ;;  %v3230_v13 = vld [vmem:[%s6525_s1 + $0xa8] sm:$0xff]  ;;  %v3341_v14 = vld [vmem:[%s6525_s1 + $0x220] sm:$0xff]  ;;  %s5261_s21 = smul.u32 432, %s6634_s17  ;;  %v3231_v18 = vld [vmem:[%s6525_s1 + $0xb0] sm:$0xff]  ;;  %s3548_s26 = sshll.u32 %s6634_s17, 8 }
  0x12   : > { %v3342_v15 = vld [vmem:[%s6525_s1 + $0x228] sm:$0xff]  ;;  %4830 = vmatprep.subr.bf16.mxu0 %v5374_v7  ;;  %4704 = vmatpush3.bf16.msra.mxu1 %v4701_v3  ;;  %v4709_v16 = vpack.c.bf16 %v3230_v13, %v3229_v11  ;;  %v3232_v19 = vld [vmem:[%s6525_s1 + $0xb8] sm:$0xff]  ;;  %v3343_v20 = vld [vmem:[%s6525_s1 + $0x230] sm:$0xff]  ;;  %s6411_s29 = scalar_lea.vmem %s6528_s4, %s3548_s26 }
  0x13   : > { %6567 = vst [vmem:[#allocation3_spill] sm:$0xff] %v5387_v12  ;;  %4832 = vmatpush3.bf16.msra.mxu0 %v5374_v7  ;;  %4706 = vmatprep.subr.bf16.mxu1 %v4705_v8  ;;  %v5402_v17 = vpack.c.bf16 %v3342_v15, %v3341_v14  ;;  %v3344_v21 = vld [vmem:[%s6525_s1 + $0x238] sm:$0xff]  ;;  %s5419_s6 = scalar_lea.vmem %s6524_s0, %s5261_s21  ;;  %v4713_v22 = vpack.c.bf16 %v3232_v19, %v3231_v18  ;;  %v3233_v24 = vld [vmem:[%s6525_s1 + $0xc0] sm:$0xff]  ;;  %v3234_v25 = vld [vmem:[%s6525_s1 + $0xc8] sm:$0xff] }
  0x14   : > { %4834 = vmatprep.subr.bf16.mxu0 %v5387_v12  ;;  %v5423_v23 = vpack.c.bf16 %v3344_v21, %v3343_v20  ;;  %v300_v26 = vld [vmem:[%s5419_s6 + $0x1] sm:$0xff]  ;;  %v5439_v29 = vld [vmem:[%s5419_s6 + $0x19] sm:$0xff]  ;;  %v4717_v30 = vpack.c.bf16 %v3234_v25, %v3233_v24  ;;  %v3235_v32 = vld [vmem:[%s6525_s1 + $0xd0] sm:$0xff] }
  0x15   : > { %6568 = vst [vmem:[#allocation4_spill] sm:$0xff] %v5402_v17  ;;  %v3345_v27 = vld [vmem:[%s6525_s1 + $0x240] sm:$0xff]  ;;  %v3346_v28 = vld [vmem:[%s6525_s1 + $0x248] sm:$0xff]  ;;  %4013 = vmatprep.mubr.f32.mxu1 %v300_v26  ;;  %4333 = vmatprep.mubr.f32.mxu0 %v5439_v29  ;;  %v3236_v33 = vld [vmem:[%s6525_s1 + $0xd8] sm:$0xff] }
  0x16   : > { %4708 = vmatpush3.bf16.msra.mxu1 %v4705_v8  ;;  %6569 = vst [vmem:[#allocation5_spill] sm:$0xff] %v5423_v23  ;;  %v5444_v31 = vpack.c.bf16 %v3346_v28, %v3345_v27  ;;  %v3347_v34 = vld [vmem:[%s6525_s1 + $0x250] sm:$0xff]  ;;  %v3348_v35 = vld [vmem:[%s6525_s1 + $0x258] sm:$0xff]  ;;  %v4721_v36 = vpack.c.bf16 %v3236_v33, %v3235_v32  ;;  %v3237_v38 = vld [vmem:[%s6525_s1 + $0xe0] sm:$0xff] }
  0x17   : > { %4836 = vmatpush3.bf16.msra.mxu0 %v5387_v12  ;;  %4710 = vmatprep.subr.bf16.mxu1 %v4709_v16  ;;  %v5460_v37 = vpack.c.bf16 %v3348_v35, %v3347_v34  ;;  %v3238_v39 = vld [vmem:[%s6525_s1 + $0xe8] sm:$0xff]  ;;  %v3349_v40 = vld [vmem:[%s6525_s1 + $0x260] sm:$0xff]  ;;  %v3239_v44 = vld [vmem:[%s6525_s1 + $0xf0] sm:$0xff] }
  0x18   : > { %4838 = vmatprep.subr.bf16.mxu0 %v5402_v17  ;;  %6570 = vst [vmem:[#allocation6_spill] sm:$0xff] %v5444_v31  ;;  %v3350_v41 = vld [vmem:[%s6525_s1 + $0x268] sm:$0xff]  ;;  %v4725_v42 = vpack.c.bf16 %v3238_v39, %v3237_v38  ;;  %v3240_v45 = vld [vmem:[%s6525_s1 + $0xf8] sm:$0xff]  ;;  %v3351_v46 = vld [vmem:[%s6525_s1 + $0x270] sm:$0xff] }
  0x19   : > { %6571 = vst [vmem:[#allocation7_spill] sm:$0xff] %v5460_v37  ;;  %v5476_v43 = vpack.c.bf16 %v3350_v41, %v3349_v40  ;;  %v3352_v47 = vld [vmem:[%s6525_s1 + $0x278] sm:$0xff]  ;;  %v4729_v48 = vpack.c.bf16 %v3240_v45, %v3239_v44  ;;  %v284_v50 = vld [vmem:[%s6525_s1] sm:$0xff]  ;;  %v285_v51 = vld [vmem:[%s6525_s1 + $0x8] sm:$0xff] }
  0x1a   : > { %4712 = vmatpush3.bf16.msra.mxu1 %v4709_v16  ;;  %v5492_v49 = vpack.c.bf16 %v3352_v47, %v3351_v46  ;;  %v3385_v52 = vld [vmem:[%s6525_s1 + $0x280] sm:$0xff]  ;;  %v3386_v53 = vld [vmem:[%s6525_s1 + $0x288] sm:$0xff]  ;;  %v4733_v54 = vpack.c.bf16 %v285_v51, %v284_v50  ;;  %v3387_v56 = vld [vmem:[%s6525_s1 + $0x290] sm:$0xff] }
  0x1b   : > { %4840 = vmatpush3.bf16.msra.mxu0 %v5402_v17  ;;  %4714 = vmatprep.subr.bf16.mxu1 %v4713_v22  ;;  %6572 = vst [vmem:[#allocation8_spill] sm:$0xff] %v5476_v43  ;;  %v4861_v55 = vpack.c.bf16 %v3386_v53, %v3385_v52  ;;  %v3388_v57 = vld [vmem:[%s6525_s1 + $0x298] sm:$0xff]  ;;  %v301_v58 = vld [vmem:[%s5419_s6 + $0x9] sm:$0xff]  ;;  %v3306_v61 = vld [vmem:[%s5419_s6 + $0x21] sm:$0xff] }
  0x1c   : > { %4842 = vmatprep.subr.bf16.mxu0 %v5423_v23  ;;  %6573 = vst [vmem:[#allocation9_spill] sm:$0xff] %v5492_v49  ;;  %v286_v59 = vld [vmem:[%s6525_s1 + $0x10] sm:$0xff]  ;;  %v287_v60 = vld [vmem:[%s6525_s1 + $0x18] sm:$0xff]  ;;  %v4865_v62 = vpack.c.bf16 %v3388_v57, %v3387_v56  ;;  %v3389_v1 = vld [vmem:[%s6525_s1 + $0x2a0] sm:$0xff] }
  0x1d   : > { %v3307_v63 = vld [vmem:[%s5419_s6 + $0x31] sm:$0xff]  ;;  %v4737_v0 = vpack.c.bf16 %v287_v60, %v286_v59  ;;  %v3390_v2 = vld [vmem:[%s6525_s1 + $0x2a8] sm:$0xff]  ;;  %v288_v3 = vld [vmem:[%s6525_s1 + $0x20] sm:$0xff] }
  0x1e   : > { %4716 = vmatpush3.bf16.msra.mxu1 %v4713_v22  ;;  %v289_v4 = vld [vmem:[%s6525_s1 + $0x28] sm:$0xff]  ;;  %v3308_v5 = vld [vmem:[%s5419_s6 + $0x39] sm:$0xff]  ;;  %v4869_v8 = vpack.c.bf16 %v3390_v2, %v3389_v1  ;;  %v3391_v9 = vld [vmem:[%s6525_s1 + $0x2b0] sm:$0xff] }
  0x1f   : > { %4844 = vmatpush3.bf16.msra.mxu0 %v5423_v23  ;;  %4718 = vmatprep.subr.bf16.mxu1 %v4717_v30  ;;  %v3309_v6 = vld [vmem:[%s5419_s6 + $0x49] sm:$0xff]  ;;  %v3392_v10 = vld [vmem:[%s6525_s1 + $0x2b8] sm:$0xff]  ;;  %v4741_v11 = vpack.c.bf16 %v289_v4, %v288_v3  ;;  %v3311_v16 = vld [vmem:[%s5419_s6 + $0x61] sm:$0xff] }
  0x20   : > { %4846 = vmatprep.subr.bf16.mxu0 %v5444_v31  ;;  %v290_v13 = vld [vmem:[%s6525_s1 + $0x30] sm:$0xff]  ;;  %v291_v14 = vld [vmem:[%s6525_s1 + $0x38] sm:$0xff]  ;;  %v4873_v18 = vpack.c.bf16 %v3392_v10, %v3391_v9  ;;  %v3393_v19 = vld [vmem:[%s6525_s1 + $0x2c0] sm:$0xff] }
  0x21   : > { %v3310_v15 = vld [vmem:[%s5419_s6 + $0x51] sm:$0xff]  ;;  %v3394_v20 = vld [vmem:[%s6525_s1 + $0x2c8] sm:$0xff]  ;;  %v4745_v21 = vpack.c.bf16 %v291_v14, %v290_v13  ;;  %v292_v22 = vld [vmem:[%s6525_s1 + $0x40] sm:$0xff] }
  0x22   : > { %4720 = vmatpush3.bf16.msra.mxu1 %v4717_v30  ;;  %v293_v24 = vld [vmem:[%s6525_s1 + $0x48] sm:$0xff]  ;;  %v3313_v26 = vld [vmem:[%s5419_s6 + $0x79] sm:$0xff]  ;;  %v4877_v27 = vpack.c.bf16 %v3394_v20, %v3393_v19  ;;  %v3395_v28 = vld [vmem:[%s6525_s1 + $0x2d0] sm:$0xff] }
  0x23   : > { %4848 = vmatpush3.bf16.msra.mxu0 %v5444_v31  ;;  %4722 = vmatprep.subr.bf16.mxu1 %v4721_v36  ;;  %v3312_v25 = vld [vmem:[%s5419_s6 + $0x69] sm:$0xff]  ;;  %v4749_v30 = vpack.c.bf16 %v293_v24, %v292_v22  ;;  %v295_v33 = vld [vmem:[%s6525_s1 + $0x58] sm:$0xff]  ;;  %v3314_v34 = vld [vmem:[%s5419_s6 + $0x81] sm:$0xff] }
  0x24   : > { %4850 = vmatprep.subr.bf16.mxu0 %v5460_v37  ;;  %v294_v32 = vld [vmem:[%s6525_s1 + $0x50] sm:$0xff]  ;;  %v3397_v38 = vld [vmem:[%s6525_s1 + $0x2e0] sm:$0xff]  ;;  %v3398_v39 = vld [vmem:[%s6525_s1 + $0x2e8] sm:$0xff] }
  0x25   : > { %v5581_v35 = vld [vmem:[%s5419_s6 + $0x91] sm:$0xff]  ;;  %v4753_v40 = vpack.c.bf16 %v295_v33, %v294_v32  ;;  %v296_v41 = vld [vmem:[%s6525_s1 + $0x60] sm:$0xff]  ;;  %v3317_v45 = vld [vmem:[%s5419_s6 + $0xa9] sm:$0xff]  ;;  %v4885_v46 = vpack.c.bf16 %v3398_v39, %v3397_v38 }
  0x26   : > { %4724 = vmatpush3.bf16.msra.mxu1 %v4721_v36  ;;  %v3316_v44 = vld [vmem:[%s5419_s6 + $0x99] sm:$0xff]  ;;  %v3399_v47 = vld [vmem:[%s6525_s1 + $0x2f0] sm:$0xff]  ;;  %v3434_v57 = vld [vmem:[%s6525_s1 + $0x308] sm:$0xff] }
  0x27   : > { %4852 = vmatpush3.bf16.msra.mxu0 %v5460_v37  ;;  %4726 = vmatprep.subr.bf16.mxu1 %v4725_v42  ;;  %v298_v51 = vld [vmem:[%s6525_s1 + $0x70] sm:$0xff]  ;;  %v299_v52 = vld [vmem:[%s6525_s1 + $0x78] sm:$0xff]  ;;  %v3433_v56 = vld [vmem:[%s6525_s1 + $0x300] sm:$0xff] }
  0x28   : > { %4854 = vmatprep.subr.bf16.mxu0 %v5476_v43  ;;  %v3318_v53 = vld [vmem:[%s5419_s6 + $0xb1] sm:$0xff]  ;;  %v3241_v59 = vld [vmem:[%s6525_s1 + $0x100] sm:$0xff]  ;;  %v3242_v60 = vld [vmem:[%s6525_s1 + $0x108] sm:$0xff] }
  0x29   : > { %v3436_v1 = vld [vmem:[%s6525_s1 + $0x318] sm:$0xff]  ;;  %v5640_v2 = vpack.c.bf16 %v3242_v60, %v3241_v59  ;;  %v5646_v3 = vld [vmem:[%s5419_s6 + $0x22] sm:$0xff]  ;;  %v5675_v14 = vld [vmem:[%s5419_s6 + $0x4a] sm:$0xff] }
  0x2a   : > { %4728 = vmatpush3.bf16.msra.mxu1 %v4725_v42  ;;  %v297_v42 = vld [vmem:[%s6525_s1 + $0x68] sm:$0xff]  ;;  %v5649_v4 = vld [vmem:[%s5419_s6 + $0xd9] sm:$0xff]  ;;  %v5672_v13 = vld [vmem:[%s5419_s6 + $0xf1] sm:$0xff] }
  0x2b   : > { %4856 = vmatpush3.bf16.msra.mxu0 %v5476_v43  ;;  %4730 = vmatprep.subr.bf16.mxu1 %v4729_v48  ;;  %v4757_v50 = vpack.c.bf16 %v297_v42, %v296_v41  ;;  %v3438_v9 = vld [vmem:[%s6525_s1 + $0x328] sm:$0xff]  ;;  %v5687_v19 = vld [vmem:[%s5419_s6 + $0xf9] sm:$0xff]  ;;  %v3443_v33 = vld [vmem:[%s6525_s1 + $0x350] sm:$0xff] }
  0x2c   : > { %4858 = vmatprep.subr.bf16.mxu0 %v5492_v49  ;;  %v5665_v10 = vld [vmem:[%s5419_s6 + $0xe1] sm:$0xff]  ;;  %v5691_v20 = vld [vmem:[%s5419_s6 + $0x52] sm:$0xff] }
  0x2d   : > { %v5697_v22 = vld [vmem:[%s5419_s6 + $0x62] sm:$0xff]  ;;  %v5738_v39 = vld [vmem:[%s5419_s6 + $0x139] sm:$0xff] }
  0x2e   : > { %4732 = vmatpush3.bf16.msra.mxu1 %v4729_v48  ;;  %v3400_v48 = vld [vmem:[%s6525_s1 + $0x2f8] sm:$0xff]  ;;  %v5735_v38 = vld [vmem:[%s5419_s6 + $0x82] sm:$0xff]  ;;  %6578 = vst [vmem:[#allocation14_spill] sm:$0xff] %v5738_v39 }
  0x2f   : > { %4860 = vmatpush3.bf16.msra.mxu0 %v5492_v49  ;;  %4734 = vmatprep.subr.bf16.mxu1 %v4733_v54  ;;  %v3445_v42 = vld [vmem:[%s6525_s1 + $0x360] sm:$0xff]  ;;  %v3482_v60 = vld [vmem:[%s6525_s1 + $0x388] sm:$0xff]  ;;  %v3252_v49 = vld [vmem:[%s6525_s1 + $0x158] sm:$0xff] }
  0x30   : > { %4862 = vmatprep.subr.bf16.mxu0 %v4861_v55  ;;  %v3481_v59 = vld [vmem:[%s6525_s1 + $0x380] sm:$0xff]  ;;  %v5915_v43 = vld [vmem:[%s5419_s6 + $0x152] sm:$0xff]  ;;  %v3290_v17 = vld [vmem:[%s6525_s1 + $0x188] sm:$0xff] }
  0x31   : > { %4014 = vmatmul.mubr.f32.vlgmr.msra.gmra.mrb[0].mxu1 %v301_v58  ;;  %v4761_v58 = vpack.c.bf16 %v299_v52, %v298_v51  ;;  %v3447_v51 = vld [vmem:[%s6525_s1 + $0x370] sm:$0xff]  ;;  %v3448_v52 = vld [vmem:[%s6525_s1 + $0x378] sm:$0xff]  ;;  %v3253_v37 = vld [vmem:[%s6525_s1 + $0x160] sm:$0xff] }
  0x32   : > { %4334 = vmatmul.mubr.f32.vlgmr.msra.gmra.mrb[0].mxu0 %v3306_v61  ;;  %4736 = vmatpush3.bf16.msra.mxu1 %v4733_v54  ;;  %v5613_v54 = vld [vmem:[%s5419_s6 + $0xc1] sm:$0xff]  ;;  %v3484_v12 = vld [vmem:[%s6525_s1 + $0x398] sm:$0xff] }
  0x33   : > { %4864 = vmatpush3.bf16.msra.mxu0 %v4861_v55  ;;  %4016 = vmatprep.mubr.f32.mxu1 %v5439_v29  ;;  %v3396_v29 = vld [vmem:[%s6525_s1 + $0x2d8] sm:$0xff]  ;;  %v4889_v55 = vpack.c.bf16 %v3400_v48, %v3399_v47  ;;  %v5763_v48 = vld [vmem:[%s5419_s6 + $0xaa] sm:$0xff]  ;;  %v3383_v23 = vld [vmem:[%s5419_s6 + $0x182] sm:$0xff] }
  0x34   : > { %4336 = vmatprep.mubr.f32.mxu0 %v3307_v63  ;;  %4866 = vmatprep.subr.bf16.mxu0 %v4865_v62  ;;  %v4881_v36 = vpack.c.bf16 %v3396_v29, %v3395_v28  ;;  %v5713_v28 = vld [vmem:[%s5419_s6 + $0x6a] sm:$0xff]  ;;  %v5716_v29 = vld [vmem:[%s5419_s6 + $0x121] sm:$0xff] }
  0x35   : > { %4017 = vmatmul.mubr.f32.gmra.mrb[2].mxu1 %v3306_v61  ;;  %4738 = vmatprep.subr.bf16.mxu1 %v4737_v0  ;;  %v5629_v61 = vld [vmem:[%s5419_s6 + $0xc9] sm:$0xff]  ;;  %6576 = vst [vmem:[#allocation12_spill] sm:$0xff] %v5716_v29  ;;  %v5760_v47 = vld [vmem:[%s5419_s6 + $0x151] sm:$0xff] }
  0x36   : > { %4337 = vmatmul.mubr.f32.gmra.mrb[2].mxu0 %v3308_v5  ;;  %4019 = vmatprep.mubr.f32.mxu1 %v3307_v63  ;;  %v4893_v63 = vpack.c.bf16 %v3434_v57, %v3433_v56  ;;  %6580 = vst [vmem:[#allocation16_spill] sm:$0xff] %v5760_v47  ;;  %v5782_v56 = vld [vmem:[%s5419_s6 + $0x169] sm:$0xff] }
  0x37   : > { %4868 = vmatpush3.bf16.msra.mxu0 %v4865_v62  ;;  %4339 = vmatprep.mubr.f32.mxu0 %v3309_v6  ;;  %v5632_v62 = vld [vmem:[%s5419_s6 + $0x1a] sm:$0xff]  ;;  %6582 = vst [vmem:[#allocation18_spill] sm:$0xff] %v5782_v56  ;;  %v5785_v57 = vld [vmem:[%s5419_s6 + $0xc2] sm:$0xff] }
  0x38   : > { %4870 = vmatprep.subr.bf16.mxu0 %v4869_v8  ;;  %4740 = vmatpush3.bf16.msra.mxu1 %v4737_v0  ;;  %v3435_v0 = vld [vmem:[%s6525_s1 + $0x310] sm:$0xff] }
  0x39   : > { %4020 = vmatmul.mubr.f32.gmra.mrb[4].mxu1 %v3308_v5  ;;  %4742 = vmatprep.subr.bf16.mxu1 %v4741_v11  ;;  %v5652_v5 = vld [vmem:[%s5419_s6 + $0x32] sm:$0xff] }
  0x3a   : > { %4340 = vmatmul.mubr.f32.gmra.mrb[4].mxu0 %v3310_v15  ;;  %4022 = vmatprep.mubr.f32.mxu1 %v3309_v6  ;;  %v4897_v6 = vpack.c.bf16 %v3436_v1, %v3435_v0  ;;  %v5801_v0 = vld [vmem:[%s5419_s6 + $0xca] sm:$0xff]  ;;  %v252_v1 = vld [vmem:[%s5419_s6] sm:$0xff] }
  0x3b   : > { %4872 = vmatpush3.bf16.msra.mxu0 %v4869_v8  ;;  %4342 = vmatprep.mubr.f32.mxu0 %v3311_v16  ;;  %v3437_v8 = vld [vmem:[%s6525_s1 + $0x320] sm:$0xff] }
  0x3c   : > { %4874 = vmatprep.subr.bf16.mxu0 %v4873_v18  ;;  %4744 = vmatpush3.bf16.msra.mxu1 %v4741_v11  ;;  %v5669_v11 = vld [vmem:[%s5419_s6 + $0x3a] sm:$0xff] }
  0x3d   : > { %4023 = vmatmul.mubr.f32.gmra.mrb[6].mxu1 %v3310_v15  ;;  %4746 = vmatprep.subr.bf16.mxu1 %v4745_v21  ;;  %v4901_v15 = vpack.c.bf16 %v3438_v9, %v3437_v8  ;;  %v5807_v8 = vpack.c.bf16 %v3482_v60, %v3481_v59  ;;  %v3243_v9 = vld [vmem:[%s6525_s1 + $0x110] sm:$0xff]  ;;  %v5868_v59 = vld [vmem:[%s5419_s6 + $0x48] sm:$0xff] }
  0x3e   : > { %4343 = vmatmul.mubr.f32.gmra.mrb[6].mxu0 %v3312_v25  ;;  %4025 = vmatprep.mubr.f32.mxu1 %v3311_v16  ;;  %v3439_v16 = vld [vmem:[%s6525_s1 + $0x330] sm:$0xff]  ;;  %6586 = vst [vmem:[#allocation22_spill] sm:$0xff] %v5868_v59  ;;  %v5871_v60 = vld [vmem:[%s5419_s6 + $0x122] sm:$0xff] }
  0x3f   : > { %4876 = vmatpush3.bf16.msra.mxu0 %v4873_v18  ;;  %4345 = vmatprep.mubr.f32.mxu0 %v3313_v26  ;;  %v3440_v18 = vld [vmem:[%s6525_s1 + $0x338] sm:$0xff] }
  0x40   : > { %4878 = vmatprep.subr.bf16.mxu0 %v4877_v27  ;;  %4748 = vmatpush3.bf16.msra.mxu1 %v4745_v21  ;;  %v5694_v21 = vld [vmem:[%s5419_s6 + $0x109] sm:$0xff]  ;;  %v4905_v24 = vpack.c.bf16 %v3440_v18, %v3439_v16 }
  0x41   : > { %4026 = vmatmul.mubr.f32.gmra.mrb[8].mxu1 %v3312_v25  ;;  %4750 = vmatprep.subr.bf16.mxu1 %v4749_v30  ;;  %6574 = vst [vmem:[#allocation10_spill] sm:$0xff] %v5694_v21  ;;  %v3441_v25 = vld [vmem:[%s6525_s1 + $0x340] sm:$0xff]  ;;  %v253_v16 = vld [vmem:[%s5419_s6 + $0x8] sm:$0xff] }
  0x42   : > { %4346 = vmatmul.mubr.f32.gmra.mrb[8].mxu0 %v3314_v34  ;;  %4028 = vmatprep.mubr.f32.mxu1 %v3313_v26  ;;  %v3442_v26 = vld [vmem:[%s6525_s1 + $0x348] sm:$0xff] }
  0x43   : > { %4880 = vmatpush3.bf16.msra.mxu0 %v4877_v27  ;;  %4348 = vmatprep.mubr.f32.mxu0 %v5581_v35  ;;  %v5709_v27 = vld [vmem:[%s5419_s6 + $0x111] sm:$0xff]  ;;  %v4909_v32 = vpack.c.bf16 %v3442_v26, %v3441_v25  ;;  %v5820_v18 = vld [vmem:[%s5419_s6 + $0xe2] sm:$0xff] }
  0x44   : > { %4882 = vmatprep.subr.bf16.mxu0 %v4881_v36  ;;  %4752 = vmatpush3.bf16.msra.mxu1 %v4749_v30  ;;  %6575 = vst [vmem:[#allocation11_spill] sm:$0xff] %v5709_v27  ;;  %v5719_v30 = vld [vmem:[%s5419_s6 + $0x7a] sm:$0xff]  ;;  %v5826_v25 = vld [vmem:[%s5419_s6 + $0xf2] sm:$0xff] }
  0x45   : > { %4029 = vmatmul.mubr.f32.gmra.mrb[10].mxu1 %v3314_v34  ;;  %4754 = vmatprep.subr.bf16.mxu1 %v4753_v40  ;;  %v3444_v34 = vld [vmem:[%s6525_s1 + $0x358] sm:$0xff] }
  0x46   : > { %4349 = vmatmul.mubr.f32.gmra.mrb[10].mxu0 %v3316_v44  ;;  %4031 = vmatprep.mubr.f32.mxu1 %v5581_v35  ;;  %v4913_v41 = vpack.c.bf16 %v3444_v34, %v3443_v33  ;;  %v3246_v33 = vld [vmem:[%s6525_s1 + $0x128] sm:$0xff]  ;;  %v5838_v34 = vld [vmem:[%s5419_s6 + $0x20] sm:$0xff] }
  0x47   : > { %4884 = vmatpush3.bf16.msra.mxu0 %v4881_v36  ;;  %4351 = vmatprep.mubr.f32.mxu0 %v3317_v45  ;;  %v5731_v36 = vld [vmem:[%s5419_s6 + $0x129] sm:$0xff] }
  0x48   : > { %4886 = vmatprep.subr.bf16.mxu0 %v4885_v46  ;;  %4756 = vmatpush3.bf16.msra.mxu1 %v4753_v40  ;;  %6577 = vst [vmem:[#allocation13_spill] sm:$0xff] %v5731_v36  ;;  %v5741_v40 = vld [vmem:[%s5419_s6 + $0x92] sm:$0xff] }
  0x49   : > { %4032 = vmatmul.mubr.f32.gmra.mrb[12].mxu1 %v3316_v44  ;;  %4758 = vmatprep.subr.bf16.mxu1 %v4757_v50  ;;  %v3446_v44 = vld [vmem:[%s6525_s1 + $0x368] sm:$0xff] }
  0x4a   : > { %4352 = vmatmul.mubr.f32.gmra.mrb[12].mxu0 %v3318_v53  ;;  %4034 = vmatprep.mubr.f32.mxu1 %v3317_v45  ;;  %v5753_v45 = vld [vmem:[%s5419_s6 + $0x141] sm:$0xff] }
  0x4b   : > { %4888 = vmatpush3.bf16.msra.mxu0 %v4885_v46  ;;  %4354 = vmatprep.mubr.f32.mxu0 %v5613_v54  ;;  %6579 = vst [vmem:[#allocation15_spill] sm:$0xff] %v5753_v45  ;;  %v5757_v46 = vld [vmem:[%s5419_s6 + $0x9a] sm:$0xff] }
  0x4c   : > { %4890 = vmatprep.subr.bf16.mxu0 %v4889_v55  ;;  %4760 = vmatpush3.bf16.msra.mxu1 %v4757_v50  ;;  %v4917_v50 = vpack.c.bf16 %v3446_v44, %v3445_v42  ;;  %v5846_v42 = vld [vmem:[%s5419_s6 + $0x30] sm:$0xff] }
  0x4d   : > { %4035 = vmatmul.mubr.f32.gmra.mrb[14].mxu1 %v3318_v53  ;;  %4762 = vmatprep.subr.bf16.mxu1 %v4761_v58  ;;  %v5775_v53 = vld [vmem:[%s5419_s6 + $0x159] sm:$0xff]  ;;  %6584 = vst [vmem:[#allocation20_spill] sm:$0xff] %v5846_v42  ;;  %v5849_v44 = vld [vmem:[%s5419_s6 + $0x10a] sm:$0xff] }
  0x4e   : > { %4355 = vmatmul.mubr.f32.gmra.mrb[14].mxu0 %v5629_v61  ;;  %4037 = vmatprep.mubr.f32.mxu1 %v5613_v54  ;;  %6581 = vst [vmem:[#allocation17_spill] sm:$0xff] %v5775_v53 }
  0x4f   : > { %4892 = vmatpush3.bf16.msra.mxu0 %v4889_v55  ;;  %4413 = vmatprep.mubr.f32.mxu0 %v5632_v62  ;;  %v5779_v55 = vld [vmem:[%s5419_s6 + $0xb2] sm:$0xff] }
  0x50   : > { %4894 = vmatprep.subr.bf16.mxu0 %v4893_v63  ;;  %4764 = vmatpush3.bf16.msra.mxu1 %v4761_v58  ;;  %v4921_v58 = vpack.c.bf16 %v3448_v52, %v3447_v51  ;;  %v3248_v51 = vld [vmem:[%s6525_s1 + $0x138] sm:$0xff] }
  0x51   : > { %4038 = vmatmul.mubr.f32.gmra.mrb[16].mxu1 %v5629_v61  ;;  %4766 = vmatprep.subr.bf16.mxu1 %v5640_v2  ;;  %v5861_v52 = vld [vmem:[%s5419_s6 + $0x38] sm:$0xff] }
  0x52   : > { %4414 = vmatmul.mubr.f32.vlgmr.msra.gmra.mrb[0].mxu0 %v5646_v3  ;;  %4040 = vmatprep.mubr.f32.mxu1 %v5649_v4  ;;  %6585 = vst [vmem:[#allocation21_spill] sm:$0xff] %v5861_v52 }
  0x53   : > { %4896 = vmatpush3.bf16.msra.mxu0 %v4893_v63  ;;  %4416 = vmatprep.mubr.f32.mxu0 %v5652_v5  ;;  %v5797_v63 = vld [vmem:[%s5419_s6 + $0x171] sm:$0xff] }
  0x54   : > { %4898 = vmatprep.subr.bf16.mxu0 %v4897_v6  ;;  %6583 = vst [vmem:[#allocation19_spill] sm:$0xff] %v5797_v63 }
  0x55   : > { %4041 = vmatmul.mubr.f32.gmra.mrb[18].mxu1 %v5665_v10 }
  0x56   : > { %4417 = vmatmul.mubr.f32.gmra.mrb[2].mxu0 %v5669_v11  ;;  %4043 = vmatprep.mubr.f32.mxu1 %v5672_v13 }
  0x57   : > { %4419 = vmatprep.mubr.f32.mxu0 %v5675_v14  ;;  %4900 = vmatpush3.bf16.msra.mxu0 %v4897_v6  ;;  %v5805_v6 = vld [vmem:[%s5419_s6 + $0xda] sm:$0xff] }
  0x58   : > { %4902 = vmatprep.subr.bf16.mxu0 %v4901_v15 }
  0x59   : > { %4044 = vmatmul.mubr.f32.gmra.mrb[20].mxu1 %v5687_v19 }
  0x5a   : > { %4420 = vmatmul.mubr.f32.gmra.mrb[4].mxu0 %v5691_v20  ;;  %4046 = vmatprep.mubr.f32.mxu1 %v5694_v21  ;;  %v3488_v21 = vld [vmem:[%s6525_s1 + $0x3b8] sm:$0xff] }
  0x5b   : > { %4422 = vmatprep.mubr.f32.mxu0 %v5697_v22  ;;  %4904 = vmatpush3.bf16.msra.mxu0 %v4901_v15  ;;  %v3244_v15 = vld [vmem:[%s6525_s1 + $0x118] sm:$0xff] }
  0x5c   : > { %4906 = vmatprep.subr.bf16.mxu0 %v4905_v24  ;;  %v4769_v26 = vpack.c.bf16 %v3244_v15, %v3243_v9  ;;  %v3249_v9 = vld [vmem:[%s6525_s1 + $0x140] sm:$0xff]  ;;  %v3250_v15 = vld [vmem:[%s6525_s1 + $0x148] sm:$0xff] }
  0x5d   : > { %4047 = vmatmul.mubr.f32.gmra.mrb[22].mxu1 %v5709_v27  ;;  %v3483_v27 = vld [vmem:[%s6525_s1 + $0x390] sm:$0xff] }
  0x5e   : > { %4423 = vmatmul.mubr.f32.gmra.mrb[6].mxu0 %v5713_v28  ;;  %4049 = vmatprep.mubr.f32.mxu1 %v5716_v29 }
  0x5f   : > { %4425 = vmatprep.mubr.f32.mxu0 %v5719_v30  ;;  %4908 = vmatpush3.bf16.msra.mxu0 %v4905_v24  ;;  %v5823_v24 = vld [vmem:[%s5419_s6 + $0x18] sm:$0xff] }
  0x60   : > { %4910 = vmatprep.subr.bf16.mxu0 %v4909_v32 }
  0x61   : > { %4050 = vmatmul.mubr.f32.gmra.mrb[24].mxu1 %v5731_v36  ;;  %v3289_v36 = vld [vmem:[%s6525_s1 + $0x180] sm:$0xff] }
  0x62   : > { %4426 = vmatmul.mubr.f32.gmra.mrb[8].mxu0 %v5735_v38  ;;  %4052 = vmatprep.mubr.f32.mxu1 %v5738_v39  ;;  %v5975_v29 = vpack.c.bf16 %v3290_v17, %v3289_v36  ;;  %v5990_v17 = vld [vmem:[%s5419_s6 + $0xd8] sm:$0xff]  ;;  %v3485_v36 = vld [vmem:[%s6525_s1 + $0x3a0] sm:$0xff] }
  0x63   : > { %4428 = vmatprep.mubr.f32.mxu0 %v5741_v40  ;;  %4912 = vmatpush3.bf16.msra.mxu0 %v4909_v32  ;;  %v3245_v32 = vld [vmem:[%s6525_s1 + $0x120] sm:$0xff] }
  0x64   : > { %4914 = vmatprep.subr.bf16.mxu0 %v4913_v41 }
  0x65   : > { %4053 = vmatmul.mubr.f32.gmra.mrb[26].mxu1 %v5753_v45  ;;  %v3256_v45 = vld [vmem:[%s6525_s1 + $0x178] sm:$0xff] }
  0x66   : > { %4429 = vmatmul.mubr.f32.gmra.mrb[10].mxu0 %v5757_v46  ;;  %4055 = vmatprep.mubr.f32.mxu1 %v5760_v47  ;;  %v3255_v47 = vld [vmem:[%s6525_s1 + $0x170] sm:$0xff] }
  0x67   : > { %4431 = vmatprep.mubr.f32.mxu0 %v5763_v48  ;;  %4916 = vmatpush3.bf16.msra.mxu0 %v4913_v41  ;;  %v5843_v41 = vld [vmem:[%s5419_s6 + $0xfa] sm:$0xff]  ;;  %v4793_v39 = vpack.c.bf16 %v3256_v45, %v3255_v47  ;;  %v3384_v45 = vld [vmem:[%s5419_s6 + $0x18a] sm:$0xff] }
  0x68   : > { %4918 = vmatprep.subr.bf16.mxu0 %v4917_v50  ;;  %v5973_v47 = vld [vmem:[%s5419_s6 + $0xc0] sm:$0xff] }
  0x69   : > { %4056 = vmatmul.mubr.f32.gmra.mrb[28].mxu1 %v5775_v53  ;;  %v5937_v53 = vld [vmem:[%s5419_s6 + $0x16a] sm:$0xff]  ;;  %6596 = vst [vmem:[#allocation32_spill] sm:$0xff] %v5973_v47 }
  0x6a   : > { %4432 = vmatmul.mubr.f32.gmra.mrb[12].mxu0 %v5779_v55  ;;  %4058 = vmatprep.mubr.f32.mxu1 %v5782_v56  ;;  %v3254_v56 = vld [vmem:[%s6525_s1 + $0x168] sm:$0xff] }
  0x6b   : > { %4434 = vmatprep.mubr.f32.mxu0 %v5785_v57  ;;  %4920 = vmatpush3.bf16.msra.mxu0 %v4917_v50  ;;  %v4773_v50 = vpack.c.bf16 %v3246_v33, %v3245_v32  ;;  %v5890_v32 = vld [vmem:[%s5419_s6 + $0x60] sm:$0xff]  ;;  %v4789_v31 = vpack.c.bf16 %v3254_v56, %v3253_v37  ;;  %v5953_v37 = vld [vmem:[%s5419_s6 + $0x172] sm:$0xff]  ;;  %v5956_v56 = vld [vmem:[%s5419_s6 + $0xa8] sm:$0xff] }
  0x6c   : > { %4922 = vmatprep.subr.bf16.mxu0 %v4921_v58  ;;  %6588 = vst [vmem:[#allocation24_spill] sm:$0xff] %v5890_v32  ;;  %v5893_v33 = vld [vmem:[%s5419_s6 + $0x13a] sm:$0xff]  ;;  %6594 = vst [vmem:[#allocation30_spill] sm:$0xff] %v5956_v56 }
  0x6d   : > { %4059 = vmatmul.mubr.f32.gmra.mrb[30].mxu1 %v5797_v63 }
  0x6e   : > { %4435 = vmatmul.mubr.f32.gmra.mrb[14].mxu0 %v5801_v0  ;;  %4093 = vmatprep.mubr.f32.mxu1 %v252_v1 }
  0x6f   : > { %4437 = vmatprep.mubr.f32.mxu0 %v5805_v6  ;;  %4924 = vmatpush3.bf16.msra.mxu0 %v4921_v58  ;;  %v5865_v58 = vld [vmem:[%s5419_s6 + $0x112] sm:$0xff] }
  0x70   : > { %4926 = vmatprep.subr.bf16.mxu0 %v5807_v8 }
  0x71   : > { %4094 = vmatmul.mubr.f32.vlgmr.msra.gmra.mrb[0].mxu1 %v253_v16  ;;  %v5883_v16 = vld [vmem:[%s5419_s6 + $0x50] sm:$0xff] }
  0x72   : > { %4438 = vmatmul.mubr.f32.gmra.mrb[16].mxu0 %v5820_v18  ;;  %4768 = vmatpush3.bf16.msra.mxu1 %v5640_v2  ;;  %v3247_v2 = vld [vmem:[%s6525_s1 + $0x130] sm:$0xff]  ;;  %6587 = vst [vmem:[#allocation23_spill] sm:$0xff] %v5883_v16 }
  0x73   : > { %4096 = vmatprep.mubr.f32.mxu1 %v5823_v24  ;;  %4440 = vmatprep.mubr.f32.mxu0 %v5826_v25  ;;  %v4777_v1 = vpack.c.bf16 %v3248_v51, %v3247_v2  ;;  %v4781_v2 = vpack.c.bf16 %v3250_v15, %v3249_v9  ;;  %v3251_v51 = vld [vmem:[%s6525_s1 + $0x150] sm:$0xff]  ;;  %v5909_v9 = vld [vmem:[%s5419_s6 + $0x142] sm:$0xff]  ;;  %v5912_v15 = vld [vmem:[%s5419_s6 + $0x78] sm:$0xff] }
  0x74   : > { %4770 = vmatprep.subr.bf16.mxu1 %v4769_v26  ;;  %6590 = vst [vmem:[#allocation26_spill] sm:$0xff] %v5912_v15  ;;  %v4785_v63 = vpack.c.bf16 %v3252_v49, %v3251_v51  ;;  %v5931_v49 = vld [vmem:[%s5419_s6 + $0x15a] sm:$0xff]  ;;  %v5934_v51 = vld [vmem:[%s5419_s6 + $0x90] sm:$0xff] }
  0x75   : > { %4097 = vmatmul.mubr.f32.gmra.mrb[2].mxu1 %v5838_v34  ;;  %6592 = vst [vmem:[#allocation28_spill] sm:$0xff] %v5934_v51 }
  0x76   : > { %4441 = vmatmul.mubr.f32.gmra.mrb[18].mxu0 %v5843_v41  ;;  %4099 = vmatprep.mubr.f32.mxu1 %v5846_v42 }
  0x77   : > { %4443 = vmatprep.mubr.f32.mxu0 %v5849_v44  ;;  %4772 = vmatpush3.bf16.msra.mxu1 %v4769_v26  ;;  %v5887_v26 = vld [vmem:[%s5419_s6 + $0x12a] sm:$0xff] }
  0x78   : > { %4774 = vmatprep.subr.bf16.mxu1 %v4773_v50 }
  0x79   : > { %4100 = vmatmul.mubr.f32.gmra.mrb[4].mxu1 %v5861_v52 }
  0x7a   : > { %4444 = vmatmul.mubr.f32.gmra.mrb[20].mxu0 %v5865_v58  ;;  %4102 = vmatprep.mubr.f32.mxu1 %v5868_v59 }
  0x7b   : > { %4446 = vmatprep.mubr.f32.mxu0 %v5871_v60  ;;  %4776 = vmatpush3.bf16.msra.mxu1 %v4773_v50  ;;  %v5905_v50 = vld [vmem:[%s5419_s6 + $0x68] sm:$0xff] }
  0x7c   : > { %4778 = vmatprep.subr.bf16.mxu1 %v4777_v1  ;;  %6589 = vst [vmem:[#allocation25_spill] sm:$0xff] %v5905_v50 }
  0x7d   : > { %4103 = vmatmul.mubr.f32.gmra.mrb[6].mxu1 %v5883_v16 }
  0x7e   : > { %4447 = vmatmul.mubr.f32.gmra.mrb[22].mxu0 %v5887_v26  ;;  %4105 = vmatprep.mubr.f32.mxu1 %v5890_v32 }
  0x7f   : > { %4449 = vmatprep.mubr.f32.mxu0 %v5893_v33  ;;  %4780 = vmatpush3.bf16.msra.mxu1 %v4777_v1  ;;  %v5927_v1 = vld [vmem:[%s5419_s6 + $0x80] sm:$0xff] }
  0x80   : > { %4782 = vmatprep.subr.bf16.mxu1 %v4781_v2  ;;  %6591 = vst [vmem:[#allocation27_spill] sm:$0xff] %v5927_v1 }
  0x81   : > { %4106 = vmatmul.mubr.f32.gmra.mrb[8].mxu1 %v5905_v50 }
  0x82   : > { %4450 = vmatmul.mubr.f32.gmra.mrb[24].mxu0 %v5909_v9  ;;  %4108 = vmatprep.mubr.f32.mxu1 %v5912_v15 }
  0x83   : > { %4452 = vmatprep.mubr.f32.mxu0 %v5915_v43  ;;  %4784 = vmatpush3.bf16.msra.mxu1 %v4781_v2  ;;  %v5949_v2 = vld [vmem:[%s5419_s6 + $0x98] sm:$0xff] }
  0x84   : > { %4786 = vmatprep.subr.bf16.mxu1 %v4785_v63  ;;  %6593 = vst [vmem:[#allocation29_spill] sm:$0xff] %v5949_v2 }
  0x85   : > { %4109 = vmatmul.mubr.f32.gmra.mrb[10].mxu1 %v5927_v1 }
  0x86   : > { %4453 = vmatmul.mubr.f32.gmra.mrb[26].mxu0 %v5931_v49  ;;  %4111 = vmatprep.mubr.f32.mxu1 %v5934_v51 }
  0x87   : > { %4455 = vmatprep.mubr.f32.mxu0 %v5937_v53  ;;  %4788 = vmatpush3.bf16.msra.mxu1 %v4785_v63  ;;  %v5969_v63 = vld [vmem:[%s5419_s6 + $0xb0] sm:$0xff] }
  0x88   : > { %4790 = vmatprep.subr.bf16.mxu1 %v4789_v31  ;;  %6595 = vst [vmem:[#allocation31_spill] sm:$0xff] %v5969_v63 }
  0x89   : > { %4112 = vmatmul.mubr.f32.gmra.mrb[12].mxu1 %v5949_v2 }
  0x8a   : > { %4456 = vmatmul.mubr.f32.gmra.mrb[28].mxu0 %v5953_v37  ;;  %4114 = vmatprep.mubr.f32.mxu1 %v5956_v56 }
  0x8b   : > { %4458 = vmatprep.mubr.f32.mxu0 %v3383_v23  ;;  %4792 = vmatpush3.bf16.msra.mxu1 %v4789_v31  ;;  %v5986_v23 = vld [vmem:[%s5419_s6 + $0xc8] sm:$0xff]  ;;  %v4929_v31 = vpack.c.bf16 %v3484_v12, %v3483_v27  ;;  %v6008_v12 = vld [vmem:[%s5419_s6 + $0xf0] sm:$0xff] }
  0x8c   : > { %4794 = vmatprep.subr.bf16.mxu1 %v4793_v39  ;;  %6597 = vst [vmem:[#allocation33_spill] sm:$0xff] %v5986_v23 }
  0x8d   : > { %4115 = vmatmul.mubr.f32.gmra.mrb[14].mxu1 %v5969_v63 }
  0x8e   : > { %4459 = vmatmul.mubr.f32.gmra.mrb[30].mxu0 %v3384_v45  ;;  %4117 = vmatprep.mubr.f32.mxu1 %v5973_v47  ;;  %v3486_v45 = vld [vmem:[%s6525_s1 + $0x3a8] sm:$0xff] }
  0x8f   : > { %4493 = vmatprep.mubr.f32.mxu0 %v5846_v42  ;;  %4796 = vmatpush3.bf16.msra.mxu1 %v4793_v39  ;;  %v6003_v39 = vld [vmem:[%s5419_s6 + $0xe0] sm:$0xff]  ;;  %v4933_v27 = vpack.c.bf16 %v3486_v45, %v3485_v36  ;;  %v6024_v36 = vld [vmem:[%s5419_s6 + $0x108] sm:$0xff] }
  0x90   : > { %4798 = vmatprep.subr.bf16.mxu1 %v5975_v29  ;;  %v800_v42 = vld [vmem:[%s5419_s6 + $0xa] sm:$0xff] }
  0x91   : > { %4118 = vmatmul.mubr.f32.gmra.mrb[16].mxu1 %v5986_v23 }
  0x92   : > { %4494 = vmatmul.mubr.f32.vlgmr.msra.gmra.mrb[0].mxu0 %v5861_v52  ;;  %4120 = vmatprep.mubr.f32.mxu1 %v5990_v17  ;;  %v3487_v52 = vld [vmem:[%s6525_s1 + $0x3b0] sm:$0xff] }
  0x93   : > { %4928 = vmatpush3.bf16.msra.mxu0 %v5807_v8  ;;  %4496 = vmatprep.mubr.f32.mxu0 %v5868_v59  ;;  %v6020_v8 = vld [vmem:[%s5419_s6 + $0xf8] sm:$0xff]  ;;  %v4937_v45 = vpack.c.bf16 %v3488_v21, %v3487_v52  ;;  %v3489_v59 = vld [vmem:[%s6525_s1 + $0x3c0] sm:$0xff] }
  0x94   : > { %4930 = vmatprep.subr.bf16.mxu0 %v4929_v31  ;;  %v6040_v21 = vld [vmem:[%s5419_s6 + $0x120] sm:$0xff] }
  0x95   : > { %4121 = vmatmul.mubr.f32.gmra.mrb[18].mxu1 %v6003_v39 }
  0x96   : > { %4497 = vmatmul.mubr.f32.gmra.mrb[2].mxu0 %v5883_v16  ;;  %4123 = vmatprep.mubr.f32.mxu1 %v6008_v12  ;;  %v3490_v16 = vld [vmem:[%s6525_s1 + $0x3c8] sm:$0xff] }
  0x97   : > { %4499 = vmatprep.mubr.f32.mxu0 %v5890_v32  ;;  %4932 = vmatpush3.bf16.msra.mxu0 %v4929_v31  ;;  %v6036_v31 = vld [vmem:[%s5419_s6 + $0x110] sm:$0xff]  ;;  %v4941_v52 = vpack.c.bf16 %v3490_v16, %v3489_v59  ;;  %v6056_v59 = vld [vmem:[%s5419_s6 + $0x138] sm:$0xff] }
  0x98   : > { %4934 = vmatprep.subr.bf16.mxu0 %v4933_v27  ;;  %v3491_v32 = vld [vmem:[%s6525_s1 + $0x3d0] sm:$0xff] }
  0x99   : > { %4124 = vmatmul.mubr.f32.gmra.mrb[20].mxu1 %v6020_v8 }
  0x9a   : > { %4500 = vmatmul.mubr.f32.gmra.mrb[4].mxu0 %v5905_v50  ;;  %4126 = vmatprep.mubr.f32.mxu1 %v6024_v36  ;;  %v3492_v50 = vld [vmem:[%s6525_s1 + $0x3d8] sm:$0xff] }
  0x9b   : > { %4502 = vmatprep.mubr.f32.mxu0 %v5912_v15  ;;  %4936 = vmatpush3.bf16.msra.mxu0 %v4933_v27  ;;  %v6052_v15 = vld [vmem:[%s5419_s6 + $0x128] sm:$0xff]  ;;  %v4945_v16 = vpack.c.bf16 %v3492_v50, %v3491_v32  ;;  %v3493_v27 = vld [vmem:[%s6525_s1 + $0x3e0] sm:$0xff]  ;;  %v6072_v32 = vld [vmem:[%s5419_s6 + $0x150] sm:$0xff] }
  0x9c   : > { %4938 = vmatprep.subr.bf16.mxu0 %v4937_v45 }
  0x9d   : > { %4127 = vmatmul.mubr.f32.gmra.mrb[22].mxu1 %v6036_v31 }
  0x9e   : > { %4503 = vmatmul.mubr.f32.gmra.mrb[6].mxu0 %v5927_v1  ;;  %4129 = vmatprep.mubr.f32.mxu1 %v6040_v21  ;;  %v3494_v1 = vld [vmem:[%s6525_s1 + $0x3e8] sm:$0xff] }
  0x9f   : > { %4505 = vmatprep.mubr.f32.mxu0 %v5934_v51  ;;  %4940 = vmatpush3.bf16.msra.mxu0 %v4937_v45  ;;  %v6068_v51 = vld [vmem:[%s5419_s6 + $0x140] sm:$0xff]  ;;  %v4949_v50 = vpack.c.bf16 %v3494_v1, %v3493_v27  ;;  %v3495_v45 = vld [vmem:[%s6525_s1 + $0x3f0] sm:$0xff]  ;;  %v6088_v1 = vld [vmem:[%s5419_s6 + $0x168] sm:$0xff] }
  0xa0   : > { %4942 = vmatprep.subr.bf16.mxu0 %v4941_v52  ;;  %v3529_v27 = vld [vmem:[%s6525_s1 + $0x400] sm:$0xff] }
  0xa1   : > { %4130 = vmatmul.mubr.f32.gmra.mrb[24].mxu1 %v6052_v15 }
  0xa2   : > { %4506 = vmatmul.mubr.f32.gmra.mrb[8].mxu0 %v5949_v2  ;;  %4132 = vmatprep.mubr.f32.mxu1 %v6056_v59  ;;  %v3496_v2 = vld [vmem:[%s6525_s1 + $0x3f8] sm:$0xff] }
  0xa3   : > { %4508 = vmatprep.mubr.f32.mxu0 %v5956_v56  ;;  %4944 = vmatpush3.bf16.msra.mxu0 %v4941_v52  ;;  %v6084_v56 = vld [vmem:[%s5419_s6 + $0x158] sm:$0xff]  ;;  %v4953_v52 = vpack.c.bf16 %v3496_v2, %v3495_v45  ;;  %v799_v2 = vld [vmem:[%s5419_s6 + $0x2] sm:$0xff]  ;;  %v3291_v45 = vld [vmem:[%s6525_s1 + $0x190] sm:$0xff] }
  0xa4   : > { %4946 = vmatprep.subr.bf16.mxu0 %v4945_v16 }
  0xa5   : > { %4133 = vmatmul.mubr.f32.gmra.mrb[26].mxu1 %v6068_v51 }
  0xa6   : > { %4509 = vmatmul.mubr.f32.gmra.mrb[10].mxu0 %v5969_v63  ;;  %4135 = vmatprep.mubr.f32.mxu1 %v6072_v32  ;;  %v3530_v63 = vld [vmem:[%s6525_s1 + $0x408] sm:$0xff] }
  0xa7   : > { %4511 = vmatprep.mubr.f32.mxu0 %v5973_v47  ;;  %4948 = vmatpush3.bf16.msra.mxu0 %v4945_v16  ;;  %v6100_v47 = vld [vmem:[%s5419_s6 + $0x170] sm:$0xff]  ;;  %v6104_v16 = vpack.c.bf16 %v3530_v63, %v3529_v27  ;;  %v3293_v63 = vld [vmem:[%s6525_s1 + $0x1a0] sm:$0xff]  ;;  %v3294_v27 = vld [vmem:[%s6525_s1 + $0x1a8] sm:$0xff] }
  0xa8   : > { %4950 = vmatprep.subr.bf16.mxu0 %v4949_v50 }
  0xa9   : > { %4136 = vmatmul.mubr.f32.gmra.mrb[28].mxu1 %v6084_v56 }
  0xaa   : > { %4512 = vmatmul.mubr.f32.gmra.mrb[12].mxu0 %v5986_v23  ;;  %4138 = vmatprep.mubr.f32.mxu1 %v6088_v1  ;;  %v3292_v23 = vld [vmem:[%s6525_s1 + $0x198] sm:$0xff] }
  0xab   : > { %4514 = vmatprep.mubr.f32.mxu0 %v5990_v17  ;;  %4952 = vmatpush3.bf16.msra.mxu0 %v4949_v50  ;;  %v4801_v50 = vpack.c.bf16 %v3292_v23, %v3291_v45  ;;  %v4805_v23 = vpack.c.bf16 %v3294_v27, %v3293_v63  ;;  %v3302_v45 = vld [vmem:[%s6525_s1 + $0x1e8] sm:$0xff]  ;;  %v3304_v63 = vld [vmem:[%s6525_s1 + $0x1f8] sm:$0xff] }
  0xac   : > { %4954 = vmatprep.subr.bf16.mxu0 %v4953_v52  ;;  %v3431_v27 = vld [vmem:[%s5419_s6 + $0x198] sm:$0xff] }
  0xad   : > { %4139 = vmatmul.mubr.f32.gmra.mrb[30].mxu1 %v6100_v47 }
  0xae   : > { %4515 = vmatmul.mubr.f32.gmra.mrb[14].mxu0 %v6003_v39  ;;  %4173 = vmatprep.mubr.f32.mxu1 %v799_v2  ;;  %v3300_v2 = vld [vmem:[%s6525_s1 + $0x1d8] sm:$0xff] }
  0xaf   : > { %4517 = vmatprep.mubr.f32.mxu0 %v6008_v12  ;;  %4956 = vmatpush3.bf16.msra.mxu0 %v4953_v52  ;;  %v3296_v52 = vld [vmem:[%s6525_s1 + $0x1b8] sm:$0xff] }
  0xb0   : > { %4958 = vmatprep.subr.bf16.mxu0 %v6104_v16 }
  0xb1   : > { %4174 = vmatmul.mubr.f32.vlgmr.msra.gmra.mrb[0].mxu1 %v800_v42  ;;  %v3295_v42 = vld [vmem:[%s6525_s1 + $0x1b0] sm:$0xff] }
  0xb2   : > { %4518 = vmatmul.mubr.f32.gmra.mrb[16].mxu0 %v6020_v8  ;;  %4800 = vmatpush3.bf16.msra.mxu1 %v5975_v29  ;;  %v3298_v29 = vld [vmem:[%s6525_s1 + $0x1c8] sm:$0xff] }
  0xb3   : > { %4176 = vmatprep.mubr.f32.mxu1 %v5632_v62  ;;  %4520 = vmatprep.mubr.f32.mxu0 %v6024_v36  ;;  %v4809_v62 = vpack.c.bf16 %v3296_v52, %v3295_v42  ;;  %v3531_v42 = vld [vmem:[%s6525_s1 + $0x410] sm:$0xff] }
  0xb4   : > { %4802 = vmatprep.subr.bf16.mxu1 %v4801_v50  ;;  %v3451_v52 = vld [vmem:[%s5419_s6 + $0x49] sm:$0xff] }
  0xb5   : > { %4177 = vmatmul.mubr.f32.gmra.mrb[2].mxu1 %v5646_v3  ;;  %v3297_v3 = vld [vmem:[%s6525_s1 + $0x1c0] sm:$0xff] }
  0xb6   : > { %4521 = vmatmul.mubr.f32.gmra.mrb[18].mxu0 %v6036_v31  ;;  %4179 = vmatprep.mubr.f32.mxu1 %v5652_v5  ;;  %v4813_v5 = vpack.c.bf16 %v3298_v29, %v3297_v3  ;;  %v3534_v3 = vld [vmem:[%s6525_s1 + $0x428] sm:$0xff] }
  0xb7   : > { %4523 = vmatprep.mubr.f32.mxu0 %v6040_v21  ;;  %4804 = vmatpush3.bf16.msra.mxu1 %v4801_v50  ;;  %v3303_v50 = vld [vmem:[%s6525_s1 + $0x1f0] sm:$0xff]  ;;  %v3453_v29 = vld [vmem:[%s5419_s6 + $0x61] sm:$0xff] }
  0xb8   : > { %4806 = vmatprep.subr.bf16.mxu1 %v4805_v23 }
  0xb9   : > { %4180 = vmatmul.mubr.f32.gmra.mrb[4].mxu1 %v5669_v11  ;;  %v3299_v11 = vld [vmem:[%s6525_s1 + $0x1d0] sm:$0xff] }
  0xba   : > { %4524 = vmatmul.mubr.f32.gmra.mrb[20].mxu0 %v6052_v15  ;;  %4182 = vmatprep.mubr.f32.mxu1 %v5675_v14  ;;  %v4817_v14 = vpack.c.bf16 %v3300_v2, %v3299_v11  ;;  %v3536_v11 = vld [vmem:[%s6525_s1 + $0x438] sm:$0xff] }
  0xbb   : > { %4526 = vmatprep.mubr.f32.mxu0 %v6056_v59  ;;  %4808 = vmatpush3.bf16.msra.mxu1 %v4805_v23  ;;  %v3432_v23 = vld [vmem:[%s5419_s6 + $0x1a0] sm:$0xff] }
  0xbc   : > { %4810 = vmatprep.subr.bf16.mxu1 %v4809_v62 }
  0xbd   : > { %4183 = vmatmul.mubr.f32.gmra.mrb[6].mxu1 %v5691_v20  ;;  %v3301_v20 = vld [vmem:[%s6525_s1 + $0x1e0] sm:$0xff] }
  0xbe   : > { %4527 = vmatmul.mubr.f32.gmra.mrb[22].mxu0 %v6068_v51  ;;  %4185 = vmatprep.mubr.f32.mxu1 %v5697_v22  ;;  %v6168_v22 = vld [vmem:[%s5419_s6 + $0x180] sm:$0xff] }
  0xbf   : > { %4529 = vmatprep.mubr.f32.mxu0 %v6072_v32  ;;  %4812 = vmatpush3.bf16.msra.mxu1 %v4809_v62 }
  0xc0   : > { %4814 = vmatprep.subr.bf16.mxu1 %v4813_v5 }
  0xc1   : > { %4186 = vmatmul.mubr.f32.gmra.mrb[8].mxu1 %v5713_v28  ;;  %v4821_v28 = vpack.c.bf16 %v3302_v45, %v3301_v20  ;;  %v3540_v45 = vld [vmem:[%s6525_s1 + $0x458] sm:$0xff] }
  0xc2   : > { %4530 = vmatmul.mubr.f32.gmra.mrb[24].mxu0 %v6084_v56  ;;  %4188 = vmatprep.mubr.f32.mxu1 %v5719_v30  ;;  %v6181_v30 = vld [vmem:[%s5419_s6 + $0x188] sm:$0xff] }
  0xc3   : > { %4532 = vmatprep.mubr.f32.mxu0 %v6088_v1  ;;  %4816 = vmatpush3.bf16.msra.mxu1 %v4813_v5  ;;  %v3535_v5 = vld [vmem:[%s6525_s1 + $0x430] sm:$0xff] }
  0xc4   : > { %4818 = vmatprep.subr.bf16.mxu1 %v4817_v14  ;;  %v4969_v2 = vpack.c.bf16 %v3536_v11, %v3535_v5  ;;  %v6305_v5 = vld [vmem:[%s5419_s6 + $0x189] sm:$0xff]  ;;  %v3479_v11 = vld [vmem:[%s5419_s6 + $0x199] sm:$0xff] }
  0xc5   : > { %4189 = vmatmul.mubr.f32.gmra.mrb[10].mxu1 %v5735_v38  ;;  %v4825_v38 = vpack.c.bf16 %v3304_v63, %v3303_v50  ;;  %v3542_v63 = vld [vmem:[%s6525_s1 + $0x468] sm:$0xff] }
  0xc6   : > { %4533 = vmatmul.mubr.f32.gmra.mrb[26].mxu0 %v6100_v47  ;;  %4191 = vmatprep.mubr.f32.mxu1 %v5741_v40  ;;  %v3449_v40 = vld [vmem:[%s5419_s6 + $0x31] sm:$0xff] }
  0xc7   : > { %4535 = vmatprep.mubr.f32.mxu0 %v6168_v22  ;;  %4820 = vmatpush3.bf16.msra.mxu1 %v4817_v14  ;;  %v3538_v14 = vld [vmem:[%s6525_s1 + $0x448] sm:$0xff] }
  0xc8   : > { %4822 = vmatprep.subr.bf16.mxu1 %v4821_v28 }
  0xc9   : > { %4192 = vmatmul.mubr.f32.gmra.mrb[12].mxu1 %v5757_v46  ;;  %v3532_v46 = vld [vmem:[%s6525_s1 + $0x418] sm:$0xff] }
  0xca   : > { %4536 = vmatmul.mubr.f32.gmra.mrb[28].mxu0 %v6181_v30  ;;  %4194 = vmatprep.mubr.f32.mxu1 %v5763_v48  ;;  %v3450_v48 = vld [vmem:[%s5419_s6 + $0x39] sm:$0xff]  ;;  %v4961_v62 = vpack.c.bf16 %v3532_v46, %v3531_v42 }
  0xcb   : > { %4538 = vmatprep.mubr.f32.mxu0 %v3431_v27  ;;  %4824 = vmatpush3.bf16.msra.mxu1 %v4821_v28  ;;  %v3459_v28 = vld [vmem:[%s5419_s6 + $0xa9] sm:$0xff]  ;;  %v3544_v27 = vld [vmem:[%s6525_s1 + $0x478] sm:$0xff]  ;;  %v6616_v46 = vld [vmem:[#allocation27_spill] sm:$0xff] }
  0xcc   : > { %4826 = vmatprep.subr.bf16.mxu1 %v4825_v38  ;;  %v6615_v42 = vld [vmem:[#allocation6_spill] sm:$0xff] }
  0xcd   : > { %4195 = vmatmul.mubr.f32.gmra.mrb[14].mxu1 %v5779_v55  ;;  %v3533_v55 = vld [vmem:[%s6525_s1 + $0x420] sm:$0xff] }
  0xce   : > { %4539 = vmatmul.mubr.f32.gmra.mrb[30].mxu0 %v3432_v23  ;;  %4197 = vmatprep.mubr.f32.mxu1 %v5785_v57  ;;  %v3452_v57 = vld [vmem:[%s5419_s6 + $0x51] sm:$0xff] }
  0xcf   : > { %4573 = vmatprep.mubr.f32.mxu0 %v3449_v40  ;;  %4828 = vmatpush3.bf16.msra.mxu1 %v4825_v38  ;;  %v6612_v38 = vld [vmem:[#allocation15_spill] sm:$0xff]  ;;  %v6613_v23 = vld [vmem:[#allocation26_spill] sm:$0xff]  ;;  %v6614_v40 = vld [vmem:[#allocation16_spill] sm:$0xff] }
  0xd0   : > { %4989 = vmatprep.subr.bf16.mxu1 %v5374_v7 }
  0xd1   : > { %4198 = vmatmul.mubr.f32.gmra.mrb[16].mxu1 %v5801_v0  ;;  %v4965_v0 = vpack.c.bf16 %v3534_v3, %v3533_v55  ;;  %v6297_v55 = vld [vmem:[%s5419_s6 + $0x181] sm:$0xff] }
  0xd2   : > { %4574 = vmatmul.mubr.f32.vlgmr.msra.gmra.mrb[0].mxu0 %v3450_v48  ;;  %4200 = vmatprep.mubr.f32.mxu1 %v5805_v6  ;;  %v3454_v6 = vld [vmem:[%s5419_s6 + $0x69] sm:$0xff]  ;;  %v6620_v3 = vld [vmem:[#allocation7_spill] sm:$0xff] }
  0xd3   : > { %4960 = vmatpush3.bf16.msra.mxu0 %v6104_v16  ;;  %4576 = vmatprep.mubr.f32.mxu0 %v3451_v52  ;;  %v3455_v16 = vld [vmem:[%s5419_s6 + $0x79] sm:$0xff]  ;;  %v6617_v48 = vld [vmem:[#allocation17_spill] sm:$0xff]  ;;  %v6618_v52 = vld [vmem:[#allocation28_spill] sm:$0xff] }
  0xd4   : > { %4962 = vmatprep.subr.bf16.mxu0 %v4961_v62 }
  0xd5   : > { %4201 = vmatmul.mubr.f32.gmra.mrb[18].mxu1 %v5820_v18  ;;  %v3537_v18 = vld [vmem:[%s6525_s1 + $0x440] sm:$0xff] }
  0xd6   : > { %4577 = vmatmul.mubr.f32.gmra.mrb[2].mxu0 %v3452_v57  ;;  %4203 = vmatprep.mubr.f32.mxu1 %v5826_v25  ;;  %v3456_v25 = vld [vmem:[%s5419_s6 + $0x81] sm:$0xff]  ;;  %v4973_v20 = vpack.c.bf16 %v3538_v14, %v3537_v18  ;;  %v6621_v57 = vld [vmem:[#allocation29_spill] sm:$0xff] }
  0xd7   : > { %4579 = vmatprep.mubr.f32.mxu0 %v3453_v29  ;;  %4964 = vmatpush3.bf16.msra.mxu0 %v4961_v62  ;;  %v6619_v62 = vld [vmem:[#allocation18_spill] sm:$0xff]  ;;  %v6622_v29 = vld [vmem:[#allocation19_spill] sm:$0xff] }
  0xd8   : > { %4966 = vmatprep.subr.bf16.mxu0 %v4965_v0  ;;  %v3480_v18 = vld [vmem:[%s5419_s6 + $0x1a1] sm:$0xff]  ;;  %v3497_v14 = vld [vmem:[%s5419_s6 + $0x32] sm:$0xff] }
  0xd9   : > { %4204 = vmatmul.mubr.f32.gmra.mrb[20].mxu1 %v5843_v41  ;;  %v3539_v41 = vld [vmem:[%s6525_s1 + $0x450] sm:$0xff] }
  0xda   : > { %4580 = vmatmul.mubr.f32.gmra.mrb[4].mxu0 %v3454_v6  ;;  %4206 = vmatprep.mubr.f32.mxu1 %v5849_v44  ;;  %v3458_v44 = vld [vmem:[%s5419_s6 + $0x99] sm:$0xff]  ;;  %v4977_v50 = vpack.c.bf16 %v3540_v45, %v3539_v41  ;;  %v6624_v6 = vld [vmem:[#allocation8_spill] sm:$0xff] }
  0xdb   : > { %4582 = vmatprep.mubr.f32.mxu0 %v3455_v16  ;;  %4968 = vmatpush3.bf16.msra.mxu0 %v4965_v0  ;;  %v6623_v0 = vld [vmem:[#allocation30_spill] sm:$0xff]  ;;  %v6625_v16 = vld [vmem:[#allocation31_spill] sm:$0xff]  ;;  %v3499_v45 = vld [vmem:[%s5419_s6 + $0x4a] sm:$0xff] }
  0xdc   : > { %4970 = vmatprep.subr.bf16.mxu0 %v4969_v2  ;;  %v3498_v41 = vld [vmem:[%s5419_s6 + $0x3a] sm:$0xff] }
  0xdd   : > { %4207 = vmatmul.mubr.f32.gmra.mrb[22].mxu1 %v5865_v58  ;;  %v3541_v58 = vld [vmem:[%s6525_s1 + $0x460] sm:$0xff] }
  0xde   : > { %4583 = vmatmul.mubr.f32.gmra.mrb[6].mxu0 %v3456_v25  ;;  %4209 = vmatprep.mubr.f32.mxu1 %v5871_v60  ;;  %v4981_v60 = vpack.c.bf16 %v3542_v63, %v3541_v58  ;;  %v6627_v25 = vld [vmem:[#allocation9_spill] sm:$0xff]  ;;  %v3514_v58 = vld [vmem:[%s5419_s6 + $0xfa] sm:$0xff] }
  0xdf   : > { %4585 = vmatprep.mubr.f32.mxu0 %v5581_v35  ;;  %4972 = vmatpush3.bf16.msra.mxu0 %v4969_v2  ;;  %v3460_v35 = vld [vmem:[%s5419_s6 + $0xb1] sm:$0xff]  ;;  %v6626_v2 = vld [vmem:[#allocation32_spill] sm:$0xff]  ;;  %v3324_v63 = vld [vmem:[%s5419_s6 + $0xf9] sm:$0xff] }
  0xe0   : > { %4974 = vmatprep.subr.bf16.mxu0 %v4973_v20 }
  0xe1   : > { %4210 = vmatmul.mubr.f32.gmra.mrb[24].mxu1 %v5887_v26  ;;  %v3543_v26 = vld [vmem:[%s6525_s1 + $0x470] sm:$0xff] }
  0xe2   : > { %4586 = vmatmul.mubr.f32.gmra.mrb[8].mxu0 %v3458_v44  ;;  %4212 = vmatprep.mubr.f32.mxu1 %v5893_v33  ;;  %v4985_v33 = vpack.c.bf16 %v3544_v27, %v3543_v26  ;;  %v3500_v44 = vld [vmem:[%s5419_s6 + $0x52] sm:$0xff]  ;;  %v3518_v27 = vld [vmem:[%s5419_s6 + $0x12a] sm:$0xff] }
  0xe3   : > { %4588 = vmatprep.mubr.f32.mxu0 %v3459_v28  ;;  %4976 = vmatpush3.bf16.msra.mxu0 %v4973_v20  ;;  %v6628_v20 = vld [vmem:[#allocation33_spill] sm:$0xff]  ;;  %v3501_v28 = vld [vmem:[%s5419_s6 + $0x62] sm:$0xff] }
  0xe4   : > { %4978 = vmatprep.subr.bf16.mxu0 %v4977_v50  ;;  %v3326_v26 = vld [vmem:[%s5419_s6 + $0x111] sm:$0xff] }
  0xe5   : > { %4213 = vmatmul.mubr.f32.gmra.mrb[26].mxu1 %v5909_v9  ;;  %v6609_v9 = vld [vmem:[#allocation14_spill] sm:$0xff] }
  0xe6   : > { %4589 = vmatmul.mubr.f32.gmra.mrb[10].mxu0 %v3460_v35  ;;  %4215 = vmatprep.mubr.f32.mxu1 %v5915_v43  ;;  %v6598_v43 = vld [vmem:[#allocation20_spill] sm:$0xff]  ;;  %v3516_v35 = vld [vmem:[%s5419_s6 + $0x112] sm:$0xff] }
  0xe7   : > { %4591 = vmatprep.mubr.f32.mxu0 %v5613_v54  ;;  %4980 = vmatpush3.bf16.msra.mxu0 %v4977_v50  ;;  %v6599_v54 = vld [vmem:[#allocation10_spill] sm:$0xff] }
  0xe8   : > { %4982 = vmatprep.subr.bf16.mxu0 %v4981_v60  ;;  %v3503_v50 = vld [vmem:[%s5419_s6 + $0x7a] sm:$0xff] }
  0xe9   : > { %4216 = vmatmul.mubr.f32.gmra.mrb[28].mxu1 %v5931_v49  ;;  %v6610_v49 = vld [vmem:[#allocation5_spill] sm:$0xff] }
  0xea   : > { %4592 = vmatmul.mubr.f32.gmra.mrb[12].mxu0 %v5629_v61  ;;  %4218 = vmatprep.mubr.f32.mxu1 %v5937_v53  ;;  %v6600_v61 = vld [vmem:[#allocation3_spill] sm:$0xff]  ;;  %v6603_v53 = vld [vmem:[#allocation22_spill] sm:$0xff] }
  0xeb   : > { %4594 = vmatprep.mubr.f32.mxu0 %v5649_v4  ;;  %4984 = vmatpush3.bf16.msra.mxu0 %v4981_v60  ;;  %v6601_v4 = vld [vmem:[#allocation21_spill] sm:$0xff]  ;;  %v3517_v60 = vld [vmem:[%s5419_s6 + $0x122] sm:$0xff] }
  0xec   : > { %4986 = vmatprep.subr.bf16.mxu0 %v4985_v33 }
  0xed   : > { %4219 = vmatmul.mubr.f32.gmra.mrb[30].mxu1 %v5953_v37  ;;  %v6611_v37 = vld [vmem:[#allocation25_spill] sm:$0xff] }
  0xee   : > { %4595 = vmatmul.mubr.f32.gmra.mrb[14].mxu0 %v5665_v10  ;;  %4253 = vmatprep.mubr.f32.mxu1 %v5823_v24  ;;  %v6602_v10 = vld [vmem:[#allocation11_spill] sm:$0xff]  ;;  %v6605_v24 = vld [vmem:[#allocation4_spill] sm:$0xff] }
  0xef   : > { %4597 = vmatprep.mubr.f32.mxu0 %v5672_v13  ;;  %4988 = vmatpush3.bf16.msra.mxu0 %v4985_v33  ;;  %v6604_v13 = vld [vmem:[#allocation12_spill] sm:$0xff] }
  0xf0   : > { %v3327_v33 = vld [vmem:[%s5419_s6 + $0x121] sm:$0xff] }
  0xf1   : > { %4254 = vmatmul.mubr.f32.vlgmr.msra.gmra.mrb[0].mxu1 %v5838_v34  ;;  %v6608_v34 = vld [vmem:[#allocation24_spill] sm:$0xff] }
  0xf2   : > { %4598 = vmatmul.mubr.f32.gmra.mrb[16].mxu0 %v5687_v19  ;;  %4997 = vmatpush3.bf16.msra.mxu1 %v5374_v7  ;;  %v6606_v19 = vld [vmem:[#allocation23_spill] sm:$0xff]  ;;  %v6607_v7 = vld [vmem:[#allocation13_spill] sm:$0xff] }
  0xf3   : > { %4256 = vmatprep.mubr.f32.mxu1 %v6598_v43  ;;  %4600 = vmatprep.mubr.f32.mxu0 %v6599_v54  ;;  %v3519_v43 = vld [vmem:[%s5419_s6 + $0x13a] sm:$0xff]  ;;  %v3328_v54 = vld [vmem:[%s5419_s6 + $0x129] sm:$0xff] }
  0xf4   : > { %4990 = vmatprep.subr.bf16.mxu1 %v6600_v61 }
  0xf5   : > { %4257 = vmatmul.mubr.f32.gmra.mrb[2].mxu1 %v6601_v4  ;;  %v3329_v4 = vld [vmem:[%s5419_s6 + $0x139] sm:$0xff] }
  0xf6   : > { %4601 = vmatmul.mubr.f32.gmra.mrb[18].mxu0 %v6602_v10  ;;  %4259 = vmatprep.mubr.f32.mxu1 %v6603_v53  ;;  %v3521_v10 = vld [vmem:[%s5419_s6 + $0x152] sm:$0xff]  ;;  %v3330_v53 = vld [vmem:[%s5419_s6 + $0x141] sm:$0xff] }
  0xf7   : > { %4603 = vmatprep.mubr.f32.mxu0 %v6604_v13  ;;  %4998 = vmatpush3.bf16.msra.mxu1 %v6600_v61  ;;  %v3520_v61 = vld [vmem:[%s5419_s6 + $0x142] sm:$0xff]  ;;  %v3522_v13 = vld [vmem:[%s5419_s6 + $0x15a] sm:$0xff] }
  0xf8   : > { %4991 = vmatprep.subr.bf16.mxu1 %v6605_v24 }
  0xf9   : > { %4260 = vmatmul.mubr.f32.gmra.mrb[4].mxu1 %v6606_v19  ;;  %v3523_v19 = vld [vmem:[%s5419_s6 + $0x16a] sm:$0xff] }
  0xfa   : > { %4604 = vmatmul.mubr.f32.gmra.mrb[20].mxu0 %v6607_v7  ;;  %4262 = vmatprep.mubr.f32.mxu1 %v6608_v34  ;;  %v3332_v7 = vld [vmem:[%s5419_s6 + $0x159] sm:$0xff] }
  0xfb   : > { %4606 = vmatprep.mubr.f32.mxu0 %v6609_v9  ;;  %4999 = vmatpush3.bf16.msra.mxu1 %v6605_v24  ;;  %v3331_v24 = vld [vmem:[%s5419_s6 + $0x151] sm:$0xff]  ;;  %v3333_v9 = vld [vmem:[%s5419_s6 + $0x169] sm:$0xff] }
  0xfc   : > { %4992 = vmatprep.subr.bf16.mxu1 %v6610_v49  ;;  %v3524_v34 = vld [vmem:[%s5419_s6 + $0x172] sm:$0xff] }
  0xfd   : > { %4263 = vmatmul.mubr.f32.gmra.mrb[6].mxu1 %v6611_v37  ;;  %v3334_v37 = vld [vmem:[%s5419_s6 + $0x171] sm:$0xff] }
  0xfe   : > { %4607 = vmatmul.mubr.f32.gmra.mrb[22].mxu0 %v6612_v38  ;;  %4265 = vmatprep.mubr.f32.mxu1 %v6613_v23  ;;  %v3526_v38 = vld [vmem:[%s5419_s6 + $0x18a] sm:$0xff]  ;;  %v3527_v23 = vld [vmem:[%s5419_s6 + $0x19a] sm:$0xff] }
  0xff   : > { %4609 = vmatprep.mubr.f32.mxu0 %v6614_v40  ;;  %5000 = vmatpush3.bf16.msra.mxu1 %v6610_v49  ;;  %v3525_v49 = vld [vmem:[%s5419_s6 + $0x182] sm:$0xff] }
 0x100   : > { %4993 = vmatprep.subr.bf16.mxu1 %v6615_v42  ;;  %v3528_v40 = vld [vmem:[%s5419_s6 + $0x1a2] sm:$0xff] }
 0x101   : > { %4266 = vmatmul.mubr.f32.gmra.mrb[8].mxu1 %v6616_v46 }
 0x102   : > { %4610 = vmatmul.mubr.f32.gmra.mrb[24].mxu0 %v6617_v48  ;;  %4268 = vmatprep.mubr.f32.mxu1 %v6618_v52 }
 0x103   : > { %4612 = vmatprep.mubr.f32.mxu0 %v6619_v62  ;;  %5001 = vmatpush3.bf16.msra.mxu1 %v6615_v42 }
 0x104   : > { %4994 = vmatprep.subr.bf16.mxu1 %v6620_v3 }
 0x105   : > { %4269 = vmatmul.mubr.f32.gmra.mrb[10].mxu1 %v6621_v57 }
 0x106   : > { %4613 = vmatmul.mubr.f32.gmra.mrb[26].mxu0 %v6622_v29  ;;  %4271 = vmatprep.mubr.f32.mxu1 %v6623_v0 }
 0x107   : > { %4615 = vmatprep.mubr.f32.mxu0 %v6297_v55  ;;  %5002 = vmatpush3.bf16.msra.mxu1 %v6620_v3 }
 0x108   : > { %4995 = vmatprep.subr.bf16.mxu1 %v6624_v6 }
 0x109   : > { %4272 = vmatmul.mubr.f32.gmra.mrb[12].mxu1 %v6625_v16 }
 0x10a   : > { %4616 = vmatmul.mubr.f32.gmra.mrb[28].mxu0 %v6305_v5  ;;  %4274 = vmatprep.mubr.f32.mxu1 %v6626_v2 }
 0x10b   : > { %4618 = vmatprep.mubr.f32.mxu0 %v3479_v11  ;;  %5003 = vmatpush3.bf16.msra.mxu1 %v6624_v6 }
 0x10c   : > { %4996 = vmatprep.subr.bf16.mxu1 %v6627_v25 }
 0x10d   : > { %4275 = vmatmul.mubr.f32.gmra.mrb[14].mxu1 %v6628_v20 }
 0x10e   : > { %4619 = vmatmul.mubr.f32.gmra.mrb[30].mxu0 %v3480_v18  ;;  %4277 = vmatprep.mubr.f32.mxu1 %v5990_v17  ;;  %v3502_v17 = vld [vmem:[%s5419_s6 + $0x6a] sm:$0xff] }
 0x10f   : > { %4653 = vmatprep.mubr.f32.mxu0 %v3497_v14  ;;  %5004 = vmatpush3.bf16.msra.mxu1 %v6627_v25  ;;  %v6401_v14 = vld [vmem:[%s6526_s2] ss:$0 sm:$0xff] }
 0x111   : > { %4278 = vmatmul.mubr.f32.gmra.mrb[16].mxu1 %v6003_v39  ;;  %v3504_v39 = vld [vmem:[%s5419_s6 + $0x82] sm:$0xff] }
 0x112   : > { %4654 = vmatmul.mubr.f32.vlgmr.msra.gmra.mrb[0].mxu0 %v3498_v41  ;;  %4280 = vmatprep.mubr.f32.mxu1 %v6008_v12  ;;  %v3505_v12 = vld [vmem:[%s5419_s6 + $0x92] sm:$0xff] }
 0x113   : > { %4656 = vmatprep.mubr.f32.mxu0 %v3499_v45 }
 0x115   : > { %4281 = vmatmul.mubr.f32.gmra.mrb[18].mxu1 %v6020_v8  ;;  %v3506_v8 = vld [vmem:[%s5419_s6 + $0x9a] sm:$0xff] }
 0x116   : > { %4657 = vmatmul.mubr.f32.gmra.mrb[2].mxu0 %v3500_v44  ;;  %4283 = vmatprep.mubr.f32.mxu1 %v6024_v36  ;;  %v3507_v36 = vld [vmem:[%s5419_s6 + $0xaa] sm:$0xff] }
 0x117   : > { %4659 = vmatprep.mubr.f32.mxu0 %v3501_v28 }
 0x119   : > { %4284 = vmatmul.mubr.f32.gmra.mrb[20].mxu1 %v6036_v31  ;;  %v3508_v31 = vld [vmem:[%s5419_s6 + $0xb2] sm:$0xff] }
 0x11a   : > { %4660 = vmatmul.mubr.f32.gmra.mrb[4].mxu0 %v3502_v17  ;;  %4286 = vmatprep.mubr.f32.mxu1 %v6040_v21  ;;  %v3509_v21 = vld [vmem:[%s5419_s6 + $0xc2] sm:$0xff] }
 0x11b   : > { %4662 = vmatprep.mubr.f32.mxu0 %v3503_v50 }
 0x11d   : > { %4287 = vmatmul.mubr.f32.gmra.mrb[22].mxu1 %v6052_v15  ;;  %v3510_v15 = vld [vmem:[%s5419_s6 + $0xca] sm:$0xff] }
 0x11e   : > { %4663 = vmatmul.mubr.f32.gmra.mrb[6].mxu0 %v3504_v39  ;;  %4289 = vmatprep.mubr.f32.mxu1 %v6056_v59  ;;  %v3512_v59 = vld [vmem:[%s5419_s6 + $0xe2] sm:$0xff] }
 0x11f   : > { %4665 = vmatprep.mubr.f32.mxu0 %v3505_v12 }
 0x121   : > { %4290 = vmatmul.mubr.f32.gmra.mrb[24].mxu1 %v6068_v51  ;;  %v3511_v51 = vld [vmem:[%s5419_s6 + $0xda] sm:$0xff] }
 0x122   : > { %4666 = vmatmul.mubr.f32.gmra.mrb[8].mxu0 %v3506_v8  ;;  %4292 = vmatprep.mubr.f32.mxu1 %v6072_v32  ;;  %v3513_v32 = vld [vmem:[%s5419_s6 + $0xf2] sm:$0xff] }
 0x123   : > { %4668 = vmatprep.mubr.f32.mxu0 %v3507_v36 }
 0x125   : > { %4293 = vmatmul.mubr.f32.gmra.mrb[26].mxu1 %v6084_v56  ;;  %v3321_v56 = vld [vmem:[%s5419_s6 + $0xd9] sm:$0xff] }
 0x126   : > { %4669 = vmatmul.mubr.f32.gmra.mrb[10].mxu0 %v3508_v31  ;;  %4295 = vmatprep.mubr.f32.mxu1 %v6088_v1  ;;  %v3322_v1 = vld [vmem:[%s5419_s6 + $0xe1] sm:$0xff] }
 0x127   : > { %4671 = vmatprep.mubr.f32.mxu0 %v3509_v21 }
 0x129   : > { %4296 = vmatmul.mubr.f32.gmra.mrb[28].mxu1 %v6100_v47  ;;  %v3323_v47 = vld [vmem:[%s5419_s6 + $0xf1] sm:$0xff] }
 0x12a   : > { %4672 = vmatmul.mubr.f32.gmra.mrb[12].mxu0 %v3510_v15  ;;  %4298 = vmatprep.mubr.f32.mxu1 %v6168_v22  ;;  %v3515_v22 = vld [vmem:[%s5419_s6 + $0x10a] sm:$0xff] }
 0x12b   : > { %4674 = vmatprep.mubr.f32.mxu0 %v3511_v51 }
 0x12d   : > { %4299 = vmatmul.mubr.f32.gmra.mrb[30].mxu1 %v6181_v30  ;;  %v3325_v30 = vld [vmem:[%s5419_s6 + $0x109] sm:$0xff]  ;;  %s251_s6 = sld [smem:[#allocation2]] }
 0x12e   : > { %4675 = vmatmul.mubr.f32.gmra.mrb[14].mxu0 %v3512_v59  ;;  %4357 = vmatprep.mubr.f32.mxu1 %v3321_v56 }
 0x12f   : > { %4677 = vmatprep.mubr.f32.mxu0 %v3513_v32 }
 0x131   : > { %4358 = vmatmul.mubr.f32.vlgmr.msra.gmra.mrb[16].mxu1 %v3322_v1 }
 0x132   : > { %4678 = vmatmul.mubr.f32.gmra.mrb[16].mxu0 %v3514_v58  ;;  %4360 = vmatprep.mubr.f32.mxu1 %v3323_v47 }
 0x133   : > { %4680 = vmatprep.mubr.f32.mxu0 %v3515_v22  ;;  %v6404_v45 = vstv %s251_s6 }
 0x135   : > { %4361 = vmatmul.mubr.f32.gmra.mrb[18].mxu1 %v3324_v63 }
 0x136   : > { %4681 = vmatmul.mubr.f32.gmra.mrb[18].mxu0 %v3516_v35  ;;  %4363 = vmatprep.mubr.f32.mxu1 %v3325_v30 }
 0x137   : > { %4683 = vmatprep.mubr.f32.mxu0 %v3517_v60 }
 0x139   : > { %4364 = vmatmul.mubr.f32.gmra.mrb[20].mxu1 %v3326_v26 }
 0x13a   : > { %4684 = vmatmul.mubr.f32.gmra.mrb[20].mxu0 %v3518_v27  ;;  %4366 = vmatprep.mubr.f32.mxu1 %v3327_v33 }
 0x13b   : > { %4686 = vmatprep.mubr.f32.mxu0 %v3519_v43 }
 0x13d   : > { %4367 = vmatmul.mubr.f32.gmra.mrb[22].mxu1 %v3328_v54 }
 0x13e   : > { %4687 = vmatmul.mubr.f32.gmra.mrb[22].mxu0 %v3520_v61  ;;  %4369 = vmatprep.mubr.f32.mxu1 %v3329_v4 }
 0x13f   : > { %4689 = vmatprep.mubr.f32.mxu0 %v3521_v10 }
 0x141   : > { %4370 = vmatmul.mubr.f32.gmra.mrb[24].mxu1 %v3330_v53 }
 0x142   : > { %4690 = vmatmul.mubr.f32.gmra.mrb[24].mxu0 %v3522_v13  ;;  %4372 = vmatprep.mubr.f32.mxu1 %v3331_v24 }
 0x143   : > { %4692 = vmatprep.mubr.f32.mxu0 %v3523_v19 }
 0x145   : > { %4373 = vmatmul.mubr.f32.gmra.mrb[26].mxu1 %v3332_v7 }
 0x146   : > { %4693 = vmatmul.mubr.f32.gmra.mrb[26].mxu0 %v3524_v34  ;;  %4375 = vmatprep.mubr.f32.mxu1 %v3333_v9 }
 0x147   : > { %4695 = vmatprep.mubr.f32.mxu0 %v3525_v49 }
 0x149   : > { %4376 = vmatmul.mubr.f32.gmra.mrb[28].mxu1 %v3334_v37 }
 0x14a   : > { %4696 = vmatmul.mubr.f32.gmra.mrb[28].mxu0 %v3526_v38  ;;  %4378 = vmatprep.mubr.f32.mxu1 %v6297_v55 }
 0x14b   : > { %4698 = vmatprep.mubr.f32.mxu0 %v3527_v23 }
 0x14d   : > { %4379 = vmatmul.mubr.f32.gmra.mrb[30].mxu1 %v6305_v5 }
 0x14e   : > { %4699 = vmatmul.mubr.f32.gmra.mrb[30].mxu0 %v3528_v40 }
 0x1c4   : > { %v4255_v42 = vpop.f32.mrb[0].mxu1 }
 0x1c5   : > { %v1221_v46 = vpop.f32.mrb[1].mxu1 }
 0x1c8   : > { %v4258_v48 = vpop.f32.mrb[2].mxu1 }
 0x1c9   : > { %v1231_v52 = vpop.f32.mrb[3].mxu1 }
 0x1cc   : > { %v4261_v62 = vpop.f32.mrb[4].mxu1 }
 0x1cd   : > { %v1241_v3 = vpop.f32.mrb[5].mxu1 }
 0x1d0   : > { %v4264_v57 = vpop.f32.mrb[6].mxu1 }
 0x1d1   : > { %v1251_v29 = vpop.f32.mrb[7].mxu1 }
 0x1d4   : > { %v6382_v0 = vpop.f32.mrb[8].mxu1 }
 0x1d5   : > { %v6384_v11 = vpop.f32.mrb[9].mxu1 }
 0x1d8   : > { %v6386_v6 = vpop.f32.mrb[10].mxu1 }
 0x1d9   : > { %v6388_v55 = vpop.f32.mrb[11].mxu1 }
 0x1dc   : > { %v6390_v16 = vpop.f32.mrb[12].mxu1 }
 0x1dd   : > { %v6392_v5 = vpop.f32.mrb[13].mxu1 }
 0x1e0   : > { %v6394_v2 = vpop.f32.mrb[14].mxu1 }
 0x1e1   : > { %v6396_v18 = vpop.f32.mrb[15].mxu1 }
 0x1e5   : > { %v4655_v25 = vpop.f32.mrb[0].mxu0 }
 0x1e6   : > { %v5005_v20 = vadd.f32 %v4655_v25, %v4255_v42  ;;  %v2752_v41 = vpop.f32.mrb[1].mxu0 }
 0x1e7   : > { %v5006_v44 = vadd.f32 %v2752_v41, %v1221_v46 }
 0x1e8   : > { %v2950_v28 = vadd.f32 %v5005_v20, %v6401_v14 }
 0x1e9   : > { %v2949_v17 = vadd.f32 %v5006_v44, %v6401_v14  ;;  %v4658_v50 = vpop.f32.mrb[2].mxu0 }
 0x1ea   : > { %vm2982_vm0 = vcmp.ge.f32.partialorder %v2950_v28, 0.0  ;;  %v3015_v39 = vmul.f32 %v6404_v45, %v2950_v28  ;;  %v5007_v12 = vadd.f32 %v4658_v50, %v4258_v48  ;;  %v2762_v8 = vpop.f32.mrb[3].mxu0 }
 0x1eb   : > { %vm2981_vm1 = vcmp.ge.f32.partialorder %v2949_v17, 0.0  ;;  %v3014_v36 = vmul.f32 %v6404_v45, %v2949_v17  ;;  %v5008_v31 = vadd.f32 %v2762_v8, %v1231_v52 }
 0x1ec   : > { %v3047_v21 = vsel %vm2982_vm0, %v2950_v28, %v3015_v39  ;;  %v2952_v15 = vadd.f32 %v5007_v12, %v6401_v14 }
 0x1ed   : > { %3079 = vst [vmem:[%s6411_s29 + $0x8] sm:$0xff] %v3047_v21  ;;  %v3046_v51 = vsel %vm2981_vm1, %v2949_v17, %v3014_v36  ;;  %v2951_v59 = vadd.f32 %v5008_v31, %v6401_v14  ;;  %v4661_v56 = vpop.f32.mrb[4].mxu0 }
 0x1ee   : > { %3078 = vst [vmem:[%s6411_s29] sm:$0xff] %v3046_v51  ;;  %vm2984_vm2 = vcmp.ge.f32.partialorder %v2952_v15, 0.0  ;;  %v3017_v32 = vmul.f32 %v6404_v45, %v2952_v15  ;;  %v5009_v1 = vadd.f32 %v4661_v56, %v4261_v62  ;;  %v2772_v58 = vpop.f32.mrb[5].mxu0 }
 0x1ef   : > { %vm2983_vm3 = vcmp.ge.f32.partialorder %v2951_v59, 0.0  ;;  %v3016_v47 = vmul.f32 %v6404_v45, %v2951_v59  ;;  %v5010_v22 = vadd.f32 %v2772_v58, %v1241_v3 }
 0x1f0   : > { %v3049_v63 = vsel %vm2984_vm2, %v2952_v15, %v3017_v32  ;;  %v2954_v35 = vadd.f32 %v5009_v1, %v6401_v14 }
 0x1f1   : > { %3081 = vst [vmem:[%s6411_s29 + $0x18] sm:$0xff] %v3049_v63  ;;  %v3048_v30 = vsel %vm2983_vm3, %v2951_v59, %v3016_v47  ;;  %v2953_v60 = vadd.f32 %v5010_v22, %v6401_v14  ;;  %v4664_v26 = vpop.f32.mrb[6].mxu0 }
 0x1f2   : > { %3080 = vst [vmem:[%s6411_s29 + $0x10] sm:$0xff] %v3048_v30  ;;  %vm2986_vm4 = vcmp.ge.f32.partialorder %v2954_v35, 0.0  ;;  %v3019_v27 = vmul.f32 %v6404_v45, %v2954_v35  ;;  %v5011_v33 = vadd.f32 %v4664_v26, %v4264_v57  ;;  %v2782_v43 = vpop.f32.mrb[7].mxu0 }
 0x1f3   : > { %vm2985_vm5 = vcmp.ge.f32.partialorder %v2953_v60, 0.0  ;;  %v3018_v54 = vmul.f32 %v6404_v45, %v2953_v60  ;;  %v5012_v61 = vadd.f32 %v2782_v43, %v1251_v29 }
 0x1f4   : > { %v3051_v4 = vsel %vm2986_vm4, %v2954_v35, %v3019_v27  ;;  %v2956_v10 = vadd.f32 %v5011_v33, %v6401_v14 }
 0x1f5   : > { %3083 = vst [vmem:[%s6411_s29 + $0x28] sm:$0xff] %v3051_v4  ;;  %v3050_v53 = vsel %vm2985_vm5, %v2953_v60, %v3018_v54  ;;  %v2955_v13 = vadd.f32 %v5012_v61, %v6401_v14  ;;  %v4667_v24 = vpop.f32.mrb[8].mxu0 }
 0x1f6   : > { %3082 = vst [vmem:[%s6411_s29 + $0x20] sm:$0xff] %v3050_v53  ;;  %vm2988_vm6 = vcmp.ge.f32.partialorder %v2956_v10, 0.0  ;;  %v3021_v19 = vmul.f32 %v6404_v45, %v2956_v10  ;;  %v5013_v7 = vadd.f32 %v4667_v24, %v6382_v0  ;;  %v2792_v34 = vpop.f32.mrb[9].mxu0 }
 0x1f7   : > { %vm2987_vm7 = vcmp.ge.f32.partialorder %v2955_v13, 0.0  ;;  %v3020_v9 = vmul.f32 %v6404_v45, %v2955_v13  ;;  %v5014_v49 = vadd.f32 %v2792_v34, %v6384_v11 }
 0x1f8   : > { %v3053_v37 = vsel %vm2988_vm6, %v2956_v10, %v3021_v19  ;;  %v2958_v38 = vadd.f32 %v5013_v7, %v6401_v14 }
 0x1f9   : > { %3085 = vst [vmem:[%s6411_s29 + $0x38] sm:$0xff] %v3053_v37  ;;  %v3052_v23 = vsel %vm2987_vm7, %v2955_v13, %v3020_v9  ;;  %v2957_v40 = vadd.f32 %v5014_v49, %v6401_v14  ;;  %v4670_v42 = vpop.f32.mrb[10].mxu0 }
 0x1fa   : > { %3084 = vst [vmem:[%s6411_s29 + $0x30] sm:$0xff] %v3052_v23  ;;  %vm2990_vm8 = vcmp.ge.f32.partialorder %v2958_v38, 0.0  ;;  %v3023_v46 = vmul.f32 %v6404_v45, %v2958_v38  ;;  %v5015_v48 = vadd.f32 %v4670_v42, %v6386_v6  ;;  %v2802_v52 = vpop.f32.mrb[11].mxu0 }
 0x1fb   : > { %vm2989_vm9 = vcmp.ge.f32.partialorder %v2957_v40, 0.0  ;;  %v3022_v62 = vmul.f32 %v6404_v45, %v2957_v40  ;;  %v5016_v3 = vadd.f32 %v2802_v52, %v6388_v55 }
 0x1fc   : > { %v3055_v57 = vsel %vm2990_vm8, %v2958_v38, %v3023_v46  ;;  %v2960_v29 = vadd.f32 %v5015_v48, %v6401_v14 }
 0x1fd   : > { %3087 = vst [vmem:[%s6411_s29 + $0x48] sm:$0xff] %v3055_v57  ;;  %v3054_v0 = vsel %vm2989_vm9, %v2957_v40, %v3022_v62  ;;  %v2959_v11 = vadd.f32 %v5016_v3, %v6401_v14  ;;  %v4673_v25 = vpop.f32.mrb[12].mxu0 }
 0x1fe   : > { %3086 = vst [vmem:[%s6411_s29 + $0x40] sm:$0xff] %v3054_v0  ;;  %vm2992_vm10 = vcmp.ge.f32.partialorder %v2960_v29, 0.0  ;;  %v3025_v6 = vmul.f32 %v6404_v45, %v2960_v29  ;;  %v5017_v20 = vadd.f32 %v4673_v25, %v6390_v16  ;;  %v2812_v41 = vpop.f32.mrb[13].mxu0 }
 0x1ff   : > { %vm2991_vm11 = vcmp.ge.f32.partialorder %v2959_v11, 0.0  ;;  %v3024_v55 = vmul.f32 %v6404_v45, %v2959_v11  ;;  %v5018_v44 = vadd.f32 %v2812_v41, %v6392_v5 }
 0x200   : > { %v3057_v28 = vsel %vm2992_vm10, %v2960_v29, %v3025_v6  ;;  %v2962_v17 = vadd.f32 %v5017_v20, %v6401_v14 }
 0x201   : > { %3089 = vst [vmem:[%s6411_s29 + $0x58] sm:$0xff] %v3057_v28  ;;  %v3056_v50 = vsel %vm2991_vm11, %v2959_v11, %v3024_v55  ;;  %v2961_v39 = vadd.f32 %v5018_v44, %v6401_v14  ;;  %v4676_v12 = vpop.f32.mrb[14].mxu0 }
 0x202   : > { %3088 = vst [vmem:[%s6411_s29 + $0x50] sm:$0xff] %v3056_v50  ;;  %vm2994_vm12 = vcmp.ge.f32.partialorder %v2962_v17, 0.0  ;;  %v3027_v16 = vmul.f32 %v6404_v45, %v2962_v17  ;;  %v5019_v8 = vadd.f32 %v4676_v12, %v6394_v2  ;;  %v2822_v36 = vpop.f32.mrb[15].mxu0 }
 0x203   : > { %vm2993_vm13 = vcmp.ge.f32.partialorder %v2961_v39, 0.0  ;;  %v3026_v5 = vmul.f32 %v6404_v45, %v2961_v39  ;;  %v5020_v31 = vadd.f32 %v2822_v36, %v6396_v18 }
 0x204   : > { %v3059_v21 = vsel %vm2994_vm12, %v2962_v17, %v3027_v16  ;;  %v2964_v15 = vadd.f32 %v5019_v8, %v6401_v14  ;;  %v4359_v51 = vpop.f32.mrb[16].mxu1 }
 0x205   : > { %3091 = vst [vmem:[%s6411_s29 + $0x68] sm:$0xff] %v3059_v21  ;;  %v3058_v59 = vsel %vm2993_vm13, %v2961_v39, %v3026_v5  ;;  %v2963_v56 = vadd.f32 %v5020_v31, %v6401_v14  ;;  %v4679_v32 = vpop.f32.mrb[16].mxu0  ;;  %v1607_v1 = vpop.f32.mrb[17].mxu1 }
 0x206   : > { %3090 = vst [vmem:[%s6411_s29 + $0x60] sm:$0xff] %v3058_v59  ;;  %vm2996_vm14 = vcmp.ge.f32.partialorder %v2964_v15, 0.0  ;;  %v3029_v2 = vmul.f32 %v6404_v45, %v2964_v15  ;;  %v5021_v58 = vadd.f32 %v4679_v32, %v4359_v51  ;;  %v2832_v47 = vpop.f32.mrb[17].mxu0 }
 0x207   : > { %vm2995_vm15 = vcmp.ge.f32.partialorder %v2963_v56, 0.0  ;;  %v3028_v18 = vmul.f32 %v6404_v45, %v2963_v56  ;;  %v5022_v22 = vadd.f32 %v2832_v47, %v1607_v1 }
 0x208   : > { %v3061_v63 = vsel %vm2996_vm14, %v2964_v15, %v3029_v2  ;;  %v2966_v35 = vadd.f32 %v5021_v58, %v6401_v14  ;;  %v4362_v30 = vpop.f32.mrb[18].mxu1 }
 0x209   : > { %3093 = vst [vmem:[%s6411_s29 + $0x78] sm:$0xff] %v3061_v63  ;;  %v3060_v60 = vsel %vm2995_vm15, %v2963_v56, %v3028_v18  ;;  %v2965_v26 = vadd.f32 %v5022_v22, %v6401_v14  ;;  %v4682_v27 = vpop.f32.mrb[18].mxu0  ;;  %v1617_v33 = vpop.f32.mrb[19].mxu1 }
 0x20a   : > { %3092 = vst [vmem:[%s6411_s29 + $0x70] sm:$0xff] %v3060_v60  ;;  %vm2998_vm0 = vcmp.ge.f32.partialorder %v2966_v35, 0.0  ;;  %v3031_v43 = vmul.f32 %v6404_v45, %v2966_v35  ;;  %v5023_v54 = vadd.f32 %v4682_v27, %v4362_v30  ;;  %v2842_v61 = vpop.f32.mrb[19].mxu0 }
 0x20b   : > { %vm2997_vm1 = vcmp.ge.f32.partialorder %v2965_v26, 0.0  ;;  %v3030_v4 = vmul.f32 %v6404_v45, %v2965_v26  ;;  %v5024_v10 = vadd.f32 %v2842_v61, %v1617_v33 }
 0x20c   : > { %v3063_v53 = vsel %vm2998_vm0, %v2966_v35, %v3031_v43  ;;  %v2968_v13 = vadd.f32 %v5023_v54, %v6401_v14  ;;  %v4365_v24 = vpop.f32.mrb[20].mxu1 }
 0x20d   : > { %3095 = vst [vmem:[%s6411_s29 + $0x88] sm:$0xff] %v3063_v53  ;;  %v3062_v19 = vsel %vm2997_vm1, %v2965_v26, %v3030_v4  ;;  %v2967_v7 = vadd.f32 %v5024_v10, %v6401_v14  ;;  %v4685_v34 = vpop.f32.mrb[20].mxu0  ;;  %v1627_v9 = vpop.f32.mrb[21].mxu1 }
 0x20e   : > { %3094 = vst [vmem:[%s6411_s29 + $0x80] sm:$0xff] %v3062_v19  ;;  %vm3000_vm2 = vcmp.ge.f32.partialorder %v2968_v13, 0.0  ;;  %v3033_v49 = vmul.f32 %v6404_v45, %v2968_v13  ;;  %v5025_v37 = vadd.f32 %v4685_v34, %v4365_v24  ;;  %v2852_v38 = vpop.f32.mrb[21].mxu0 }
 0x20f   : > { %vm2999_vm3 = vcmp.ge.f32.partialorder %v2967_v7, 0.0  ;;  %v3032_v23 = vmul.f32 %v6404_v45, %v2967_v7  ;;  %v5026_v40 = vadd.f32 %v2852_v38, %v1627_v9 }
 0x210   : > { %v3065_v42 = vsel %vm3000_vm2, %v2968_v13, %v3033_v49  ;;  %v2970_v46 = vadd.f32 %v5025_v37, %v6401_v14  ;;  %v4368_v48 = vpop.f32.mrb[22].mxu1 }
 0x211   : > { %3097 = vst [vmem:[%s6411_s29 + $0x98] sm:$0xff] %v3065_v42  ;;  %v3064_v52 = vsel %vm2999_vm3, %v2967_v7, %v3032_v23  ;;  %v2969_v62 = vadd.f32 %v5026_v40, %v6401_v14  ;;  %v4688_v3 = vpop.f32.mrb[22].mxu0  ;;  %v1637_v57 = vpop.f32.mrb[23].mxu1 }
 0x212   : > { %3096 = vst [vmem:[%s6411_s29 + $0x90] sm:$0xff] %v3064_v52  ;;  %vm3002_vm4 = vcmp.ge.f32.partialorder %v2970_v46, 0.0  ;;  %v3035_v29 = vmul.f32 %v6404_v45, %v2970_v46  ;;  %v5027_v0 = vadd.f32 %v4688_v3, %v4368_v48  ;;  %v2862_v11 = vpop.f32.mrb[23].mxu0 }
 0x213   : > { %vm3001_vm5 = vcmp.ge.f32.partialorder %v2969_v62, 0.0  ;;  %v3034_v25 = vmul.f32 %v6404_v45, %v2969_v62  ;;  %v5028_v6 = vadd.f32 %v2862_v11, %v1637_v57 }
 0x214   : > { %v3067_v20 = vsel %vm3002_vm4, %v2970_v46, %v3035_v29  ;;  %v2972_v41 = vadd.f32 %v5027_v0, %v6401_v14  ;;  %v4371_v55 = vpop.f32.mrb[24].mxu1 }
 0x215   : > { %3099 = vst [vmem:[%s6411_s29 + $0xa8] sm:$0xff] %v3067_v20  ;;  %v3066_v44 = vsel %vm3001_vm5, %v2969_v62, %v3034_v25  ;;  %v2971_v28 = vadd.f32 %v5028_v6, %v6401_v14  ;;  %v4691_v17 = vpop.f32.mrb[24].mxu0  ;;  %v1647_v50 = vpop.f32.mrb[25].mxu1 }
 0x216   : > { %3098 = vst [vmem:[%s6411_s29 + $0xa0] sm:$0xff] %v3066_v44  ;;  %vm3004_vm6 = vcmp.ge.f32.partialorder %v2972_v41, 0.0  ;;  %v3037_v39 = vmul.f32 %v6404_v45, %v2972_v41  ;;  %v5029_v12 = vadd.f32 %v4691_v17, %v4371_v55  ;;  %v2872_v16 = vpop.f32.mrb[25].mxu0 }
 0x217   : > { %vm3003_vm7 = vcmp.ge.f32.partialorder %v2971_v28, 0.0  ;;  %v3036_v8 = vmul.f32 %v6404_v45, %v2971_v28  ;;  %v5030_v36 = vadd.f32 %v2872_v16, %v1647_v50 }
 0x218   : > { %v3069_v5 = vsel %vm3004_vm6, %v2972_v41, %v3037_v39  ;;  %v2974_v31 = vadd.f32 %v5029_v12, %v6401_v14  ;;  %v4374_v21 = vpop.f32.mrb[26].mxu1 }
 0x219   : > { %3101 = vst [vmem:[%s6411_s29 + $0xb8] sm:$0xff] %v3069_v5  ;;  %v3068_v15 = vsel %vm3003_vm7, %v2971_v28, %v3036_v8  ;;  %v2973_v51 = vadd.f32 %v5030_v36, %v6401_v14  ;;  %v4694_v59 = vpop.f32.mrb[26].mxu0  ;;  %v1657_v56 = vpop.f32.mrb[27].mxu1 }
 0x21a   : > { %3100 = vst [vmem:[%s6411_s29 + $0xb0] sm:$0xff] %v3068_v15  ;;  %vm3006_vm8 = vcmp.ge.f32.partialorder %v2974_v31, 0.0  ;;  %v3039_v32 = vmul.f32 %v6404_v45, %v2974_v31  ;;  %v5031_v1 = vadd.f32 %v4694_v59, %v4374_v21  ;;  %v2882_v2 = vpop.f32.mrb[27].mxu0 }
 0x21b   : > { %vm3005_vm9 = vcmp.ge.f32.partialorder %v2973_v51, 0.0  ;;  %v3038_v58 = vmul.f32 %v6404_v45, %v2973_v51  ;;  %v5032_v47 = vadd.f32 %v2882_v2, %v1657_v56 }
 0x21c   : > { %v3071_v18 = vsel %vm3006_vm8, %v2974_v31, %v3039_v32  ;;  %v2976_v22 = vadd.f32 %v5031_v1, %v6401_v14  ;;  %v4377_v63 = vpop.f32.mrb[28].mxu1 }
 0x21d   : > { %3103 = vst [vmem:[%s6411_s29 + $0xc8] sm:$0xff] %v3071_v18  ;;  %v3070_v35 = vsel %vm3005_vm9, %v2973_v51, %v3038_v58  ;;  %v2975_v30 = vadd.f32 %v5032_v47, %v6401_v14  ;;  %v4697_v60 = vpop.f32.mrb[28].mxu0  ;;  %v1667_v26 = vpop.f32.mrb[29].mxu1 }
 0x21e   : > { %3102 = vst [vmem:[%s6411_s29 + $0xc0] sm:$0xff] %v3070_v35  ;;  %vm3008_vm10 = vcmp.ge.f32.partialorder %v2976_v22, 0.0  ;;  %v3041_v27 = vmul.f32 %v6404_v45, %v2976_v22  ;;  %v5033_v33 = vadd.f32 %v4697_v60, %v4377_v63  ;;  %v2892_v43 = vpop.f32.mrb[29].mxu0 }
 0x21f   : > { %vm3007_vm11 = vcmp.ge.f32.partialorder %v2975_v30, 0.0  ;;  %v3040_v54 = vmul.f32 %v6404_v45, %v2975_v30  ;;  %v5034_v61 = vadd.f32 %v2892_v43, %v1667_v26 }
 0x220   : > { %v3073_v4 = vsel %vm3008_vm10, %v2976_v22, %v3041_v27  ;;  %v2978_v10 = vadd.f32 %v5033_v33, %v6401_v14  ;;  %v4380_v53 = vpop.f32.mrb[30].mxu1 }
 0x221   : > { %3105 = vst [vmem:[%s6411_s29 + $0xd8] sm:$0xff] %v3073_v4  ;;  %v3072_v13 = vsel %vm3007_vm11, %v2975_v30, %v3040_v54  ;;  %v2977_v24 = vadd.f32 %v5034_v61, %v6401_v14  ;;  %v4700_v19 = vpop.f32.mrb[30].mxu0  ;;  %v1677_v7 = vpop.f32.mrb[31].mxu1 }
 0x222   : > { %3104 = vst [vmem:[%s6411_s29 + $0xd0] sm:$0xff] %v3072_v13  ;;  %vm3010_vm12 = vcmp.ge.f32.partialorder %v2978_v10, 0.0  ;;  %v3043_v34 = vmul.f32 %v6404_v45, %v2978_v10  ;;  %v5035_v9 = vadd.f32 %v4700_v19, %v4380_v53  ;;  %v2902_v49 = vpop.f32.mrb[31].mxu0 }
 0x223   : > { %vm3009_vm13 = vcmp.ge.f32.partialorder %v2977_v24, 0.0  ;;  %v3042_v37 = vmul.f32 %v6404_v45, %v2977_v24  ;;  %v5036_v38 = vadd.f32 %v2902_v49, %v1677_v7 }
 0x224   : > { %v3075_v23 = vsel %vm3010_vm12, %v2978_v10, %v3043_v34  ;;  %v2980_v40 = vadd.f32 %v5035_v9, %v6401_v14 }
 0x225   : > { %3107 = vst [vmem:[%s6411_s29 + $0xe8] sm:$0xff] %v3075_v23  ;;  %v3074_v42 = vsel %vm3009_vm13, %v2977_v24, %v3042_v37  ;;  %v2979_v46 = vadd.f32 %v5036_v38, %v6401_v14 }
 0x226   : > { %3106 = vst [vmem:[%s6411_s29 + $0xe0] sm:$0xff] %v3074_v42  ;;  %vm3012_vm14 = vcmp.ge.f32.partialorder %v2980_v40, 0.0  ;;  %v3045_v48 = vmul.f32 %v6404_v45, %v2980_v40 }
 0x227   : > { %vm3011_vm15 = vcmp.ge.f32.partialorder %v2979_v46, 0.0  ;;  %v3044_v52 = vmul.f32 %v6404_v45, %v2979_v46 }
 0x228   : > { %v3077_v62 = vsel %vm3012_vm14, %v2980_v40, %v3045_v48 }
 0x229   : > { %3109 = vst [vmem:[%s6411_s29 + $0xf8] sm:$0xff] %v3077_v62  ;;  %v3076_v3 = vsel %vm3011_vm15, %v2979_v46, %v3044_v52 }
 0x22a   : > { %3108 = vst [vmem:[%s6411_s29 + $0xf0] sm:$0xff] %v3076_v3 }
 0x22b PF: > { %s15_s19 = sadd.s32 1, %s5308_s19   ;;  %s6629_s17 = smov %s5304_s18 }
 0x22c   : > { %p12_p5 = scmp.ge.s32.totalorder %s15_s19, 4   ;;  %s6630_s18 = smov %s6632_s3 }
 0x22e   :  { %14 = sbr.rel (!%p12_p5) target bundleno = 2 (0x2), region = 82 }

// kernel: ppm_forward.13
= control target key start
LH: loop header
LB: loop body
LE: loop exit
PB: predicated region body
PF: predicated region fallthrough
CT: control target
= control target key end

     0   :  { %s1532_s0 = inlined_call_operand.vmem [shape: f32[256,50], index: 0, kind: input, shape index: {}]   ;;  %s1533_s1 = inlined_call_operand.vmem [shape: f32[2,50,128], index: 1, kind: input, shape index: {}]   ;;  %s1534_s2 = inlined_call_operand.vmem [shape: f32[1,128], index: 2, kind: input, shape index: {}]   ;;  %s1535_s3 = inlined_call_operand.<no memory space> [shape: f32[1], index: 3, kind: input, shape index: {}]   ;;  %s1536_s4 = inlined_call_operand.hbm [shape: f32[2,256,128], index: 4, kind: output, shape index: {}]  }
   0x1   :  { %9 = sst [smem:[#allocation2]] %s1535_s3 }
   0x2   :  { %10 = vsyncpa [#allocation4], 0 }
   0x3   :  { %12 = vsyncpa [#allocation4 + $0x1], 0  ;;  %s1178_s17 = smov 0   ;;  %s1180_s18 = smov 0  }
   0x4   :  { %s1182_s19 = smov 0   ;;  %s1184_s20 = smov 0  }
   0x5   :  { %s1186_s21 = smov 0   ;;  %s1188_s22 = smov 0  }
   0x6 LB: > { %s840_s3 = sadd.s32 4294967295, %s1145_s22   ;;  %s841_s23 = sadd.s32 4294967294, %s1145_s22   ;;  %s1145_s22 = sphi %s1188_s22, %s18_s22   ;;  %s1141_s21 = sphi %s1186_s21, %s1543_s21   ;;  %s1137_s20 = sphi %s1184_s20, %s1542_s20   ;;  %s1133_s19 = sphi %s1182_s19, %s1541_s19   ;;  %s1129_s18 = sphi %s1180_s18, %s1540_s18   ;;  %s1125_s17 = sphi %s1178_s17, %s1539_s17  }
   0x7   : > { %s30_s24 = sadd.s32 1, %s1141_s21  ;;  %s133_s25 = sadd.s32 1, %s1133_s19 }
   0x8   : > { %p32_p0 = scmp.ge.s32.totalorder %s30_s24, 2  ;;  %p143_p1 = scmp.ne.s32.totalorder %s1133_s19, %s1129_s18 }
   0x9   : > { %p144_p2 = scmp.eq.s32.totalorder %s840_s3, 1  ;;  %p149_p3 = scmp.ne.s32.totalorder %s1129_s18, %s1125_s17 }
   0xa   : > { %s1545_s24 = smov (%p32_p0, %s30_s24), 0  ;;  %p150_p5 = scmp.eq.s32.totalorder %s841_s23, 1 }
   0xb   : > { %p1218_p4 = por %p144_p2, %p143_p1  ;;  %s128_s27 = ssub.s32 %s1141_s21, %s1545_s24 }
   0xc   : > { %p845_p6 = scmp.ge.s32.totalorder %s1145_s22, 1  ;;  %p131_p7 = scmp.eq.s32.totalorder %s128_s27, 0 }
   0xd   : > { %p1225_p8 = por %p150_p5, %p149_p3  ;;  %p191_p9 = scmp.lt.s32.totalorder %s1145_s22, 3 }
   0xe   : > { %s1231_s29 = scalar_select %p131_p7, %s1133_s19, %s133_s25  }
   0xf   : > { %p192_p10 = pnand %p845_p6, %p191_p9 }
  0x10   : > { %p228_p11 = scmp.lt.s32.totalorder (!%p192_p10), %s1137_s20, 1  ;;  %v234_v0 = vld [vmem:[%s1532_s0] sm:$0xff] (!%p192_p10)  ;;  %vm280_vm0 = vcmask (!%p192_p10), 408576   ;;  %vm377_vm1 = vcmask (!%p192_p10), 1041408   ;;  %v235_v12 = vld [vmem:[%s1532_s0 + $0x8] sm:$0xff] (!%p192_p10)  ;;  %v236_v14 = vld [vmem:[%s1532_s0 + $0x10] sm:$0xff] (!%p192_p10) }
  0x11   : > { %195 = sbr.rel (%p192_p10) target bundleno = 308 (0x134), region = 36  ;;  %v250_v1 = vld [vmem:[%s1532_s0 + $0x80] sm:$0xff] (!%p192_p10)  ;;  %941 = vmatprep.mubr.msk.f32.mxu0 (!%p192_p10), %vm280_vm0, %v234_v0  ;;  %v251_v13 = vld [vmem:[%s1532_s0 + $0x88] sm:$0xff] (!%p192_p10)  ;;  %v252_v15 = vld [vmem:[%s1532_s0 + $0x90] sm:$0xff] (!%p192_p10)  ;;  %s606_s5 = sld [smem:[#allocation2]] (!%p192_p10) }
  0x12   : > { %965 = vmatprep.mubr.msk.f32.mxu1 (!%p192_p10), %vm280_vm0, %v250_v1  ;;  %v237_v16 = vld [vmem:[%s1532_s0 + $0x18] sm:$0xff] (!%p192_p10)  ;;  %v238_v18 = vld [vmem:[%s1532_s0 + $0x20] sm:$0xff] (!%p192_p10)  ;;  %v239_v20 = vld [vmem:[%s1532_s0 + $0x28] sm:$0xff] (!%p192_p10)  ;;  %s219_s6 = sand.u32 (!%p192_p10), 1, %s1129_s18   ;;  %s887_s11 = sshll.u32 (!%p192_p10), %s1137_s20, 12 }
  0x13   : > { %v253_v17 = vld [vmem:[%s1532_s0 + $0x98] sm:$0xff] (!%p192_p10)  ;;  %v254_v19 = vld [vmem:[%s1532_s0 + $0xa0] sm:$0xff] (!%p192_p10)  ;;  %v255_v21 = vld [vmem:[%s1532_s0 + $0xa8] sm:$0xff] (!%p192_p10)  ;;  %s1476_s14 = scalar_lea.hbm (!%p192_p10), %s1536_s4, %s887_s11  ;;  %s1486_s15 = scalar_lea.sflag (!%p192_p10), [#allocation4], %s219_s6 }
  0x14   : > { %v240_v22 = vld [vmem:[%s1532_s0 + $0x30] sm:$0xff] (!%p192_p10)  ;;  %v241_v24 = vld [vmem:[%s1532_s0 + $0x38] sm:$0xff] (!%p192_p10)  ;;  %v242_v26 = vld [vmem:[%s1532_s0 + $0x40] sm:$0xff] (!%p192_p10)  ;;  %s1147_s3 = smov (!%p192_p10), [#allocation3]  }
  0x15   : > { %v256_v23 = vld [vmem:[%s1532_s0 + $0xb0] sm:$0xff] (!%p192_p10)  ;;  %v257_v25 = vld [vmem:[%s1532_s0 + $0xb8] sm:$0xff] (!%p192_p10)  ;;  %v258_v27 = vld [vmem:[%s1532_s0 + $0xc0] sm:$0xff] (!%p192_p10)  ;;  %s1071_s23 = sshll.u32 (!%p192_p10), %s1147_s3, 4  ;;  %s1072_s23 = int_to_ptr.vmem [resolvable:$false] %s1071_s23 }
  0x16   : > { %v243_v28 = vld [vmem:[%s1532_s0 + $0x48] sm:$0xff] (!%p192_p10)  ;;  %v244_v30 = vld [vmem:[%s1532_s0 + $0x50] sm:$0xff] (!%p192_p10)  ;;  %v245_v32 = vld [vmem:[%s1532_s0 + $0x58] sm:$0xff] (!%p192_p10)  ;;  %s1073_s25 = scalar_lea.vmem (!%p192_p10), %s1072_s23, 8192 }
  0x17   : > { %v259_v29 = vld [vmem:[%s1532_s0 + $0xc8] sm:$0xff] (!%p192_p10)  ;;  %v260_v31 = vld [vmem:[%s1532_s0 + $0xd0] sm:$0xff] (!%p192_p10)  ;;  %v261_v33 = vld [vmem:[%s1532_s0 + $0xd8] sm:$0xff] (!%p192_p10)  ;;  %v1374_v44 = vstv (!%p192_p10), %s606_s5 }
  0x18   : > { %s229_s8 = scalar_select %p228_p11, %s1137_s20, 1  ;;  %v246_v34 = vld [vmem:[%s1532_s0 + $0x60] sm:$0xff]  ;;  %v247_v36 = vld [vmem:[%s1532_s0 + $0x68] sm:$0xff]  ;;  %v248_v38 = vld [vmem:[%s1532_s0 + $0x70] sm:$0xff] }
  0x19   : > { %v262_v35 = vld [vmem:[%s1532_s0 + $0xe0] sm:$0xff]  ;;  %v263_v37 = vld [vmem:[%s1532_s0 + $0xe8] sm:$0xff]  ;;  %v264_v39 = vld [vmem:[%s1532_s0 + $0xf0] sm:$0xff] }
  0x1a   : > { %s1009_s9 = smul.u32 56, %s229_s8  ;;  %v249_v40 = vld [vmem:[%s1532_s0 + $0x78] sm:$0xff]  ;;  %v1370_v42 = vld [vmem:[%s1534_s2] ss:$0 sm:$0xff] }
  0x1b   : > { %v265_v41 = vld [vmem:[%s1532_s0 + $0xf8] sm:$0xff] }
  0x1c   : > { %s232_s12 = scalar_lea.vmem %s1533_s1, %s1009_s9  ;;  %s846_s9 = sshll.u32 %s219_s6, 8 }
  0x1d   : > { %v266_v2 = vld [vmem:[%s232_s12] sm:$0xff]  ;;  %v267_v3 = vld [vmem:[%s232_s12 + $0x8] sm:$0xff]  ;;  %v268_v4 = vld [vmem:[%s232_s12 + $0x10] sm:$0xff]  ;;  %s1386_s10 = scalar_lea.vmem [#allocation3], %s846_s9 }
  0x1e   : > { %v989_v5 = vpack.c.bf16 %v267_v3, %v266_v2  ;;  %v269_v6 = vld [vmem:[%s232_s12 + $0x18] sm:$0xff]  ;;  %v270_v8 = vld [vmem:[%s232_s12 + $0x20] sm:$0xff]  ;;  %v271_v9 = vld [vmem:[%s232_s12 + $0x28] sm:$0xff] }
  0x1f   : > { %v993_v7 = vpack.c.bf16 %v269_v6, %v268_v4  ;;  %v997_v10 = vpack.c.bf16 %v271_v9, %v270_v8  ;;  %v272_v11 = vld [vmem:[%s232_s12 + $0x30] sm:$0x3]  ;;  %s752_s12 = sshll.u32 %s1386_s10, 4  ;;  %s1478_s12 = int_to_ptr.vmem [resolvable:$true] %s752_s12 }
  0x20   : > { %990 = vmatprep.subr.bf16.mxu0 %v989_v5  ;;  %1001 = vmatprep.subr.bf16.mxu1 %v989_v5  ;;  %s1067_s16 = scalar_lea.vmem %s1478_s12, 4096  ;;  %p1074_p1 = scmp.lt.s32.totalorder %s1478_s12, %s1072_s23 }
  0x21   : > { %992 = vmatpush3.bf16.msra.mxu0 %v989_v5  ;;  %1005 = vmatpush3.bf16.msra.mxu1 %v989_v5  ;;  %p1068_p12 = scmp.ne.s32.totalorder %s1478_s12, %s1067_s16  ;;  %p1075_p2 = scmp.lt.s32.totalorder %s1073_s25, %s1067_s16 }
  0x22   : > { %994 = vmatprep.subr.bf16.mxu0 %v993_v7  ;;  %1002 = vmatprep.subr.bf16.mxu1 %v993_v7 }
  0x23   : > { %p1069_p13 = pnand %p1068_p12, %p1218_p4  ;;  %p1076_p3 = por %p1075_p2, %p1074_p1 }
  0x25   : > { %996 = vmatpush3.bf16.msra.mxu0 %v993_v7  ;;  %1006 = vmatpush3.bf16.msra.mxu1 %v993_v7  ;;  %p1070_p0 = pneg %p1069_p13 }
  0x26   : > { %998 = vmatprep.subr.bf16.mxu0 %v997_v10  ;;  %1003 = vmatprep.subr.bf16.mxu1 %v997_v10 }
  0x27   : > { %p1077_p5 = pnand %p1076_p3, %p1070_p0 }
  0x29   : > { %1000 = vmatpush3.bf16.msra.mxu0 %v997_v10  ;;  %1007 = vmatpush3.bf16.msra.mxu1 %v997_v10 }
  0x2a   : > { %939 = vmatprep.subr.msk.mxu0 %vm377_vm1, %v272_v11  ;;  %1004 = vmatprep.subr.msk.mxu1 %vm377_vm1, %v272_v11 }
  0x2d   : > { %940 = vmatpush3.msk.msra.mxu0 %vm377_vm1, %v272_v11  ;;  %1008 = vmatpush3.msk.msra.mxu1 %vm377_vm1, %v272_v11 }
  0x2e   : > { %942 = vmatmul.mubr.msk.f32.vlgmr.msra.gmra.mrb[0].mxu0 %vm280_vm0, %v235_v12  ;;  %966 = vmatmul.mubr.msk.f32.vlgmr.msra.gmra.mrb[0].mxu1 %vm280_vm0, %v251_v13 }
  0x2f   : > { %944 = vmatprep.mubr.msk.f32.mxu0 %vm280_vm0, %v236_v14  ;;  %968 = vmatprep.mubr.msk.f32.mxu1 %vm280_vm0, %v252_v15 }
  0x32   : > { %945 = vmatmul.mubr.msk.f32.gmra.mrb[2].mxu0 %vm280_vm0, %v237_v16  ;;  %969 = vmatmul.mubr.msk.f32.gmra.mrb[2].mxu1 %vm280_vm0, %v253_v17 }
  0x33   : > { %947 = vmatprep.mubr.msk.f32.mxu0 %vm280_vm0, %v238_v18  ;;  %971 = vmatprep.mubr.msk.f32.mxu1 %vm280_vm0, %v254_v19 }
  0x36   : > { %948 = vmatmul.mubr.msk.f32.gmra.mrb[4].mxu0 %vm280_vm0, %v239_v20  ;;  %972 = vmatmul.mubr.msk.f32.gmra.mrb[4].mxu1 %vm280_vm0, %v255_v21 }
  0x37   : > { %950 = vmatprep.mubr.msk.f32.mxu0 %vm280_vm0, %v240_v22  ;;  %974 = vmatprep.mubr.msk.f32.mxu1 %vm280_vm0, %v256_v23 }
  0x3a   : > { %951 = vmatmul.mubr.msk.f32.gmra.mrb[6].mxu0 %vm280_vm0, %v241_v24  ;;  %975 = vmatmul.mubr.msk.f32.gmra.mrb[6].mxu1 %vm280_vm0, %v257_v25 }
  0x3b   : > { %953 = vmatprep.mubr.msk.f32.mxu0 %vm280_vm0, %v242_v26  ;;  %977 = vmatprep.mubr.msk.f32.mxu1 %vm280_vm0, %v258_v27 }
  0x3e   : > { %954 = vmatmul.mubr.msk.f32.gmra.mrb[8].mxu0 %vm280_vm0, %v243_v28  ;;  %978 = vmatmul.mubr.msk.f32.gmra.mrb[8].mxu1 %vm280_vm0, %v259_v29 }
  0x3f   : > { %956 = vmatprep.mubr.msk.f32.mxu0 %vm280_vm0, %v244_v30  ;;  %980 = vmatprep.mubr.msk.f32.mxu1 %vm280_vm0, %v260_v31 }
  0x42   : > { %957 = vmatmul.mubr.msk.f32.gmra.mrb[10].mxu0 %vm280_vm0, %v245_v32  ;;  %981 = vmatmul.mubr.msk.f32.gmra.mrb[10].mxu1 %vm280_vm0, %v261_v33 }
  0x43   : > { %959 = vmatprep.mubr.msk.f32.mxu0 %vm280_vm0, %v246_v34  ;;  %983 = vmatprep.mubr.msk.f32.mxu1 %vm280_vm0, %v262_v35 }
  0x46   : > { %960 = vmatmul.mubr.msk.f32.gmra.mrb[12].mxu0 %vm280_vm0, %v247_v36  ;;  %984 = vmatmul.mubr.msk.f32.gmra.mrb[12].mxu1 %vm280_vm0, %v263_v37 }
  0x47   : > { %962 = vmatprep.mubr.msk.f32.mxu0 %vm280_vm0, %v248_v38  ;;  %986 = vmatprep.mubr.msk.f32.mxu1 %vm280_vm0, %v264_v39 }
  0x4a   : > { %963 = vmatmul.mubr.msk.f32.gmra.mrb[14].mxu0 %vm280_vm0, %v249_v40  ;;  %987 = vmatmul.mubr.msk.f32.gmra.mrb[14].mxu1 %vm280_vm0, %v265_v41 }
 0x101   : > { %v943_v43 = vpop.f32.mrb[0].mxu0  ;;  %v967_v45 = vpop.f32.mrb[0].mxu1 }
 0x102   : > { %v453_v46 = vadd.f32 %v943_v43, %v1370_v42  ;;  %v533_v47 = vadd.f32 %v967_v45, %v1370_v42  ;;  %v447_v48 = vpop.f32.mrb[1].mxu0  ;;  %v527_v49 = vpop.f32.mrb[1].mxu1 }
 0x103   : > { %v448_v50 = vadd.f32 %v1370_v42, %v447_v48  ;;  %v528_v51 = vadd.f32 %v1370_v42, %v527_v49 }
 0x104   : > { %vm608_vm2 = vcmp.ge.f32.partialorder %v453_v46, 0.0  ;;  %v641_v52 = vmul.f32 %v1374_v44, %v453_v46  ;;  %vm624_vm3 = vcmp.ge.f32.partialorder %v533_v47, 0.0  ;;  %v657_v53 = vmul.f32 %v1374_v44, %v533_v47 }
 0x105   : > { %vm607_vm4 = vcmp.ge.f32.partialorder %v448_v50, 0.0  ;;  %v640_v54 = vmul.f32 %v1374_v44, %v448_v50  ;;  %vm623_vm5 = vcmp.ge.f32.partialorder %v528_v51, 0.0  ;;  %v656_v55 = vmul.f32 %v1374_v44, %v528_v51  ;;  %v946_v56 = vpop.f32.mrb[2].mxu0  ;;  %v970_v57 = vpop.f32.mrb[2].mxu1 }
 0x106   : > { %v673_v58 = vsel %vm608_vm2, %v453_v46, %v641_v52  ;;  %v689_v59 = vsel %vm624_vm3, %v533_v47, %v657_v53  ;;  %v463_v60 = vadd.f32 %v946_v56, %v1370_v42  ;;  %v543_v61 = vadd.f32 %v970_v57, %v1370_v42  ;;  %v457_v62 = vpop.f32.mrb[3].mxu0  ;;  %v537_v63 = vpop.f32.mrb[3].mxu1 }
 0x107   : > { %705 = vst [vmem:[%s1386_s10 + $0x8] sm:$0xff] %v673_v58  ;;  %721 = vst [vmem:[%s1386_s10 + $0x88] sm:$0xff] %v689_v59  ;;  %v672_v0 = vsel %vm607_vm4, %v448_v50, %v640_v54  ;;  %v688_v1 = vsel %vm623_vm5, %v528_v51, %v656_v55  ;;  %v458_v2 = vadd.f32 %v1370_v42, %v457_v62 }
 0x108   : > { %v538_v3 = vadd.f32 %v1370_v42, %v537_v63  ;;  %704 = vst [vmem:[%s1386_s10] sm:$0xff] %v672_v0  ;;  %720 = vst [vmem:[%s1386_s10 + $0x80] sm:$0xff] %v688_v1  ;;  %vm610_vm6 = vcmp.ge.f32.partialorder %v463_v60, 0.0  ;;  %v643_v4 = vmul.f32 %v1374_v44, %v463_v60  ;;  %vm626_vm7 = vcmp.ge.f32.partialorder %v543_v61, 0.0 }
 0x109   : > { %v659_v5 = vmul.f32 %v1374_v44, %v543_v61  ;;  %vm609_vm8 = vcmp.ge.f32.partialorder %v458_v2, 0.0  ;;  %v642_v6 = vmul.f32 %v1374_v44, %v458_v2  ;;  %v949_v8 = vpop.f32.mrb[4].mxu0  ;;  %v973_v9 = vpop.f32.mrb[4].mxu1 }
 0x10a   : > { %vm625_vm9 = vcmp.ge.f32.partialorder %v538_v3, 0.0  ;;  %v658_v7 = vmul.f32 %v1374_v44, %v538_v3  ;;  %v675_v10 = vsel %vm610_vm6, %v463_v60, %v643_v4  ;;  %v473_v12 = vadd.f32 %v949_v8, %v1370_v42  ;;  %v467_v14 = vpop.f32.mrb[5].mxu0  ;;  %v547_v15 = vpop.f32.mrb[5].mxu1 }
 0x10b   : > { %v691_v11 = vsel %vm626_vm7, %v543_v61, %v659_v5  ;;  %v553_v13 = vadd.f32 %v973_v9, %v1370_v42  ;;  %707 = vst [vmem:[%s1386_s10 + $0x18] sm:$0xff] %v675_v10  ;;  %v674_v16 = vsel %vm609_vm8, %v458_v2, %v642_v6  ;;  %v468_v18 = vadd.f32 %v1370_v42, %v467_v14 }
 0x10c   : > { %723 = vst [vmem:[%s1386_s10 + $0x98] sm:$0xff] %v691_v11  ;;  %v690_v17 = vsel %vm625_vm9, %v538_v3, %v658_v7  ;;  %v548_v19 = vadd.f32 %v1370_v42, %v547_v15  ;;  %706 = vst [vmem:[%s1386_s10 + $0x10] sm:$0xff] %v674_v16  ;;  %vm612_vm10 = vcmp.ge.f32.partialorder %v473_v12, 0.0  ;;  %v645_v20 = vmul.f32 %v1374_v44, %v473_v12 }
 0x10d   : > { %722 = vst [vmem:[%s1386_s10 + $0x90] sm:$0xff] %v690_v17  ;;  %vm628_vm11 = vcmp.ge.f32.partialorder %v553_v13, 0.0  ;;  %v661_v21 = vmul.f32 %v1374_v44, %v553_v13  ;;  %vm611_vm12 = vcmp.ge.f32.partialorder %v468_v18, 0.0  ;;  %v644_v22 = vmul.f32 %v1374_v44, %v468_v18  ;;  %v952_v24 = vpop.f32.mrb[6].mxu0  ;;  %v976_v25 = vpop.f32.mrb[6].mxu1 }
 0x10e   : > { %vm627_vm13 = vcmp.ge.f32.partialorder %v548_v19, 0.0  ;;  %v660_v23 = vmul.f32 %v1374_v44, %v548_v19  ;;  %v677_v26 = vsel %vm612_vm10, %v473_v12, %v645_v20  ;;  %v483_v28 = vadd.f32 %v952_v24, %v1370_v42  ;;  %v477_v30 = vpop.f32.mrb[7].mxu0  ;;  %v557_v31 = vpop.f32.mrb[7].mxu1 }
 0x10f   : > { %v693_v27 = vsel %vm628_vm11, %v553_v13, %v661_v21  ;;  %v563_v29 = vadd.f32 %v976_v25, %v1370_v42  ;;  %709 = vst [vmem:[%s1386_s10 + $0x28] sm:$0xff] %v677_v26  ;;  %v676_v32 = vsel %vm611_vm12, %v468_v18, %v644_v22  ;;  %v478_v34 = vadd.f32 %v1370_v42, %v477_v30 }
 0x110   : > { %725 = vst [vmem:[%s1386_s10 + $0xa8] sm:$0xff] %v693_v27  ;;  %v692_v33 = vsel %vm627_vm13, %v548_v19, %v660_v23  ;;  %v558_v35 = vadd.f32 %v1370_v42, %v557_v31  ;;  %708 = vst [vmem:[%s1386_s10 + $0x20] sm:$0xff] %v676_v32  ;;  %vm614_vm14 = vcmp.ge.f32.partialorder %v483_v28, 0.0  ;;  %v647_v36 = vmul.f32 %v1374_v44, %v483_v28 }
 0x111   : > { %724 = vst [vmem:[%s1386_s10 + $0xa0] sm:$0xff] %v692_v33  ;;  %vm630_vm15 = vcmp.ge.f32.partialorder %v563_v29, 0.0  ;;  %v663_v37 = vmul.f32 %v1374_v44, %v563_v29  ;;  %vm613_vm0 = vcmp.ge.f32.partialorder %v478_v34, 0.0  ;;  %v646_v38 = vmul.f32 %v1374_v44, %v478_v34  ;;  %v955_v40 = vpop.f32.mrb[8].mxu0  ;;  %v979_v41 = vpop.f32.mrb[8].mxu1 }
 0x112   : > { %vm629_vm1 = vcmp.ge.f32.partialorder %v558_v35, 0.0  ;;  %v662_v39 = vmul.f32 %v1374_v44, %v558_v35  ;;  %v679_v43 = vsel %vm614_vm14, %v483_v28, %v647_v36  ;;  %v493_v46 = vadd.f32 %v955_v40, %v1370_v42  ;;  %v487_v48 = vpop.f32.mrb[9].mxu0  ;;  %v567_v49 = vpop.f32.mrb[9].mxu1 }
 0x113   : > { %v695_v45 = vsel %vm630_vm15, %v563_v29, %v663_v37  ;;  %v573_v47 = vadd.f32 %v979_v41, %v1370_v42  ;;  %711 = vst [vmem:[%s1386_s10 + $0x38] sm:$0xff] %v679_v43  ;;  %v678_v50 = vsel %vm613_vm0, %v478_v34, %v646_v38  ;;  %v488_v52 = vadd.f32 %v1370_v42, %v487_v48 }
 0x114   : > { %727 = vst [vmem:[%s1386_s10 + $0xb8] sm:$0xff] %v695_v45  ;;  %v694_v51 = vsel %vm629_vm1, %v558_v35, %v662_v39  ;;  %v568_v53 = vadd.f32 %v1370_v42, %v567_v49  ;;  %710 = vst [vmem:[%s1386_s10 + $0x30] sm:$0xff] %v678_v50  ;;  %vm616_vm2 = vcmp.ge.f32.partialorder %v493_v46, 0.0  ;;  %v649_v54 = vmul.f32 %v1374_v44, %v493_v46 }
 0x115   : > { %726 = vst [vmem:[%s1386_s10 + $0xb0] sm:$0xff] %v694_v51  ;;  %vm632_vm3 = vcmp.ge.f32.partialorder %v573_v47, 0.0  ;;  %v665_v55 = vmul.f32 %v1374_v44, %v573_v47  ;;  %vm615_vm4 = vcmp.ge.f32.partialorder %v488_v52, 0.0  ;;  %v648_v56 = vmul.f32 %v1374_v44, %v488_v52  ;;  %v958_v58 = vpop.f32.mrb[10].mxu0  ;;  %v982_v59 = vpop.f32.mrb[10].mxu1 }
 0x116   : > { %vm631_vm5 = vcmp.ge.f32.partialorder %v568_v53, 0.0  ;;  %v664_v57 = vmul.f32 %v1374_v44, %v568_v53  ;;  %v681_v60 = vsel %vm616_vm2, %v493_v46, %v649_v54  ;;  %v503_v62 = vadd.f32 %v958_v58, %v1370_v42  ;;  %v497_v0 = vpop.f32.mrb[11].mxu0  ;;  %v577_v1 = vpop.f32.mrb[11].mxu1 }
 0x117   : > { %v697_v61 = vsel %vm632_vm3, %v573_v47, %v665_v55  ;;  %v583_v63 = vadd.f32 %v982_v59, %v1370_v42  ;;  %713 = vst [vmem:[%s1386_s10 + $0x48] sm:$0xff] %v681_v60  ;;  %v680_v2 = vsel %vm615_vm4, %v488_v52, %v648_v56  ;;  %v498_v4 = vadd.f32 %v1370_v42, %v497_v0 }
 0x118   : > { %729 = vst [vmem:[%s1386_s10 + $0xc8] sm:$0xff] %v697_v61  ;;  %v696_v3 = vsel %vm631_vm5, %v568_v53, %v664_v57  ;;  %v578_v5 = vadd.f32 %v1370_v42, %v577_v1  ;;  %712 = vst [vmem:[%s1386_s10 + $0x40] sm:$0xff] %v680_v2  ;;  %vm618_vm6 = vcmp.ge.f32.partialorder %v503_v62, 0.0  ;;  %v651_v6 = vmul.f32 %v1374_v44, %v503_v62 }
 0x119   : > { %728 = vst [vmem:[%s1386_s10 + $0xc0] sm:$0xff] %v696_v3  ;;  %vm634_vm7 = vcmp.ge.f32.partialorder %v583_v63, 0.0  ;;  %v667_v7 = vmul.f32 %v1374_v44, %v583_v63  ;;  %vm617_vm8 = vcmp.ge.f32.partialorder %v498_v4, 0.0  ;;  %v650_v8 = vmul.f32 %v1374_v44, %v498_v4  ;;  %v961_v10 = vpop.f32.mrb[12].mxu0  ;;  %v985_v11 = vpop.f32.mrb[12].mxu1 }
 0x11a   : > { %vm633_vm9 = vcmp.ge.f32.partialorder %v578_v5, 0.0  ;;  %v666_v9 = vmul.f32 %v1374_v44, %v578_v5  ;;  %v683_v12 = vsel %vm618_vm6, %v503_v62, %v651_v6  ;;  %v513_v14 = vadd.f32 %v961_v10, %v1370_v42  ;;  %v507_v16 = vpop.f32.mrb[13].mxu0  ;;  %v587_v17 = vpop.f32.mrb[13].mxu1 }
 0x11b   : > { %v699_v13 = vsel %vm634_vm7, %v583_v63, %v667_v7  ;;  %v593_v15 = vadd.f32 %v985_v11, %v1370_v42  ;;  %715 = vst [vmem:[%s1386_s10 + $0x58] sm:$0xff] %v683_v12  ;;  %v682_v18 = vsel %vm617_vm8, %v498_v4, %v650_v8  ;;  %v508_v20 = vadd.f32 %v1370_v42, %v507_v16 }
 0x11c   : > { %731 = vst [vmem:[%s1386_s10 + $0xd8] sm:$0xff] %v699_v13  ;;  %v698_v19 = vsel %vm633_vm9, %v578_v5, %v666_v9  ;;  %v588_v21 = vadd.f32 %v1370_v42, %v587_v17  ;;  %714 = vst [vmem:[%s1386_s10 + $0x50] sm:$0xff] %v682_v18  ;;  %vm620_vm10 = vcmp.ge.f32.partialorder %v513_v14, 0.0  ;;  %v653_v22 = vmul.f32 %v1374_v44, %v513_v14 }
 0x11d   : > { %730 = vst [vmem:[%s1386_s10 + $0xd0] sm:$0xff] %v698_v19  ;;  %vm636_vm11 = vcmp.ge.f32.partialorder %v593_v15, 0.0  ;;  %v669_v23 = vmul.f32 %v1374_v44, %v593_v15  ;;  %vm619_vm12 = vcmp.ge.f32.partialorder %v508_v20, 0.0  ;;  %v652_v24 = vmul.f32 %v1374_v44, %v508_v20  ;;  %v964_v26 = vpop.f32.mrb[14].mxu0  ;;  %v988_v27 = vpop.f32.mrb[14].mxu1 }
 0x11e   : > { %vm635_vm13 = vcmp.ge.f32.partialorder %v588_v21, 0.0  ;;  %v668_v25 = vmul.f32 %v1374_v44, %v588_v21  ;;  %v685_v28 = vsel %vm620_vm10, %v513_v14, %v653_v22  ;;  %v523_v30 = vadd.f32 %v964_v26, %v1370_v42  ;;  %v517_v32 = vpop.f32.mrb[15].mxu0  ;;  %v597_v33 = vpop.f32.mrb[15].mxu1 }
 0x11f   : > { %v701_v29 = vsel %vm636_vm11, %v593_v15, %v669_v23  ;;  %v603_v31 = vadd.f32 %v988_v27, %v1370_v42  ;;  %717 = vst [vmem:[%s1386_s10 + $0x68] sm:$0xff] %v685_v28  ;;  %v684_v34 = vsel %vm619_vm12, %v508_v20, %v652_v24  ;;  %v518_v36 = vadd.f32 %v1370_v42, %v517_v32 }
 0x120   : > { %733 = vst [vmem:[%s1386_s10 + $0xe8] sm:$0xff] %v701_v29  ;;  %v700_v35 = vsel %vm635_vm13, %v588_v21, %v668_v25  ;;  %v598_v37 = vadd.f32 %v1370_v42, %v597_v33  ;;  %716 = vst [vmem:[%s1386_s10 + $0x60] sm:$0xff] %v684_v34  ;;  %vm622_vm14 = vcmp.ge.f32.partialorder %v523_v30, 0.0  ;;  %v655_v38 = vmul.f32 %v1374_v44, %v523_v30 }
 0x121   : > { %732 = vst [vmem:[%s1386_s10 + $0xe0] sm:$0xff] %v700_v35  ;;  %vm638_vm15 = vcmp.ge.f32.partialorder %v603_v31, 0.0  ;;  %v671_v39 = vmul.f32 %v1374_v44, %v603_v31  ;;  %vm621_vm0 = vcmp.ge.f32.partialorder %v518_v36, 0.0  ;;  %v654_v40 = vmul.f32 %v1374_v44, %v518_v36 }
 0x122   : > { %vm637_vm1 = vcmp.ge.f32.partialorder %v598_v37, 0.0  ;;  %v670_v41 = vmul.f32 %v1374_v44, %v598_v37  ;;  %v687_v42 = vsel %vm622_vm14, %v523_v30, %v655_v38 }
 0x123   : > { %v703_v43 = vsel %vm638_vm15, %v603_v31, %v671_v39  ;;  %719 = vst [vmem:[%s1386_s10 + $0x78] sm:$0xff] %v687_v42  ;;  %v686_v45 = vsel %vm621_vm0, %v518_v36, %v654_v40 }
 0x124   : > { %735 = vst [vmem:[%s1386_s10 + $0xf8] sm:$0xff] %v703_v43  ;;  %v702_v46 = vsel %vm637_vm1, %v598_v37, %v670_v41  ;;  %718 = vst [vmem:[%s1386_s10 + $0x70] sm:$0xff] %v686_v45 }
 0x125   : > { %734 = vst [vmem:[%s1386_s10 + $0xf0] sm:$0xff] %v702_v46 }
 0x126   : > { %1080 = shalt.err (!%p1077_p5)
}
 0x127   : > { %s1081_s27 = scalar_lea.hbm %s1476_s14, 4096  ;;  %s1085_s6 = scalar_lea.hbm %s1536_s4, 8192 }
 0x128   : > { %p1082_p6 = scmp.ne.s32.totalorder %s1476_s14, %s1081_s27  ;;  %p1086_p10 = scmp.lt.u32.totalorder %s1476_s14, %s1536_s4 }
 0x129   : > { %p1087_p11 = scmp.lt.u32.totalorder %s1085_s6, %s1081_s27  ;;  %p1089_p13 = scmp.lt.u32.totalorder %s1081_s27, %s1476_s14 }
 0x12a   : > { %p1083_p7 = pnand %p1082_p6, %p1218_p4 }
 0x12b   : > { %p1088_p12 = por %p1087_p11, %p1086_p10 }
 0x12c   : > { %p1084_p9 = pneg %p1083_p7 }
 0x12d   : > { %p1090_p0 = por %p1089_p13, %p1088_p12 }
 0x12f   : > { %p1091_p1 = pnand %p1090_p0, %p1084_p9 }
 0x131   : > { %1094 = shalt.err (!%p1091_p1)
}
 0x132   : > { %s1148_s9 = smov 128   ;;  %s1149_s10 = smov 8  }
 0x133   : > { %1010 = dma.vmem_to_hbm [thread:$0]  (%p1218_p4), %s1478_s12, 4096, %s1476_s14, %s1486_s15, %s1148_s9, %s1148_s9, %s1149_s10  }
 0x134 PF: > { %p1016_p2 = scmp.ge.s32.totalorder %s1145_s22, 2  ;;  %s767_s11 = sand.u32 1, %s1125_s17  }
 0x135   : > { %s768_s20 = scalar_lea.sflag [#allocation4], %s767_s11 }
 0x136   : > { %p1013_p3 = pnand %p1016_p2, %p1225_p8 }
 0x138   : > { %1120 = dma.done.wait (!%p1013_p3), %s768_s20, 4096  }
 0x139   : > { %1122 = vsyncadd (!%p1013_p3), %s768_s20, 4294963200  ;;  %s18_s22 = sadd.s32 1, %s1145_s22   ;;  %s1539_s17 = smov %s1129_s18 }
 0x13a   : > { %p15_p5 = scmp.ge.s32.totalorder %s18_s22, 4   ;;  %s1540_s18 = smov %s1133_s19 }
 0x13b   : > { %s1541_s19 = smov %s1231_s29  ;;  %s1542_s20 = smov %s1141_s21 }
 0x13c   : > { %s1543_s21 = smov %s1545_s24  ;;  %17 = sbr.rel (!%p15_p5) target bundleno = 6 (0x6), region = 74 }
 0x143   :  { %773 = vsyncpa [#allocation4], 1 }
 0x144   :  { %775 = vsyncpa [#allocation4 + $0x1], 1 }

// kernel: ppm_forward.12
= control target key start
LH: loop header
LB: loop body
LE: loop exit
PB: predicated region body
PF: predicated region fallthrough
CT: control target
= control target key end

     0   :  { %v551_v0 = vmov 0.0|0.0   ;;  %vm552_vm0 = vmmov 0   ;;  %v553_v4 = vmov 0.0   ;;  %s814_s1 = inlined_call_operand.vmem [shape: f32[128,128], index: 1, kind: input, shape index: {}]   ;;  %s815_s2 = inlined_call_operand.vmem [shape: f32[128,128], index: 2, kind: input, shape index: {}]   ;;  %s816_s0 = inlined_call_operand.vmem [shape: f32[72,128], index: 0, kind: input, shape index: {}]   ;;  %s817_s3 = inlined_call_operand.vmem [shape: f32[1,128], index: 3, kind: input, shape index: {}]   ;;  %s818_s4 = inlined_call_operand.<no memory space> [shape: f32[1], index: 4, kind: input, shape index: {}]   ;;  %s819_s5 = inlined_call_operand.vmem [shape: f32[72,128], index: 5, kind: output, shape index: {}]  }
   0x1   :  { %500 = vmatprep.subr.bf16.mxu0 %v551_v0  ;;  %v30_v1 = vld [vmem:[%s814_s1] sm:$0xff]  ;;  %v31_v2 = vld [vmem:[%s814_s1 + $0x8] sm:$0xff]  ;;  %v32_v3 = vld [vmem:[%s814_s1 + $0x10] sm:$0xff]  ;;  %414 = vmatprep.mubr.msk.f32.mxu0 %vm552_vm0, %v553_v4  ;;  %v751_v61 = vstv %s818_s4 }
   0x2   :  { %v501_v5 = vpack.c.bf16 %v31_v2, %v30_v1  ;;  %v33_v6 = vld [vmem:[%s814_s1 + $0x18] sm:$0xff]  ;;  %524 = vmatprep.subr.bf16.mxu1 %v551_v0  ;;  %473 = vmatprep.mubr.msk.f32.mxu1 %vm552_vm0, %v553_v4  ;;  %v34_v8 = vld [vmem:[%s814_s1 + $0x20] sm:$0xff]  ;;  %v35_v9 = vld [vmem:[%s814_s1 + $0x28] sm:$0xff] }
   0x3   :  { %v504_v7 = vpack.c.bf16 %v33_v6, %v32_v3  ;;  %v507_v10 = vpack.c.bf16 %v35_v9, %v34_v8  ;;  %v36_v11 = vld [vmem:[%s814_s1 + $0x30] sm:$0xff]  ;;  %v37_v12 = vld [vmem:[%s814_s1 + $0x38] sm:$0xff]  ;;  %v192_v13 = vld [vmem:[%s815_s2] sm:$0xff] }
   0x4   :  { %502 = vmatpush3.bf16.msra.mxu0 %v501_v5  ;;  %v193_v14 = vld [vmem:[%s815_s2 + $0x8] sm:$0xff]  ;;  %v194_v16 = vld [vmem:[%s815_s2 + $0x10] sm:$0xff]  ;;  %v195_v17 = vld [vmem:[%s815_s2 + $0x18] sm:$0xff]  ;;  %v510_v18 = vpack.c.bf16 %v37_v12, %v36_v11 }
   0x5   :  { %503 = vmatprep.subr.bf16.mxu0 %v551_v0  ;;  %v525_v15 = vpack.c.bf16 %v193_v14, %v192_v13  ;;  %v38_v19 = vld [vmem:[%s814_s1 + $0x40] sm:$0xff]  ;;  %v528_v20 = vpack.c.bf16 %v195_v17, %v194_v16  ;;  %v39_v21 = vld [vmem:[%s814_s1 + $0x48] sm:$0xff]  ;;  %v40_v25 = vld [vmem:[%s814_s1 + $0x50] sm:$0xff] }
   0x6   :  { %v196_v22 = vld [vmem:[%s815_s2 + $0x20] sm:$0xff]  ;;  %v197_v23 = vld [vmem:[%s815_s2 + $0x28] sm:$0xff]  ;;  %v513_v24 = vpack.c.bf16 %v39_v21, %v38_v19  ;;  %v41_v27 = vld [vmem:[%s814_s1 + $0x58] sm:$0xff] }
   0x7   :  { %526 = vmatpush3.bf16.msra.mxu1 %v525_v15  ;;  %v531_v26 = vpack.c.bf16 %v197_v23, %v196_v22  ;;  %v198_v28 = vld [vmem:[%s815_s2 + $0x30] sm:$0xff]  ;;  %v199_v29 = vld [vmem:[%s815_s2 + $0x38] sm:$0xff]  ;;  %v516_v30 = vpack.c.bf16 %v41_v27, %v40_v25  ;;  %v42_v31 = vld [vmem:[%s814_s1 + $0x60] sm:$0xff] }
   0x8   :  { %505 = vmatpush3.bf16.msra.mxu0 %v504_v7  ;;  %527 = vmatprep.subr.bf16.mxu1 %v551_v0  ;;  %v534_v32 = vpack.c.bf16 %v199_v29, %v198_v28  ;;  %v43_v33 = vld [vmem:[%s814_s1 + $0x68] sm:$0xff]  ;;  %v200_v34 = vld [vmem:[%s815_s2 + $0x40] sm:$0xff]  ;;  %v44_v37 = vld [vmem:[%s814_s1 + $0x70] sm:$0xff] }
   0x9   :  { %506 = vmatprep.subr.bf16.mxu0 %v551_v0  ;;  %v201_v35 = vld [vmem:[%s815_s2 + $0x48] sm:$0xff]  ;;  %v519_v36 = vpack.c.bf16 %v43_v33, %v42_v31  ;;  %v45_v39 = vld [vmem:[%s814_s1 + $0x78] sm:$0xff]  ;;  %v202_v40 = vld [vmem:[%s815_s2 + $0x50] sm:$0xff] }
   0xa   :  { %v537_v38 = vpack.c.bf16 %v201_v35, %v200_v34  ;;  %v203_v41 = vld [vmem:[%s815_s2 + $0x58] sm:$0xff]  ;;  %v522_v42 = vpack.c.bf16 %v45_v39, %v44_v37  ;;  %v204_v44 = vld [vmem:[%s815_s2 + $0x60] sm:$0xff]  ;;  %v205_v45 = vld [vmem:[%s815_s2 + $0x68] sm:$0xff] }
   0xb   :  { %529 = vmatpush3.bf16.msra.mxu1 %v528_v20  ;;  %v540_v43 = vpack.c.bf16 %v203_v41, %v202_v40  ;;  %v21_v46 = vld [vmem:[%s816_s0] sm:$0xff]  ;;  %v543_v47 = vpack.c.bf16 %v205_v45, %v204_v44  ;;  %v22_v48 = vld [vmem:[%s816_s0 + $0x8] sm:$0xff]  ;;  %v23_v49 = vld [vmem:[%s816_s0 + $0x10] sm:$0xff] }
   0xc   :  { %508 = vmatpush3.bf16.msra.mxu0 %v507_v10  ;;  %530 = vmatprep.subr.bf16.mxu1 %v551_v0  ;;  %v24_v50 = vld [vmem:[%s816_s0 + $0x18] sm:$0xff]  ;;  %v25_v51 = vld [vmem:[%s816_s0 + $0x20] sm:$0xff]  ;;  %v26_v52 = vld [vmem:[%s816_s0 + $0x28] sm:$0xff] }
   0xd   :  { %509 = vmatprep.subr.bf16.mxu0 %v551_v0  ;;  %v27_v53 = vld [vmem:[%s816_s0 + $0x30] sm:$0xff]  ;;  %v28_v54 = vld [vmem:[%s816_s0 + $0x38] sm:$0xff]  ;;  %v29_v55 = vld [vmem:[%s816_s0 + $0x40] sm:$0xff] }
   0xe   :  { %v206_v56 = vld [vmem:[%s815_s2 + $0x70] sm:$0xff]  ;;  %v207_v57 = vld [vmem:[%s815_s2 + $0x78] sm:$0xff]  ;;  %v746_v59 = vld [vmem:[%s817_s3] ss:$0 sm:$0xff] }
   0xf   :  { %532 = vmatpush3.bf16.msra.mxu1 %v531_v26  ;;  %v546_v58 = vpack.c.bf16 %v207_v57, %v206_v56 }
  0x10   :  { %511 = vmatpush3.bf16.msra.mxu0 %v510_v18  ;;  %533 = vmatprep.subr.bf16.mxu1 %v551_v0 }
  0x11   :  { %512 = vmatprep.subr.bf16.mxu0 %v551_v0 }
  0x13   :  { %535 = vmatpush3.bf16.msra.mxu1 %v534_v32 }
  0x14   :  { %514 = vmatpush3.bf16.msra.mxu0 %v513_v24  ;;  %536 = vmatprep.subr.bf16.mxu1 %v551_v0 }
  0x15   :  { %515 = vmatprep.subr.bf16.mxu0 %v551_v0 }
  0x17   :  { %538 = vmatpush3.bf16.msra.mxu1 %v537_v38 }
  0x18   :  { %517 = vmatpush3.bf16.msra.mxu0 %v516_v30  ;;  %539 = vmatprep.subr.bf16.mxu1 %v551_v0 }
  0x19   :  { %518 = vmatprep.subr.bf16.mxu0 %v551_v0 }
  0x1b   :  { %541 = vmatpush3.bf16.msra.mxu1 %v540_v43 }
  0x1c   :  { %520 = vmatpush3.bf16.msra.mxu0 %v519_v36  ;;  %542 = vmatprep.subr.bf16.mxu1 %v551_v0 }
  0x1d   :  { %521 = vmatprep.subr.bf16.mxu0 %v551_v0 }
  0x1f   :  { %544 = vmatpush3.bf16.msra.mxu1 %v543_v47 }
  0x20   :  { %523 = vmatpush3.bf16.msra.mxu0 %v522_v42  ;;  %545 = vmatprep.subr.bf16.mxu1 %v551_v0 }
  0x23   :  { %415 = vmatmul.mubr.f32.vlgmr.msra.gmra.mrb[0].mxu0 %v21_v46  ;;  %547 = vmatpush3.bf16.msra.mxu1 %v546_v58 }
  0x24   :  { %417 = vmatprep.mubr.msk.f32.mxu0 %vm552_vm0, %v553_v4 }
  0x27   :  { %418 = vmatmul.mubr.f32.gmra.mrb[2].mxu0 %v22_v48 }
  0x28   :  { %420 = vmatprep.mubr.msk.f32.mxu0 %vm552_vm0, %v553_v4 }
  0x2b   :  { %421 = vmatmul.mubr.f32.gmra.mrb[4].mxu0 %v23_v49 }
  0x2c   :  { %423 = vmatprep.mubr.msk.f32.mxu0 %vm552_vm0, %v553_v4 }
  0x2f   :  { %424 = vmatmul.mubr.f32.gmra.mrb[6].mxu0 %v24_v50 }
  0x30   :  { %426 = vmatprep.mubr.msk.f32.mxu0 %vm552_vm0, %v553_v4 }
  0x33   :  { %427 = vmatmul.mubr.f32.gmra.mrb[8].mxu0 %v25_v51 }
  0x34   :  { %429 = vmatprep.mubr.msk.f32.mxu0 %vm552_vm0, %v553_v4 }
  0x37   :  { %430 = vmatmul.mubr.f32.gmra.mrb[10].mxu0 %v26_v52 }
  0x38   :  { %432 = vmatprep.mubr.msk.f32.mxu0 %vm552_vm0, %v553_v4 }
  0x3b   :  { %433 = vmatmul.mubr.f32.gmra.mrb[12].mxu0 %v27_v53 }
  0x3c   :  { %435 = vmatprep.mubr.msk.f32.mxu0 %vm552_vm0, %v553_v4 }
  0x3f   :  { %436 = vmatmul.mubr.f32.gmra.mrb[14].mxu0 %v28_v54 }
  0x40   :  { %438 = vmatprep.mubr.msk.f32.mxu0 %vm552_vm0, %v553_v4 }
  0x43   :  { %439 = vmatmul.mubr.f32.gmra.mrb[16].mxu0 %v29_v55 }
  0xf6   :  { %v119_v60 = vpop.f32.mrb[0].mxu0 }
  0xf7   :  { %v120_v62 = vadd.f32 %v746_v59, %v119_v60  ;;  %v416_v63 = vpop.f32.mrb[1].mxu0 }
  0xf9   :  { %v174_v0 = vmul.f32 %v751_v61, %v120_v62  ;;  %vm164_vm1 = vcmp.ge.f32.partialorder %v120_v62, 0.0 }
  0xfa   :  { %v124_v1 = vpop.f32.mrb[2].mxu0 }
  0xfb   :  { %v125_v2 = vadd.f32 %v746_v59, %v124_v1  ;;  %v419_v3 = vpop.f32.mrb[3].mxu0  ;;  %v183_v5 = vsel %vm164_vm1, %v120_v62, %v174_v0 }
  0xfc   :  { %474 = vmatmul.mubr.f32.vlgmr.msra.gmra.mrb[0].mxu1 %v183_v5 }
  0xfd   :  { %v175_v6 = vmul.f32 %v751_v61, %v125_v2  ;;  %476 = vmatprep.mubr.msk.f32.mxu1 %vm552_vm0, %v553_v4  ;;  %vm165_vm2 = vcmp.ge.f32.partialorder %v125_v2, 0.0 }
  0xfe   :  { %v129_v7 = vpop.f32.mrb[4].mxu0 }
  0xff   :  { %v130_v8 = vadd.f32 %v746_v59, %v129_v7  ;;  %v422_v9 = vpop.f32.mrb[5].mxu0  ;;  %v184_v10 = vsel %vm165_vm2, %v125_v2, %v175_v6 }
 0x100   :  { %477 = vmatmul.mubr.f32.gmra.mrb[2].mxu1 %v184_v10 }
 0x101   :  { %v176_v11 = vmul.f32 %v751_v61, %v130_v8  ;;  %479 = vmatprep.mubr.msk.f32.mxu1 %vm552_vm0, %v553_v4  ;;  %vm166_vm3 = vcmp.ge.f32.partialorder %v130_v8, 0.0 }
 0x102   :  { %v134_v12 = vpop.f32.mrb[6].mxu0 }
 0x103   :  { %v135_v13 = vadd.f32 %v746_v59, %v134_v12  ;;  %v425_v14 = vpop.f32.mrb[7].mxu0  ;;  %v185_v15 = vsel %vm166_vm3, %v130_v8, %v176_v11 }
 0x104   :  { %480 = vmatmul.mubr.f32.gmra.mrb[4].mxu1 %v185_v15 }
 0x105   :  { %v177_v16 = vmul.f32 %v751_v61, %v135_v13  ;;  %482 = vmatprep.mubr.msk.f32.mxu1 %vm552_vm0, %v553_v4  ;;  %vm167_vm4 = vcmp.ge.f32.partialorder %v135_v13, 0.0 }
 0x106   :  { %v139_v17 = vpop.f32.mrb[8].mxu0 }
 0x107   :  { %v140_v18 = vadd.f32 %v746_v59, %v139_v17  ;;  %v428_v19 = vpop.f32.mrb[9].mxu0  ;;  %v186_v20 = vsel %vm167_vm4, %v135_v13, %v177_v16 }
 0x108   :  { %483 = vmatmul.mubr.f32.gmra.mrb[6].mxu1 %v186_v20 }
 0x109   :  { %v178_v21 = vmul.f32 %v751_v61, %v140_v18  ;;  %485 = vmatprep.mubr.msk.f32.mxu1 %vm552_vm0, %v553_v4  ;;  %vm168_vm5 = vcmp.ge.f32.partialorder %v140_v18, 0.0 }
 0x10a   :  { %v144_v22 = vpop.f32.mrb[10].mxu0 }
 0x10b   :  { %v145_v23 = vadd.f32 %v746_v59, %v144_v22  ;;  %v431_v24 = vpop.f32.mrb[11].mxu0  ;;  %v187_v25 = vsel %vm168_vm5, %v140_v18, %v178_v21 }
 0x10c   :  { %486 = vmatmul.mubr.f32.gmra.mrb[8].mxu1 %v187_v25 }
 0x10d   :  { %v179_v26 = vmul.f32 %v751_v61, %v145_v23  ;;  %488 = vmatprep.mubr.msk.f32.mxu1 %vm552_vm0, %v553_v4  ;;  %vm169_vm6 = vcmp.ge.f32.partialorder %v145_v23, 0.0 }
 0x10e   :  { %v149_v27 = vpop.f32.mrb[12].mxu0 }
 0x10f   :  { %v150_v28 = vadd.f32 %v746_v59, %v149_v27  ;;  %v434_v29 = vpop.f32.mrb[13].mxu0  ;;  %v188_v30 = vsel %vm169_vm6, %v145_v23, %v179_v26 }
 0x110   :  { %489 = vmatmul.mubr.f32.gmra.mrb[10].mxu1 %v188_v30 }
 0x111   :  { %v180_v31 = vmul.f32 %v751_v61, %v150_v28  ;;  %491 = vmatprep.mubr.msk.f32.mxu1 %vm552_vm0, %v553_v4  ;;  %vm170_vm7 = vcmp.ge.f32.partialorder %v150_v28, 0.0 }
 0x112   :  { %v154_v32 = vpop.f32.mrb[14].mxu0 }
 0x113   :  { %v155_v33 = vadd.f32 %v746_v59, %v154_v32  ;;  %v437_v34 = vpop.f32.mrb[15].mxu0  ;;  %v189_v35 = vsel %vm170_vm7, %v150_v28, %v180_v31 }
 0x114   :  { %492 = vmatmul.mubr.f32.gmra.mrb[12].mxu1 %v189_v35 }
 0x115   :  { %v181_v36 = vmul.f32 %v751_v61, %v155_v33  ;;  %494 = vmatprep.mubr.msk.f32.mxu1 %vm552_vm0, %v553_v4  ;;  %vm171_vm8 = vcmp.ge.f32.partialorder %v155_v33, 0.0 }
 0x116   :  { %v159_v37 = vpop.f32.mrb[16].mxu0 }
 0x117   :  { %v160_v38 = vadd.f32 %v746_v59, %v159_v37  ;;  %v440_v39 = vpop.f32.mrb[17].mxu0  ;;  %v190_v40 = vsel %vm171_vm8, %v155_v33, %v181_v36 }
 0x118   :  { %495 = vmatmul.mubr.f32.gmra.mrb[14].mxu1 %v190_v40 }
 0x119   :  { %v182_v41 = vmul.f32 %v751_v61, %v160_v38  ;;  %497 = vmatprep.mubr.msk.f32.mxu1 %vm552_vm0, %v553_v4  ;;  %vm172_vm9 = vcmp.ge.f32.partialorder %v160_v38, 0.0 }
 0x11b   :  { %v191_v42 = vsel %vm172_vm9, %v160_v38, %v182_v41 }
 0x11c   :  { %498 = vmatmul.mubr.f32.gmra.mrb[16].mxu1 %v191_v42 }
 0x1cf   :  { %v274_v43 = vpop.f32.mrb[0].mxu1 }
 0x1d0   :  { %318 = vst [vmem:[%s819_s5] sm:$0xff] %v274_v43  ;;  %v475_v44 = vpop.f32.mrb[1].mxu1 }
 0x1d3   :  { %v279_v45 = vpop.f32.mrb[2].mxu1 }
 0x1d4   :  { %319 = vst [vmem:[%s819_s5 + $0x8] sm:$0xff] %v279_v45  ;;  %v478_v46 = vpop.f32.mrb[3].mxu1 }
 0x1d7   :  { %v284_v47 = vpop.f32.mrb[4].mxu1 }
 0x1d8   :  { %320 = vst [vmem:[%s819_s5 + $0x10] sm:$0xff] %v284_v47  ;;  %v481_v4 = vpop.f32.mrb[5].mxu1 }
 0x1db   :  { %v289_v48 = vpop.f32.mrb[6].mxu1 }
 0x1dc   :  { %321 = vst [vmem:[%s819_s5 + $0x18] sm:$0xff] %v289_v48  ;;  %v484_v49 = vpop.f32.mrb[7].mxu1 }
 0x1df   :  { %v294_v50 = vpop.f32.mrb[8].mxu1 }
 0x1e0   :  { %322 = vst [vmem:[%s819_s5 + $0x20] sm:$0xff] %v294_v50  ;;  %v487_v51 = vpop.f32.mrb[9].mxu1 }
 0x1e3   :  { %v299_v52 = vpop.f32.mrb[10].mxu1 }
 0x1e4   :  { %323 = vst [vmem:[%s819_s5 + $0x28] sm:$0xff] %v299_v52  ;;  %v490_v53 = vpop.f32.mrb[11].mxu1 }
 0x1e7   :  { %v304_v54 = vpop.f32.mrb[12].mxu1 }
 0x1e8   :  { %324 = vst [vmem:[%s819_s5 + $0x30] sm:$0xff] %v304_v54  ;;  %v493_v55 = vpop.f32.mrb[13].mxu1 }
 0x1eb   :  { %v309_v56 = vpop.f32.mrb[14].mxu1 }
 0x1ec   :  { %325 = vst [vmem:[%s819_s5 + $0x38] sm:$0xff] %v309_v56  ;;  %v496_v57 = vpop.f32.mrb[15].mxu1 }
 0x1ef   :  { %v314_v58 = vpop.f32.mrb[16].mxu1 }
 0x1f0   :  { %326 = vst [vmem:[%s819_s5 + $0x40] sm:$0xff] %v314_v58  ;;  %v499_v59 = vpop.f32.mrb[17].mxu1 }

</bundles_post_ra>
